<compile_context>
chip_gen: v7x
topology: tpu7x:2x2x1
jax: 0.10.0
libtpu: 0.0.40
codegen_flags: <defaults>
</compile_context>

<pallas_src>
import functools

import jax
import jax.numpy as jnp
from jax.experimental import pallas as pl
from jax.experimental.pallas import tpu as pltpu


# ----------------------------------------------------------------------------
# helpers
# ----------------------------------------------------------------------------
def _rup(x, m):
    return ((x + m - 1) // m) * m


def _default_tile_px():
    """Target output pixels per grid step (2048-4096 on v5e/v6e, 2048 on v7x)."""
    try:
        kind = jax.devices()[0].device_kind.lower()
    except Exception:
        return 2048
    if "v5" in kind or "v6" in kind:
        return 4096          # 128 MiB VMEM -> go big
    return 2048              # v7x (64 MiB VMEM) and anything unknown


def _pick_row_tile(OH, OW, target_px):
    """Largest TR dividing OH with 8 | TR*OW and TR*OW <= target_px."""
    cands = [t for t in range(1, OH + 1)
             if OH % t == 0 and (t * OW) % 8 == 0 and t * OW <= target_px]
    # Fallback TR=OH: the output block is full-extent (exempt from (8,128)).
    return max(cands) if cands else OH


def _vmem_padded_bytes(shape, itemsize, sublane):
    """Conservative VMEM footprint of a buffer with (sublane, 128) tiling."""
    if len(shape) == 1:
        return _rup(shape[0], 128) * itemsize
    lead = 1
    for d in shape[:-2]:
        lead *= d
    return lead * _rup(shape[-2], sublane) * _rup(shape[-1], 128) * itemsize


# ----------------------------------------------------------------------------
# Pallas kernel: NB images x (TR x OW) output pixels per grid step.
# In-kernel im2col into a VMEM patch, then one K = KH*KW*C GEMM on the MXU
# (f32 accumulation), bias + optional ReLU fused in the f32 epilogue.
# ----------------------------------------------------------------------------
def _conv_tile_kernel(xph_ref, w_ref, b_ref, o_ref, patch_ref, *,
                      KH, KW, stride, NB, TR, OW, C, apply_relu):
    """Refs:
      xph_ref  : (NB*s*s, Hs, Ws, C)   stride-phase decomposed padded images
      w_ref    : (KH*KW*C, OCp)        weights (grid-constant, single-buffered)
      b_ref    : (1, OCp) f32          bias   (grid-constant, single-buffered)
      o_ref    : (NB, TR*OW, OCp)      lane-dense output tile
      patch_ref: (NB*TR*OW, KH*KW*C)   VMEM scratch: in-kernel im2col patch
    """
    s = stride
    TMi = TR * OW
    r0 = pl.program_id(1) * TR                      # first output row of tile

    # ---- in-kernel im2col: build the patch once (no HBM blow-up) ----
    for bimg in range(NB):                          # static unroll
        base = bimg * s * s
        for i in range(KH):
            for j in range(KW):
                ph = (i % s) * s + (j % s)          # stride phase
                di, dj = i // s, j // s             # offset inside the phase
                xs = xph_ref[base + ph, pl.ds(r0 + di, TR), dj:dj + OW, :]
                t = i * KW + j
                patch_ref[bimg * TMi:(bimg + 1) * TMi, t * C:(t + 1) * C] = (
                    xs.reshape(TMi, C))

    # ---- single GEMM, K = KH*KW*C, f32 accumulation on the MXU ----
    out = jnp.dot(patch_ref[...], w_ref[...],
                  preferred_element_type=jnp.float32)
    out = out + b_ref[...]                          # f32 epilogue
    if apply_relu:
        out = jnp.maximum(out, 0.0)
    out = out.astype(o_ref.dtype)
    for bimg in range(NB):
        o_ref[bimg] = out[bimg * TMi:(bimg + 1) * TMi]


# ----------------------------------------------------------------------------
# One Conv2d layer
# ----------------------------------------------------------------------------
def conv2d_pallas(x_nhwc, w, b, stride, padding, apply_relu, *,
                  compute_dtype=jnp.bfloat16, target_px=None):
    """One Conv2d layer (cross-correlation, like PyTorch) via a fused kernel.

    x_nhwc : (N, H, W, Cin); Cin may exceed w.shape[1] (lane-padded channels
             carried from the previous layer) -- the extra channels are
             neutralized by zero-padding the weights along input-C.
    w      : (OC, CR, KH, KW)  -- PyTorch Conv2d weight layout
    b      : (OC,)
    Returns (N, OH, OW, OCp) in compute_dtype; only [..., :OC] is meaningful
    (padded output lanes are exactly zero).
    """
    OC, CR, KH, KW = w.shape
    N, H, W, Cin = x_nhwc.shape
    s = int(stride)
    assert Cin >= CR, "input must carry at least the layer's real channels"
    if target_px is None:
        target_px = _default_tile_px()

    # ---- channel pad to a multiple of 8 (sublane-friendly patch stripes) ----
    Cp = _rup(max(Cin, CR), 8)
    if Cp != Cin:
        x_nhwc = jnp.pad(x_nhwc, ((0, 0), (0, 0), (0, 0), (0, Cp - Cin)))
    x_nhwc = x_nhwc.astype(compute_dtype)

    # ---- glue (plain JAX, ~1x data): spatial pad + stride-phase decompose ----
    xp = jnp.pad(x_nhwc, ((0, 0), (padding, padding), (padding, padding), (0, 0)))
    Hp, Wp = xp.shape[1], xp.shape[2]
    OH = (Hp - KH) // s + 1
    OW = (Wp - KW) // s + 1

    # phase layout: xph[n*s*s + p*s + q, hh, ww, c] == xp[n, s*hh + p, s*ww + q, c]
    Hs = max(-(-Hp // s), OH + (KH - 1) // s)
    Ws = max(-(-Wp // s), OW + (KW - 1) // s)
    xp = jnp.pad(xp, ((0, 0), (0, Hs * s - Hp), (0, Ws * s - Wp), (0, 0)))
    if s == 1:
        xph = xp                                            # (N, Hs, Ws, Cp)
    else:
        xph = xp.reshape(N, Hs, s, Ws, s, Cp).transpose(0, 2, 4, 1, 3, 5)
        xph = xph.reshape(N * s * s, Hs, Ws, Cp)

    # ---- weights: (OC,CR,KH,KW) -> (KH*KW*Cp, OCp), zero-padded C and OC ----
    OCp = _rup(OC, 128)
    K = KH * KW * Cp
    wk = jnp.transpose(w, (2, 3, 1, 0))                     # (KH, KW, CR, OC)
    wk = jnp.pad(wk, ((0, 0), (0, 0), (0, Cp - CR), (0, OCp - OC)))
    wmat = wk.reshape(K, OCp).astype(compute_dtype)
    bmat = jnp.pad(b.reshape(1, OC).astype(jnp.float32),
                   ((0, 0), (0, OCp - OC)))

    # ---- tiling: big row tiles, and pack images when OH*OW is tiny ----
    TR = _pick_row_tile(OH, OW, target_px)
    NB = 1
    if TR == OH and N > 1:
        cap = max(1, target_px // max(1, OH * OW))
        for nb in range(min(N, cap), 0, -1):
            if N % nb == 0:
                NB = nb
                break
    TMi = TR * OW
    n_rt = OH // TR
    n_bt = N // NB

    # ---- VMEM budget -> explicit vmem_limit_bytes + slab buffer count ----
    isz = jnp.dtype(compute_dtype).itemsize
    sub = 8 * (4 // isz)                                    # 8 for f32, 16 for bf16
    slab_b = _vmem_padded_bytes((NB * s * s, Hs, Ws, Cp), isz, sub)
    w_b = _vmem_padded_bytes((K, OCp), isz, sub)
    bias_b = _vmem_padded_bytes((1, OCp), 4, 8)
    out_b = _vmem_padded_bytes((NB, TMi, OCp), isz, sub)
    patch_b = _vmem_padded_bytes((NB * TMi, K), isz, sub)
    acc_b = _vmem_padded_bytes((NB * TMi, OCp), 4, 8)       # f32 dot temporaries
    slab_bufs = 1 if slab_b > 12 * 2 ** 20 else 2           # v7x VMEM relief
    resident = slab_bufs * slab_b + w_b + bias_b + 2 * out_b + patch_b + 2 * acc_b
    vmem_limit = int(min(max(2 * resident, 32 * 2 ** 20), 64 * 2 ** 20))

    slab_kwargs = {}
    if slab_bufs == 1:
        slab_kwargs["pipeline_mode"] = pl.Buffered(1)

    kernel = functools.partial(_conv_tile_kernel, KH=KH, KW=KW, stride=s,
                               NB=NB, TR=TR, OW=OW, C=Cp, apply_relu=apply_relu)

    cost = pl.CostEstimate(
        flops=2 * N * OH * OW * K * OCp,
        transcendentals=0,
        bytes_accessed=int(isz * (N * s * s * Hs * Ws * Cp + K * OCp
                                  + N * OH * OW * OCp) + 4 * OCp),
    )

    out = pl.pallas_call(
        kernel,
        out_shape=jax.ShapeDtypeStruct((N, OH * OW, OCp), compute_dtype),
        grid_spec=pltpu.PrefetchScalarGridSpec(
            num_scalar_prefetch=0,
            grid=(n_bt, n_rt),
            in_specs=[
                # Per-group phase slab: constant block index along the row-tile
                # axis -> DMA'd once per image group, resident across row tiles.
                pl.BlockSpec((NB * s * s, Hs, Ws, Cp),
                             lambda n, r: (n, 0, 0, 0), **slab_kwargs),
                # Grid-constant weights & bias: single-buffered.
                pl.BlockSpec((K, OCp), lambda n, r: (0, 0),
                             pipeline_mode=pl.Buffered(1)),
                pl.BlockSpec((1, OCp), lambda n, r: (0, 0),
                             pipeline_mode=pl.Buffered(1)),
            ],
            out_specs=pl.BlockSpec((NB, TMi, OCp), lambda n, r: (n, r, 0)),
            scratch_shapes=[pltpu.VMEM((NB * TMi, K), compute_dtype)],
        ),
        compiler_params=pltpu.CompilerParams(
            dimension_semantics=("parallel", "parallel"),
            vmem_limit_bytes=vmem_limit),
        cost_estimate=cost,
    )(xph, wmat, bmat)

    # Keep the lane-dense OCp channels for chaining; caller slices [..., :OC]
    # once at the very end of the network.
    return out.reshape(N, OH, OW, OCp)


# ----------------------------------------------------------------------------
# Conv2dNet
# ----------------------------------------------------------------------------
class Conv2dNet:
    """JAX/Pallas port of the PyTorch Conv2dNet module.

    convs: list of tuples, each (out_channels, kernel_size[, stride[, padding]])
           mirroring nn.Conv2d positional args.  Activation is ReLU.
    """

    def __init__(self, in_channels=3, convs=(), activate_last=False, seed=0,
                 compute_dtype=jnp.bfloat16, target_px=None):
        self.layer_cfgs = []
        self.params = []
        key = jax.random.PRNGKey(seed)
        ci = in_channels
        for p in convs:
            oc = p[0]
            k = p[1]
            stride = p[2] if len(p) > 2 else 1
            padding = p[3] if len(p) > 3 else 0
            key, kw, kb = jax.random.split(key, 3)
            fan_in = ci * k * k
            bound = 1.0 / float(fan_in) ** 0.5
            wgt = jax.random.uniform(kw, (oc, ci, k, k), jnp.float32, -bound, bound)
            bias = jax.random.uniform(kb, (oc,), jnp.float32, -bound, bound)
            self.params.append((wgt, bias))
            self.layer_cfgs.append((stride, padding))
            ci = oc
        self.nlayers = len(convs)
        self.activate_last = activate_last
        self.compute_dtype = compute_dtype
        self.target_px = target_px

    def __call__(self, x_nchw, compute_dtype=None):
        cd = self.compute_dtype if compute_dtype is None else compute_dtype
        # NCHW (PyTorch) -> NHWC for the kernels.
        x = jnp.transpose(x_nchw, (0, 2, 3, 1)).astype(jnp.float32)
        oc = x.shape[-1]
        for i in range(self.nlayers):
            w, b = self.params[i]
            stride, padding = self.layer_cfgs[i]
            is_last = i == self.nlayers - 1
            apply_relu = (not is_last) or self.activate_last
            x = conv2d_pallas(x, w, b, stride, padding, apply_relu,
                              compute_dtype=cd, target_px=self.target_px)
            oc = w.shape[0]
        # Drop the lane-padded channels once, at the end of the network.
        x = x[..., :oc].astype(jnp.float32)
        # NHWC -> NCHW to match PyTorch output layout.
        return jnp.transpose(x, (0, 3, 1, 2))


# ----------------------------------------------------------------------------
# Reference (plain JAX) for correctness checking
# ----------------------------------------------------------------------------
def _reference_forward(net, x_nchw):
    x = x_nchw
    for i in range(net.nlayers):
        w, b = net.params[i]
        stride, padding = net.layer_cfgs[i]
        x = jax.lax.conv_general_dilated(
            x, w,
            window_strides=(stride, stride),
            padding=[(padding, padding), (padding, padding)],
            dimension_numbers=("NCHW", "OIHW", "NCHW"),
        ) + b.reshape(1, -1, 1, 1)
        is_last = i == net.nlayers - 1
        if (not is_last) or net.activate_last:
            x = jnp.maximum(x, 0.0)
    return x


if __name__ == "__main__":
    key = jax.random.PRNGKey(0)
    x = jax.random.normal(key, (2, 4, 16, 16), dtype=jnp.float32)  # NCHW

    # Equivalent of: Conv2dNet(4, [(8,3,1,1), (16,3,2,1), (32,3,1,1)], F.relu, False)
    net = Conv2dNet(in_channels=4,
                    convs=[(8, 3, 1, 1), (16, 3, 2, 1), (32, 3, 1, 1)],
                    activate_last=False,
                    seed=0)

    ref = jax.block_until_ready(_reference_forward(net, x))

    # f32 operand path: tight numerical check against the plain-JAX reference.
    out_f32 = jax.block_until_ready(net(x, compute_dtype=jnp.float32))
    assert out_f32.shape == ref.shape == (2, 32, 8, 8), out_f32.shape
    assert jnp.allclose(out_f32, ref, atol=1e-4, rtol=1e-4), "f32 mismatch"

    # bf16 operand path (default, per perf review): looser tolerance dominated
    # by bf16 input/weight quantization, accumulation stays f32.
    out_bf16 = jax.block_until_ready(net(x))
    assert out_bf16.shape == ref.shape, out_bf16.shape
    max_err = float(jnp.max(jnp.abs(out_bf16 - ref)))
    assert max_err < 5e-2, f"bf16 mismatch: max abs err {max_err}"

    print("KERNEL_OK")
</pallas_src>

<mosaic_0001>
module attributes {stable_mosaic.version = 11 : i64} {
  func.func @_conv_tile_kernel(%arg0: i32, %arg1: i32, %arg2: memref<2x18x18x8xf32, #tpu.memory_space<vmem>>, %arg3: memref<72x128xf32, #tpu.memory_space<vmem>>, %arg4: memref<1x128xf32, #tpu.memory_space<vmem>>, %arg5: memref<2x256x128xf32, #tpu.memory_space<vmem>>, %arg6: memref<512x72xf32, #tpu.memory_space<vmem>>) attributes {dimension_semantics = [#tpu.dimension_semantics<parallel>, #tpu.dimension_semantics<parallel>], iteration_bounds = array<i64: 1, 1>, scalar_prefetch = 0 : i64, scratch_operands = 1 : i64, tpu.core_type = #tpu.core_type<tc>, window_params = [{transform_indices = @transform_0, window_bounds = array<i64: 2, 18, 18, 8>}, {pipeline_mode = #tpu.pipeline_mode<synchronous>, transform_indices = @transform_1, window_bounds = array<i64: 72, 128>}, {pipeline_mode = #tpu.pipeline_mode<synchronous>, transform_indices = @transform_2, window_bounds = array<i64: 1, 128>}, {transform_indices = @transform_3, window_bounds = array<i64: 2, 256, 128>}]} {
    %c16_i32 = arith.constant 16 : i32
    %0 = arith.muli %arg1, %c16_i32 : i32
    %c0_i32 = arith.constant 0 : i32
    %1 = arith.addi %0, %c0_i32 : i32
    %c0 = arith.constant 0 : index
    %2 = arith.index_cast %1 : i32 to index
    %c0_0 = arith.constant 0 : index
    %c0_1 = arith.constant 0 : index
    %3 = vector.load %arg2[%c0, %2, %c0_0, %c0_1] : memref<2x18x18x8xf32, #tpu.memory_space<vmem>>, vector<1x16x16x8xf32>
    %4 = vector.shape_cast %3 : vector<1x16x16x8xf32> to vector<16x16x8xf32>
    %5 = vector.shape_cast %4 : vector<16x16x8xf32> to vector<256x8xf32>
    %c0_2 = arith.constant 0 : index
    %c0_3 = arith.constant 0 : index
    %6 = vector.load %arg6[%c0_2, %c0_3] : memref<512x72xf32, #tpu.memory_space<vmem>>, vector<256x8xf32>
    tpu.vector_store %arg6[%c0_2, %c0_3], %5 {strides = array<i32>} : memref<512x72xf32, #tpu.memory_space<vmem>>, vector<256x8xf32>,
    %c0_i32_4 = arith.constant 0 : i32
    %7 = arith.addi %0, %c0_i32_4 : i32
    %c0_5 = arith.constant 0 : index
    %8 = arith.index_cast %7 : i32 to index
    %c1 = arith.constant 1 : index
    %c0_6 = arith.constant 0 : index
    %9 = vector.load %arg2[%c0_5, %8, %c1, %c0_6] : memref<2x18x18x8xf32, #tpu.memory_space<vmem>>, vector<1x16x16x8xf32>
    %10 = vector.shape_cast %9 : vector<1x16x16x8xf32> to vector<16x16x8xf32>
    %11 = vector.shape_cast %10 : vector<16x16x8xf32> to vector<256x8xf32>
    %c0_7 = arith.constant 0 : index
    %c8 = arith.constant 8 : index
    %12 = vector.load %arg6[%c0_7, %c8] : memref<512x72xf32, #tpu.memory_space<vmem>>, vector<256x8xf32>
    tpu.vector_store %arg6[%c0_7, %c8], %11 {strides = array<i32>} : memref<512x72xf32, #tpu.memory_space<vmem>>, vector<256x8xf32>,
    %c0_i32_8 = arith.constant 0 : i32
    %13 = arith.addi %0, %c0_i32_8 : i32
    %c0_9 = arith.constant 0 : index
    %14 = arith.index_cast %13 : i32 to index
    %c2 = arith.constant 2 : index
    %c0_10 = arith.constant 0 : index
    %15 = vector.load %arg2[%c0_9, %14, %c2, %c0_10] : memref<2x18x18x8xf32, #tpu.memory_space<vmem>>, vector<1x16x16x8xf32>
    %16 = vector.shape_cast %15 : vector<1x16x16x8xf32> to vector<16x16x8xf32>
    %17 = vector.shape_cast %16 : vector<16x16x8xf32> to vector<256x8xf32>
    %c0_11 = arith.constant 0 : index
    %c16 = arith.constant 16 : index
    %18 = vector.load %arg6[%c0_11, %c16] : memref<512x72xf32, #tpu.memory_space<vmem>>, vector<256x8xf32>
    tpu.vector_store %arg6[%c0_11, %c16], %17 {strides = array<i32>} : memref<512x72xf32, #tpu.memory_space<vmem>>, vector<256x8xf32>,
    %c1_i32 = arith.constant 1 : i32
    %19 = arith.addi %0, %c1_i32 : i32
    %c0_12 = arith.constant 0 : index
    %20 = arith.index_cast %19 : i32 to index
    %c0_13 = arith.constant 0 : index
    %c0_14 = arith.constant 0 : index
    %21 = vector.load %arg2[%c0_12, %20, %c0_13, %c0_14] : memref<2x18x18x8xf32, #tpu.memory_space<vmem>>, vector<1x16x16x8xf32>
    %22 = vector.shape_cast %21 : vector<1x16x16x8xf32> to vector<16x16x8xf32>
    %23 = vector.shape_cast %22 : vector<16x16x8xf32> to vector<256x8xf32>
    %c0_15 = arith.constant 0 : index
    %c24 = arith.constant 24 : index
    %24 = vector.load %arg6[%c0_15, %c24] : memref<512x72xf32, #tpu.memory_space<vmem>>, vector<256x8xf32>
    tpu.vector_store %arg6[%c0_15, %c24], %23 {strides = array<i32>} : memref<512x72xf32, #tpu.memory_space<vmem>>, vector<256x8xf32>,
    %c1_i32_16 = arith.constant 1 : i32
    %25 = arith.addi %0, %c1_i32_16 : i32
    %c0_17 = arith.constant 0 : index
    %26 = arith.index_cast %25 : i32 to index
    %c1_18 = arith.constant 1 : index
    %c0_19 = arith.constant 0 : index
    %27 = vector.load %arg2[%c0_17, %26, %c1_18, %c0_19] : memref<2x18x18x8xf32, #tpu.memory_space<vmem>>, vector<1x16x16x8xf32>
    %28 = vector.shape_cast %27 : vector<1x16x16x8xf32> to vector<16x16x8xf32>
    %29 = vector.shape_cast %28 : vector<16x16x8xf32> to vector<256x8xf32>
    %c0_20 = arith.constant 0 : index
    %c32 = arith.constant 32 : index
    %30 = vector.load %arg6[%c0_20, %c32] : memref<512x72xf32, #tpu.memory_space<vmem>>, vector<256x8xf32>
    tpu.vector_store %arg6[%c0_20, %c32], %29 {strides = array<i32>} : memref<512x72xf32, #tpu.memory_space<vmem>>, vector<256x8xf32>,
    %c1_i32_21 = arith.constant 1 : i32
    %31 = arith.addi %0, %c1_i32_21 : i32
    %c0_22 = arith.constant 0 : index
    %32 = arith.index_cast %31 : i32 to index
    %c2_23 = arith.constant 2 : index
    %c0_24 = arith.constant 0 : index
    %33 = vector.load %arg2[%c0_22, %32, %c2_23, %c0_24] : memref<2x18x18x8xf32, #tpu.memory_space<vmem>>, vector<1x16x16x8xf32>
    %34 = vector.shape_cast %33 : vector<1x16x16x8xf32> to vector<16x16x8xf32>
    %35 = vector.shape_cast %34 : vector<16x16x8xf32> to vector<256x8xf32>
    %c0_25 = arith.constant 0 : index
    %c40 = arith.constant 40 : index
    %36 = vector.load %arg6[%c0_25, %c40] : memref<512x72xf32, #tpu.memory_space<vmem>>, vector<256x8xf32>
    tpu.vector_store %arg6[%c0_25, %c40], %35 {strides = array<i32>} : memref<512x72xf32, #tpu.memory_space<vmem>>, vector<256x8xf32>,
    %c2_i32 = arith.constant 2 : i32
    %37 = arith.addi %0, %c2_i32 : i32
    %c0_26 = arith.constant 0 : index
    %38 = arith.index_cast %37 : i32 to index
    %c0_27 = arith.constant 0 : index
    %c0_28 = arith.constant 0 : index
    %39 = vector.load %arg2[%c0_26, %38, %c0_27, %c0_28] : memref<2x18x18x8xf32, #tpu.memory_space<vmem>>, vector<1x16x16x8xf32>
    %40 = vector.shape_cast %39 : vector<1x16x16x8xf32> to vector<16x16x8xf32>
    %41 = vector.shape_cast %40 : vector<16x16x8xf32> to vector<256x8xf32>
    %c0_29 = arith.constant 0 : index
    %c48 = arith.constant 48 : index
    %42 = vector.load %arg6[%c0_29, %c48] : memref<512x72xf32, #tpu.memory_space<vmem>>, vector<256x8xf32>
    tpu.vector_store %arg6[%c0_29, %c48], %41 {strides = array<i32>} : memref<512x72xf32, #tpu.memory_space<vmem>>, vector<256x8xf32>,
    %c2_i32_30 = arith.constant 2 : i32
    %43 = arith.addi %0, %c2_i32_30 : i32
    %c0_31 = arith.constant 0 : index
    %44 = arith.index_cast %43 : i32 to index
    %c1_32 = arith.constant 1 : index
    %c0_33 = arith.constant 0 : index
    %45 = vector.load %arg2[%c0_31, %44, %c1_32, %c0_33] : memref<2x18x18x8xf32, #tpu.memory_space<vmem>>, vector<1x16x16x8xf32>
    %46 = vector.shape_cast %45 : vector<1x16x16x8xf32> to vector<16x16x8xf32>
    %47 = vector.shape_cast %46 : vector<16x16x8xf32> to vector<256x8xf32>
    %c0_34 = arith.constant 0 : index
    %c56 = arith.constant 56 : index
    %48 = vector.load %arg6[%c0_34, %c56] : memref<512x72xf32, #tpu.memory_space<vmem>>, vector<256x8xf32>
    tpu.vector_store %arg6[%c0_34, %c56], %47 {strides = array<i32>} : memref<512x72xf32, #tpu.memory_space<vmem>>, vector<256x8xf32>,
    %c2_i32_35 = arith.constant 2 : i32
    %49 = arith.addi %0, %c2_i32_35 : i32
    %c0_36 = arith.constant 0 : index
    %50 = arith.index_cast %49 : i32 to index
    %c2_37 = arith.constant 2 : index
    %c0_38 = arith.constant 0 : index
    %51 = vector.load %arg2[%c0_36, %50, %c2_37, %c0_38] : memref<2x18x18x8xf32, #tpu.memory_space<vmem>>, vector<1x16x16x8xf32>
    %52 = vector.shape_cast %51 : vector<1x16x16x8xf32> to vector<16x16x8xf32>
    %53 = vector.shape_cast %52 : vector<16x16x8xf32> to vector<256x8xf32>
    %c0_39 = arith.constant 0 : index
    %c64 = arith.constant 64 : index
    %54 = vector.load %arg6[%c0_39, %c64] : memref<512x72xf32, #tpu.memory_space<vmem>>, vector<256x8xf32>
    tpu.vector_store %arg6[%c0_39, %c64], %53 {strides = array<i32>} : memref<512x72xf32, #tpu.memory_space<vmem>>, vector<256x8xf32>,
    %c0_i32_40 = arith.constant 0 : i32
    %55 = arith.addi %0, %c0_i32_40 : i32
    %c1_41 = arith.constant 1 : index
    %56 = arith.index_cast %55 : i32 to index
    %c0_42 = arith.constant 0 : index
    %c0_43 = arith.constant 0 : index
    %57 = vector.load %arg2[%c1_41, %56, %c0_42, %c0_43] : memref<2x18x18x8xf32, #tpu.memory_space<vmem>>, vector<1x16x16x8xf32>
    %58 = vector.shape_cast %57 : vector<1x16x16x8xf32> to vector<16x16x8xf32>
    %59 = vector.shape_cast %58 : vector<16x16x8xf32> to vector<256x8xf32>
    %c256 = arith.constant 256 : index
    %c0_44 = arith.constant 0 : index
    %60 = vector.load %arg6[%c256, %c0_44] : memref<512x72xf32, #tpu.memory_space<vmem>>, vector<256x8xf32>
    tpu.vector_store %arg6[%c256, %c0_44], %59 {strides = array<i32>} : memref<512x72xf32, #tpu.memory_space<vmem>>, vector<256x8xf32>,
    %c0_i32_45 = arith.constant 0 : i32
    %61 = arith.addi %0, %c0_i32_45 : i32
    %c1_46 = arith.constant 1 : index
    %62 = arith.index_cast %61 : i32 to index
    %c1_47 = arith.constant 1 : index
    %c0_48 = arith.constant 0 : index
    %63 = vector.load %arg2[%c1_46, %62, %c1_47, %c0_48] : memref<2x18x18x8xf32, #tpu.memory_space<vmem>>, vector<1x16x16x8xf32>
    %64 = vector.shape_cast %63 : vector<1x16x16x8xf32> to vector<16x16x8xf32>
    %65 = vector.shape_cast %64 : vector<16x16x8xf32> to vector<256x8xf32>
    %c256_49 = arith.constant 256 : index
    %c8_50 = arith.constant 8 : index
    %66 = vector.load %arg6[%c256_49, %c8_50] : memref<512x72xf32, #tpu.memory_space<vmem>>, vector<256x8xf32>
    tpu.vector_store %arg6[%c256_49, %c8_50], %65 {strides = array<i32>} : memref<512x72xf32, #tpu.memory_space<vmem>>, vector<256x8xf32>,
    %c0_i32_51 = arith.constant 0 : i32
    %67 = arith.addi %0, %c0_i32_51 : i32
    %c1_52 = arith.constant 1 : index
    %68 = arith.index_cast %67 : i32 to index
    %c2_53 = arith.constant 2 : index
    %c0_54 = arith.constant 0 : index
    %69 = vector.load %arg2[%c1_52, %68, %c2_53, %c0_54] : memref<2x18x18x8xf32, #tpu.memory_space<vmem>>, vector<1x16x16x8xf32>
    %70 = vector.shape_cast %69 : vector<1x16x16x8xf32> to vector<16x16x8xf32>
    %71 = vector.shape_cast %70 : vector<16x16x8xf32> to vector<256x8xf32>
    %c256_55 = arith.constant 256 : index
    %c16_56 = arith.constant 16 : index
    %72 = vector.load %arg6[%c256_55, %c16_56] : memref<512x72xf32, #tpu.memory_space<vmem>>, vector<256x8xf32>
    tpu.vector_store %arg6[%c256_55, %c16_56], %71 {strides = array<i32>} : memref<512x72xf32, #tpu.memory_space<vmem>>, vector<256x8xf32>,
    %c1_i32_57 = arith.constant 1 : i32
    %73 = arith.addi %0, %c1_i32_57 : i32
    %c1_58 = arith.constant 1 : index
    %74 = arith.index_cast %73 : i32 to index
    %c0_59 = arith.constant 0 : index
    %c0_60 = arith.constant 0 : index
    %75 = vector.load %arg2[%c1_58, %74, %c0_59, %c0_60] : memref<2x18x18x8xf32, #tpu.memory_space<vmem>>, vector<1x16x16x8xf32>
    %76 = vector.shape_cast %75 : vector<1x16x16x8xf32> to vector<16x16x8xf32>
    %77 = vector.shape_cast %76 : vector<16x16x8xf32> to vector<256x8xf32>
    %c256_61 = arith.constant 256 : index
    %c24_62 = arith.constant 24 : index
    %78 = vector.load %arg6[%c256_61, %c24_62] : memref<512x72xf32, #tpu.memory_space<vmem>>, vector<256x8xf32>
    tpu.vector_store %arg6[%c256_61, %c24_62], %77 {strides = array<i32>} : memref<512x72xf32, #tpu.memory_space<vmem>>, vector<256x8xf32>,
    %c1_i32_63 = arith.constant 1 : i32
    %79 = arith.addi %0, %c1_i32_63 : i32
    %c1_64 = arith.constant 1 : index
    %80 = arith.index_cast %79 : i32 to index
    %c1_65 = arith.constant 1 : index
    %c0_66 = arith.constant 0 : index
    %81 = vector.load %arg2[%c1_64, %80, %c1_65, %c0_66] : memref<2x18x18x8xf32, #tpu.memory_space<vmem>>, vector<1x16x16x8xf32>
    %82 = vector.shape_cast %81 : vector<1x16x16x8xf32> to vector<16x16x8xf32>
    %83 = vector.shape_cast %82 : vector<16x16x8xf32> to vector<256x8xf32>
    %c256_67 = arith.constant 256 : index
    %c32_68 = arith.constant 32 : index
    %84 = vector.load %arg6[%c256_67, %c32_68] : memref<512x72xf32, #tpu.memory_space<vmem>>, vector<256x8xf32>
    tpu.vector_store %arg6[%c256_67, %c32_68], %83 {strides = array<i32>} : memref<512x72xf32, #tpu.memory_space<vmem>>, vector<256x8xf32>,
    %c1_i32_69 = arith.constant 1 : i32
    %85 = arith.addi %0, %c1_i32_69 : i32
    %c1_70 = arith.constant 1 : index
    %86 = arith.index_cast %85 : i32 to index
    %c2_71 = arith.constant 2 : index
    %c0_72 = arith.constant 0 : index
    %87 = vector.load %arg2[%c1_70, %86, %c2_71, %c0_72] : memref<2x18x18x8xf32, #tpu.memory_space<vmem>>, vector<1x16x16x8xf32>
    %88 = vector.shape_cast %87 : vector<1x16x16x8xf32> to vector<16x16x8xf32>
    %89 = vector.shape_cast %88 : vector<16x16x8xf32> to vector<256x8xf32>
    %c256_73 = arith.constant 256 : index
    %c40_74 = arith.constant 40 : index
    %90 = vector.load %arg6[%c256_73, %c40_74] : memref<512x72xf32, #tpu.memory_space<vmem>>, vector<256x8xf32>
    tpu.vector_store %arg6[%c256_73, %c40_74], %89 {strides = array<i32>} : memref<512x72xf32, #tpu.memory_space<vmem>>, vector<256x8xf32>,
    %c2_i32_75 = arith.constant 2 : i32
    %91 = arith.addi %0, %c2_i32_75 : i32
    %c1_76 = arith.constant 1 : index
    %92 = arith.index_cast %91 : i32 to index
    %c0_77 = arith.constant 0 : index
    %c0_78 = arith.constant 0 : index
    %93 = vector.load %arg2[%c1_76, %92, %c0_77, %c0_78] : memref<2x18x18x8xf32, #tpu.memory_space<vmem>>, vector<1x16x16x8xf32>
    %94 = vector.shape_cast %93 : vector<1x16x16x8xf32> to vector<16x16x8xf32>
    %95 = vector.shape_cast %94 : vector<16x16x8xf32> to vector<256x8xf32>
    %c256_79 = arith.constant 256 : index
    %c48_80 = arith.constant 48 : index
    %96 = vector.load %arg6[%c256_79, %c48_80] : memref<512x72xf32, #tpu.memory_space<vmem>>, vector<256x8xf32>
    tpu.vector_store %arg6[%c256_79, %c48_80], %95 {strides = array<i32>} : memref<512x72xf32, #tpu.memory_space<vmem>>, vector<256x8xf32>,
    %c2_i32_81 = arith.constant 2 : i32
    %97 = arith.addi %0, %c2_i32_81 : i32
    %c1_82 = arith.constant 1 : index
    %98 = arith.index_cast %97 : i32 to index
    %c1_83 = arith.constant 1 : index
    %c0_84 = arith.constant 0 : index
    %99 = vector.load %arg2[%c1_82, %98, %c1_83, %c0_84] : memref<2x18x18x8xf32, #tpu.memory_space<vmem>>, vector<1x16x16x8xf32>
    %100 = vector.shape_cast %99 : vector<1x16x16x8xf32> to vector<16x16x8xf32>
    %101 = vector.shape_cast %100 : vector<16x16x8xf32> to vector<256x8xf32>
    %c256_85 = arith.constant 256 : index
    %c56_86 = arith.constant 56 : index
    %102 = vector.load %arg6[%c256_85, %c56_86] : memref<512x72xf32, #tpu.memory_space<vmem>>, vector<256x8xf32>
    tpu.vector_store %arg6[%c256_85, %c56_86], %101 {strides = array<i32>} : memref<512x72xf32, #tpu.memory_space<vmem>>, vector<256x8xf32>,
    %c2_i32_87 = arith.constant 2 : i32
    %103 = arith.addi %0, %c2_i32_87 : i32
    %c1_88 = arith.constant 1 : index
    %104 = arith.index_cast %103 : i32 to index
    %c2_89 = arith.constant 2 : index
    %c0_90 = arith.constant 0 : index
    %105 = vector.load %arg2[%c1_88, %104, %c2_89, %c0_90] : memref<2x18x18x8xf32, #tpu.memory_space<vmem>>, vector<1x16x16x8xf32>
    %106 = vector.shape_cast %105 : vector<1x16x16x8xf32> to vector<16x16x8xf32>
    %107 = vector.shape_cast %106 : vector<16x16x8xf32> to vector<256x8xf32>
    %c256_91 = arith.constant 256 : index
    %c64_92 = arith.constant 64 : index
    %108 = vector.load %arg6[%c256_91, %c64_92] : memref<512x72xf32, #tpu.memory_space<vmem>>, vector<256x8xf32>
    tpu.vector_store %arg6[%c256_91, %c64_92], %107 {strides = array<i32>} : memref<512x72xf32, #tpu.memory_space<vmem>>, vector<256x8xf32>,
    %c0_93 = arith.constant 0 : index
    %c0_94 = arith.constant 0 : index
    %109 = vector.load %arg6[%c0_93, %c0_94] : memref<512x72xf32, #tpu.memory_space<vmem>>, vector<512x72xf32>
    %c0_95 = arith.constant 0 : index
    %c0_96 = arith.constant 0 : index
    %110 = vector.load %arg3[%c0_95, %c0_96] : memref<72x128xf32, #tpu.memory_space<vmem>>, vector<72x128xf32>
    %cst = arith.constant dense<0.000000e+00> : vector<512x128xf32>
    %111 = tpu.matmul %109, %110, %cst {dimension_numbers = #tpu.dot_dimension_numbers<[1], [0], [0], [1], [0, 0, 1, 1], [], []>} : vector<512x72xf32>, vector<72x128xf32>, vector<512x128xf32> -> vector<512x128xf32>
    %c0_97 = arith.constant 0 : index
    %c0_98 = arith.constant 0 : index
    %112 = vector.load %arg4[%c0_97, %c0_98] : memref<1x128xf32, #tpu.memory_space<vmem>>, vector<1x128xf32>
    %113 = vector.broadcast %112 : vector<1x128xf32> to vector<512x128xf32>
    %114 = arith.addf %111, %113 : vector<512x128xf32>
    %cst_99 = arith.constant 0.000000e+00 : f32
    %115 = vector.broadcast %cst_99 : f32 to vector<512x128xf32>
    %116 = arith.maximumf %114, %115 : vector<512x128xf32>
    %117 = vector.extract_strided_slice %116 {offsets = [0, 0], sizes = [256, 128], strides = [1, 1]} : vector<512x128xf32> to vector<256x128xf32>
    %c0_100 = arith.constant 0 : index
    %c0_101 = arith.constant 0 : index
    %c0_102 = arith.constant 0 : index
    %118 = vector.load %arg5[%c0_100, %c0_101, %c0_102] : memref<2x256x128xf32, #tpu.memory_space<vmem>>, vector<1x256x128xf32>
    %119 = vector.shape_cast %118 : vector<1x256x128xf32> to vector<256x128xf32>
    %120 = vector.shape_cast %117 : vector<256x128xf32> to vector<1x256x128xf32>
    tpu.vector_store %arg5[%c0_100, %c0_101, %c0_102], %120 {strides = array<i32>} : memref<2x256x128xf32, #tpu.memory_space<vmem>>, vector<1x256x128xf32>,
    %121 = vector.extract_strided_slice %116 {offsets = [256, 0], sizes = [256, 128], strides = [1, 1]} : vector<512x128xf32> to vector<256x128xf32>
    %c1_103 = arith.constant 1 : index
    %c0_104 = arith.constant 0 : index
    %c0_105 = arith.constant 0 : index
    %122 = vector.load %arg5[%c1_103, %c0_104, %c0_105] : memref<2x256x128xf32, #tpu.memory_space<vmem>>, vector<1x256x128xf32>
    %123 = vector.shape_cast %122 : vector<1x256x128xf32> to vector<256x128xf32>
    %124 = vector.shape_cast %121 : vector<256x128xf32> to vector<1x256x128xf32>
    tpu.vector_store %arg5[%c1_103, %c0_104, %c0_105], %124 {strides = array<i32>} : memref<2x256x128xf32, #tpu.memory_space<vmem>>, vector<1x256x128xf32>,
    return
  }
  func.func @transform_0(%arg0: i32, %arg1: i32) -> (i32, i32, i32, i32) {
    %c0_i32 = arith.constant 0 : i32
    %c0_i32_0 = arith.constant 0 : i32
    %c0_i32_1 = arith.constant 0 : i32
    %c0_i32_2 = arith.constant 0 : i32
    return %arg0, %c0_i32, %c0_i32_0, %c0_i32_1 : i32, i32, i32, i32
  }
  func.func @transform_1(%arg0: i32, %arg1: i32) -> (i32, i32) {
    %c0_i32 = arith.constant 0 : i32
    %c0_i32_0 = arith.constant 0 : i32
    %c0_i32_1 = arith.constant 0 : i32
    return %c0_i32, %c0_i32_0 : i32, i32
  }
  func.func @transform_2(%arg0: i32, %arg1: i32) -> (i32, i32) {
    %c0_i32 = arith.constant 0 : i32
    %c0_i32_0 = arith.constant 0 : i32
    %c0_i32_1 = arith.constant 0 : i32
    return %c0_i32, %c0_i32_0 : i32, i32
  }
  func.func @transform_3(%arg0: i32, %arg1: i32) -> (i32, i32, i32) {
    %c0_i32 = arith.constant 0 : i32
    %c0_i32_0 = arith.constant 0 : i32
    return %arg0, %arg1, %c0_i32 : i32, i32, i32
  }
}

</mosaic_0001>

<bundles_post_ra>
// kernel: tpu_custom_call.1
= control target key start
LH: loop header
LB: loop body
LE: loop exit
PB: predicated region body
PF: predicated region fallthrough
CT: control target
= control target key end

     0   :  { %s4840_s16 = smov 8   ;;  %vm50_vm0 = vcmask 64512   ;;  %s7700_s0 = inlined_call_operand.vmem [shape: f32[2,18,18,8], index: 0, kind: input, shape index: {}]   ;;  %s7701_s1 = inlined_call_operand.vmem [shape: f32[72,128], index: 1, kind: input, shape index: {}]   ;;  %s7702_s2 = inlined_call_operand.vmem [shape: f32[1,128], index: 2, kind: input, shape index: {}]   ;;  %s7703_s3 = inlined_call_operand.hbm [shape: f32[2,256,128], index: 3, kind: output, shape index: {}]  }
   0x1   :  { %v83_v0 = vld [vmem:[%s7700_s0 + $0x1] sm:$0xff]  ;;  %v4876_v1 = vld [vmem:[%s7700_s0 + $0x19] sm:$0xff]  ;;  %v84_v2 = vld [vmem:[%s7700_s0 + $0x9] sm:$0xff] }
   0x2   :  { %147 = vrot.lane.b32.xlu0 %v83_v0, %s4840_s16  ;;  %151 = vrot.lane.b32.xlu1 %v4876_v1, %s4840_s16  ;;  %v4887_v3 = vld [vmem:[%s7700_s0 + $0x21] sm:$0xff]  ;;  %v4895_v4 = vld [vmem:[%s7700_s0 + $0x31] sm:$0xff] }
   0x3   :  { %v4900_v5 = vld [vmem:[%s7700_s0 + $0x39] sm:$0xff]  ;;  %v4909_v6 = vld [vmem:[%s7700_s0 + $0x49] sm:$0xff]  ;;  %v4914_v7 = vld [vmem:[%s7700_s0 + $0x51] sm:$0xff] }
   0x4   :  { %v4923_v8 = vld [vmem:[%s7700_s0 + $0x61] sm:$0xff]  ;;  %v4928_v9 = vld [vmem:[%s7700_s0 + $0x69] sm:$0xff]  ;;  %v4937_v10 = vld [vmem:[%s7700_s0 + $0x79] sm:$0xff] }
   0x5   :  { %v4942_v11 = vld [vmem:[%s7700_s0 + $0x81] sm:$0xff]  ;;  %v4954_v13 = vld [vmem:[%s7700_s0 + $0x18] sm:$0xff]  ;;  %v4981_v18 = vld [vmem:[%s7700_s0 + $0xa9] sm:$0xff] }
   0x6   :  { %149 = vrot.lane.b32.xlu0 %v84_v2, %s4840_s16  ;;  %153 = vrot.lane.b32.xlu1 %v4887_v3, %s4840_s16  ;;  %v18_v12 = vld [vmem:[%s7700_s0] sm:$0xff]  ;;  %v4959_v14 = vld [vmem:[%s7700_s0 + $0x91] sm:$0xff]  ;;  %53 = vst.msk [vmem:[#allocation2 + $0x10] sm:$0xff] %vm50_vm0, %v4954_v13 }
   0x7   :  { %v4964_v15 = vld [vmem:[%s7700_s0 + $0x99] sm:$0xff]  ;;  %51 = vst.msk [vmem:[#allocation2] sm:$0xff] %vm50_vm0, %v18_v12  ;;  %v19_v16 = vld [vmem:[%s7700_s0 + $0x8] sm:$0xff]  ;;  %v4988_v19 = vld [vmem:[%s7700_s0 + $0x30] sm:$0xff] }
   0x8   :  { %52 = vst.msk [vmem:[#allocation2 + $0x8] sm:$0xff] %vm50_vm0, %v19_v16  ;;  %v4976_v17 = vld [vmem:[%s7700_s0 + $0x20] sm:$0xff]  ;;  %v4993_v20 = vld [vmem:[%s7700_s0 + $0x38] sm:$0xff]  ;;  %55 = vst.msk [vmem:[#allocation2 + $0x20] sm:$0xff] %vm50_vm0, %v4988_v19 }
   0x9   :  { %54 = vst.msk [vmem:[#allocation2 + $0x18] sm:$0xff] %vm50_vm0, %v4976_v17  ;;  %v5002_v21 = vld [vmem:[%s7700_s0 + $0xb1] sm:$0xff]  ;;  %56 = vst.msk [vmem:[#allocation2 + $0x28] sm:$0xff] %vm50_vm0, %v4993_v20  ;;  %v5011_v22 = vld [vmem:[%s7700_s0 + $0x48] sm:$0xff] }
   0xa   :  { %155 = vrot.lane.b32.xlu0 %v4895_v4, %s4840_s16  ;;  %157 = vrot.lane.b32.xlu1 %v4900_v5, %s4840_s16  ;;  %57 = vst.msk [vmem:[#allocation2 + $0x30] sm:$0xff] %vm50_vm0, %v5011_v22  ;;  %v5018_v23 = vld [vmem:[%s7700_s0 + $0x50] sm:$0xff]  ;;  %v5023_v24 = vld [vmem:[%s7700_s0 + $0x60] sm:$0xff] }
   0xb   :  { %v5028_v25 = vld [vmem:[%s7700_s0 + $0x68] sm:$0xff]  ;;  %58 = vst.msk [vmem:[#allocation2 + $0x38] sm:$0xff] %vm50_vm0, %v5018_v23  ;;  %59 = vst.msk [vmem:[#allocation2 + $0x40] sm:$0xff] %vm50_vm0, %v5023_v24  ;;  %v5039_v26 = vld [vmem:[%s7700_s0 + $0x78] sm:$0xff] }
   0xc   :  { %60 = vst.msk [vmem:[#allocation2 + $0x48] sm:$0xff] %vm50_vm0, %v5028_v25  ;;  %v5044_v27 = vld [vmem:[%s7700_s0 + $0x80] sm:$0xff]  ;;  %v5049_v28 = vld [vmem:[%s7700_s0 + $0x90] sm:$0xff]  ;;  %61 = vst.msk [vmem:[#allocation2 + $0x50] sm:$0xff] %vm50_vm0, %v5039_v26 }
   0xd   :  { %v5054_v29 = vld [vmem:[%s7700_s0 + $0xc1] sm:$0xff]  ;;  %v5059_v30 = vld [vmem:[%s7700_s0 + $0xc9] sm:$0xff]  ;;  %62 = vst.msk [vmem:[#allocation2 + $0x58] sm:$0xff] %vm50_vm0, %v5044_v27  ;;  %63 = vst.msk [vmem:[#allocation2 + $0x60] sm:$0xff] %vm50_vm0, %v5049_v28 }
   0xe   :  { %159 = vrot.lane.b32.xlu0 %v4909_v6, %s4840_s16  ;;  %161 = vrot.lane.b32.xlu1 %v4914_v7, %s4840_s16  ;;  %v5070_v31 = vld [vmem:[%s7700_s0 + $0x98] sm:$0xff]  ;;  %v5075_v32 = vld [vmem:[%s7700_s0 + $0xa8] sm:$0xff] }
   0xf   :  { %v5080_v33 = vld [vmem:[%s7700_s0 + $0xb0] sm:$0xff]  ;;  %64 = vst.msk [vmem:[#allocation2 + $0x68] sm:$0xff] %vm50_vm0, %v5070_v31  ;;  %65 = vst.msk [vmem:[#allocation2 + $0x70] sm:$0xff] %vm50_vm0, %v5075_v32  ;;  %v5095_v34 = vld [vmem:[%s7700_s0 + $0xc0] sm:$0xff] }
  0x10   :  { %66 = vst.msk [vmem:[#allocation2 + $0x78] sm:$0xff] %vm50_vm0, %v5080_v33  ;;  %v5100_v35 = vld [vmem:[%s7700_s0 + $0xc8] sm:$0xff]  ;;  %67 = vst.msk [vmem:[#allocation2 + $0x80] sm:$0xff] %vm50_vm0, %v5095_v34  ;;  %v5109_v36 = vld [vmem:[%s7700_s0 + $0xd8] sm:$0xff] }
  0x11   :  { %68 = vst.msk [vmem:[#allocation2 + $0x88] sm:$0xff] %vm50_vm0, %v5100_v35  ;;  %v5114_v37 = vld [vmem:[%s7700_s0 + $0xe0] sm:$0xff]  ;;  %v5119_v38 = vld [vmem:[%s7700_s0 + $0xf0] sm:$0xff]  ;;  %69 = vst.msk [vmem:[#allocation2 + $0x90] sm:$0xff] %vm50_vm0, %v5109_v36 }
  0x12   :  { %163 = vrot.lane.b32.xlu0 %v4923_v8, %s4840_s16  ;;  %165 = vrot.lane.b32.xlu1 %v4928_v9, %s4840_s16  ;;  %70 = vst.msk [vmem:[#allocation2 + $0x98] sm:$0xff] %vm50_vm0, %v5114_v37  ;;  %71 = vst.msk [vmem:[#allocation2 + $0xa0] sm:$0xff] %vm50_vm0, %v5119_v38  ;;  %v5130_v39 = vld [vmem:[%s7700_s0 + $0xf8] sm:$0xff]  ;;  %v5135_v40 = vld [vmem:[%s7700_s0 + $0x108] sm:$0xff] }
  0x13   :  { %v5140_v41 = vld [vmem:[%s7700_s0 + $0x110] sm:$0xff]  ;;  %72 = vst.msk [vmem:[#allocation2 + $0xa8] sm:$0xff] %vm50_vm0, %v5130_v39  ;;  %73 = vst.msk [vmem:[#allocation2 + $0xb0] sm:$0xff] %vm50_vm0, %v5135_v40 }
  0x14   :  { %74 = vst.msk [vmem:[#allocation2 + $0xb8] sm:$0xff] %vm50_vm0, %v5140_v41 }
  0x16   :  { %167 = vrot.lane.b32.xlu0 %v4937_v10, %s4840_s16  ;;  %169 = vrot.lane.b32.xlu1 %v4942_v11, %s4840_s16 }
  0x1a   :  { %171 = vrot.lane.b32.xlu0 %v4959_v14, %s4840_s16  ;;  %173 = vrot.lane.b32.xlu1 %v4964_v15, %s4840_s16 }
  0x1e   :  { %175 = vrot.lane.b32.xlu0 %v4981_v18, %s4840_s16  ;;  %177 = vrot.lane.b32.xlu1 %v5002_v21, %s4840_s16 }
  0x1f   :  { %8 = vsyncpa [#allocation4], 0  ;;  %v5155_v42 = vld [vmem:[%s7700_s0 + $0xd9] sm:$0xff]  ;;  %v5160_v43 = vld [vmem:[%s7700_s0 + $0xe1] sm:$0xff]  ;;  %s4841_s14 = smov 16   ;;  %vm243_vm1 = vcmask 130112  }
  0x20   :  { %v5165_v44 = vld [vmem:[%s7700_s0 + $0x120] sm:$0xff]  ;;  %v5172_v45 = vld [vmem:[%s7700_s0 + $0x128] sm:$0xff]  ;;  %v5183_v46 = vld [vmem:[%s7700_s0 + $0xf1] sm:$0xff]  ;;  %s4842_s26 = smov 24   ;;  %vm436_vm2 = vcmask 195712   ;;  %s4843_s4 = smov 32  }
  0x21   :  { %75 = vst.msk [vmem:[#allocation2 + $0xc0] sm:$0xff] %vm50_vm0, %v5165_v44  ;;  %76 = vst.msk [vmem:[#allocation2 + $0xc8] sm:$0xff] %vm50_vm0, %v5172_v45  ;;  %v5188_v47 = vld [vmem:[%s7700_s0 + $0xf9] sm:$0xff]  ;;  %v5211_v50 = vld [vmem:[%s7700_s0 + $0x109] sm:$0xff]  ;;  %vm632_vm3 = vcmask 261312   ;;  %s4844_s9 = smov 40  }
  0x22   :  { %179 = vrot.lane.b32.xlu0 %v5054_v29, %s4840_s16  ;;  %181 = vrot.lane.b32.xlu1 %v5059_v30, %s4840_s16  ;;  %v5193_v48 = vld [vmem:[%s7700_s0 + $0x138] sm:$0xff]  ;;  %v5200_v49 = vld [vmem:[%s7700_s0 + $0x140] sm:$0xff]  ;;  %vm825_vm4 = vcmask 326912   ;;  %s4845_s15 = smov 48   ;;  %vm1018_vm5 = vcmask 392512   ;;  %s4846_s25 = smov 56  }
  0x23   :  { %77 = vst.msk [vmem:[#allocation2 + $0xd0] sm:$0xff] %vm50_vm0, %v5193_v48  ;;  %78 = vst.msk [vmem:[#allocation2 + $0xd8] sm:$0xff] %vm50_vm0, %v5200_v49  ;;  %v5216_v51 = vld [vmem:[%s7700_s0 + $0x111] sm:$0xff]  ;;  %v5239_v54 = vld [vmem:[%s7700_s0 + $0x121] sm:$0xff]  ;;  %vm1214_vm6 = vcmask 458112   ;;  %s4847_s22 = smov 64  }
  0x24   :  { %v5221_v52 = vld [vmem:[%s7700_s0 + $0x150] sm:$0xff]  ;;  %v5228_v53 = vld [vmem:[%s7700_s0 + $0x158] sm:$0xff]  ;;  %v5249_v56 = vld [vmem:[%s7700_s0 + $0x168] sm:$0xff]  ;;  %vm1407_vm7 = vcmask 523712   ;;  %vm1600_vm8 = vcmask 589312   ;;  %vm3319_vm9 = vcmask 588800  }
  0x25   :  { %79 = vst.msk [vmem:[#allocation2 + $0xe0] sm:$0xff] %vm50_vm0, %v5221_v52  ;;  %80 = vst.msk [vmem:[#allocation2 + $0xe8] sm:$0xff] %vm50_vm0, %v5228_v53  ;;  %v5244_v55 = vld [vmem:[%s7700_s0 + $0x129] sm:$0xff]  ;;  %v5267_v58 = vld [vmem:[%s7700_s0 + $0x139] sm:$0xff] }
  0x26   :  { %183 = vrot.lane.b32.xlu0 %v5155_v42, %s4840_s16  ;;  %185 = vrot.lane.b32.xlu1 %v5160_v43, %s4840_s16  ;;  %81 = vst.msk [vmem:[#allocation2 + $0xf0] sm:$0xff] %vm50_vm0, %v5249_v56  ;;  %v5256_v57 = vld [vmem:[%s7700_s0 + $0x170] sm:$0xff]  ;;  %v5272_v59 = vld [vmem:[%s7700_s0 + $0x141] sm:$0xff] }
  0x27   :  { %82 = vst.msk [vmem:[#allocation2 + $0xf8] sm:$0xff] %vm50_vm0, %v5256_v57  ;;  %v5281_v60 = vld [vmem:[%s7700_s0 + $0x151] sm:$0xff]  ;;  %v5286_v61 = vld [vmem:[%s7700_s0 + $0x159] sm:$0xff]  ;;  %v5295_v62 = vld [vmem:[%s7700_s0 + $0x169] sm:$0xff] }
  0x28   :  { %7734 = vst [vmem:[#allocation6_spill] sm:$0xff] %v5286_v61  ;;  %7735 = vst [vmem:[#allocation7_spill] sm:$0xff] %v5295_v62  ;;  %v5300_v63 = vld [vmem:[%s7700_s0 + $0x171] sm:$0xff]  ;;  %v276_v0 = vld [vmem:[%s7700_s0 + $0x2] sm:$0xff] }
  0x29   :  { %7736 = vst [vmem:[#allocation8_spill] sm:$0xff] %v5300_v63  ;;  %v277_v2 = vld [vmem:[%s7700_s0 + $0xa] sm:$0xff]  ;;  %v5317_v12 = vld [vmem:[%s7700_s0 + $0x1a] sm:$0xff]  ;;  %v5322_v16 = vld [vmem:[%s7700_s0 + $0x22] sm:$0xff] }
  0x2a   :  { %187 = vrot.lane.b32.xlu0 %v5183_v46, %s4840_s16  ;;  %189 = vrot.lane.b32.xlu1 %v5188_v47, %s4840_s16  ;;  %7737 = vst [vmem:[#allocation9_spill] sm:$0xff] %v5317_v12  ;;  %7738 = vst [vmem:[#allocation10_spill] sm:$0xff] %v5322_v16 }
  0x2e   :  { %191 = vrot.lane.b32.xlu0 %v5211_v50, %s4840_s16  ;;  %193 = vrot.lane.b32.xlu1 %v5216_v51, %s4840_s16 }
  0x32   :  { %195 = vrot.lane.b32.xlu0 %v5239_v54, %s4840_s16  ;;  %197 = vrot.lane.b32.xlu1 %v5244_v55, %s4840_s16 }
  0x36   :  { %199 = vrot.lane.b32.xlu0 %v5267_v58, %s4840_s16  ;;  %201 = vrot.lane.b32.xlu1 %v5272_v59, %s4840_s16 }
  0x3a   :  { %203 = vrot.lane.b32.xlu0 %v5281_v60, %s4840_s16  ;;  %205 = vrot.lane.b32.xlu1 %v5286_v61, %s4840_s16 }
  0x3e   :  { %207 = vrot.lane.b32.xlu0 %v5295_v62, %s4840_s16  ;;  %209 = vrot.lane.b32.xlu1 %v5300_v63, %s4840_s16 }
  0x42   :  { %340 = vrot.lane.b32.xlu0 %v276_v0, %s4841_s14  ;;  %342 = vrot.lane.b32.xlu1 %v277_v2, %s4841_s14  ;;  %v5331_v0 = vld [vmem:[%s7700_s0 + $0x32] sm:$0xff]  ;;  %v5336_v2 = vld [vmem:[%s7700_s0 + $0x3a] sm:$0xff] }
  0x43   :  { %7739 = vst [vmem:[#allocation11_spill] sm:$0xff] %v5331_v0  ;;  %7740 = vst [vmem:[#allocation12_spill] sm:$0xff] %v5336_v2 }
  0x46   :  { %344 = vrot.lane.b32.xlu0 %v5317_v12, %s4841_s14  ;;  %346 = vrot.lane.b32.xlu1 %v5322_v16, %s4841_s14  ;;  %v5345_v16 = vld [vmem:[%s7700_s0 + $0x4a] sm:$0xff]  ;;  %v5350_v12 = vld [vmem:[%s7700_s0 + $0x52] sm:$0xff] }
  0x47   :  { %7741 = vst [vmem:[#allocation13_spill] sm:$0xff] %v5345_v16  ;;  %7742 = vst [vmem:[#allocation14_spill] sm:$0xff] %v5350_v12 }
  0x4a   :  { %348 = vrot.lane.b32.xlu0 %v5331_v0, %s4841_s14  ;;  %350 = vrot.lane.b32.xlu1 %v5336_v2, %s4841_s14  ;;  %v5359_v2 = vld [vmem:[%s7700_s0 + $0x62] sm:$0xff]  ;;  %v5364_v0 = vld [vmem:[%s7700_s0 + $0x6a] sm:$0xff] }
  0x4b   :  { %7743 = vst [vmem:[#allocation15_spill] sm:$0xff] %v5359_v2  ;;  %7744 = vst [vmem:[#allocation16_spill] sm:$0xff] %v5364_v0 }
  0x4e   :  { %352 = vrot.lane.b32.xlu0 %v5345_v16, %s4841_s14  ;;  %354 = vrot.lane.b32.xlu1 %v5350_v12, %s4841_s14  ;;  %v5373_v12 = vld [vmem:[%s7700_s0 + $0x7a] sm:$0xff]  ;;  %v5378_v16 = vld [vmem:[%s7700_s0 + $0x82] sm:$0xff] }
  0x4f   :  { %7745 = vst [vmem:[#allocation17_spill] sm:$0xff] %v5373_v12  ;;  %7746 = vst [vmem:[#allocation18_spill] sm:$0xff] %v5378_v16 }
  0x52   :  { %356 = vrot.lane.b32.xlu0 %v5359_v2, %s4841_s14  ;;  %358 = vrot.lane.b32.xlu1 %v5364_v0, %s4841_s14  ;;  %v5387_v0 = vld [vmem:[%s7700_s0 + $0x92] sm:$0xff]  ;;  %v5392_v2 = vld [vmem:[%s7700_s0 + $0x9a] sm:$0xff] }
  0x53   :  { %7747 = vst [vmem:[#allocation19_spill] sm:$0xff] %v5387_v0  ;;  %7748 = vst [vmem:[#allocation20_spill] sm:$0xff] %v5392_v2 }
  0x56   :  { %360 = vrot.lane.b32.xlu0 %v5373_v12, %s4841_s14  ;;  %362 = vrot.lane.b32.xlu1 %v5378_v16, %s4841_s14  ;;  %v5401_v16 = vld [vmem:[%s7700_s0 + $0xaa] sm:$0xff]  ;;  %v5406_v12 = vld [vmem:[%s7700_s0 + $0xb2] sm:$0xff] }
  0x57   :  { %7749 = vst [vmem:[#allocation21_spill] sm:$0xff] %v5401_v16  ;;  %7750 = vst [vmem:[#allocation22_spill] sm:$0xff] %v5406_v12 }
  0x5a   :  { %364 = vrot.lane.b32.xlu0 %v5387_v0, %s4841_s14  ;;  %366 = vrot.lane.b32.xlu1 %v5392_v2, %s4841_s14  ;;  %v5415_v2 = vld [vmem:[%s7700_s0 + $0xc2] sm:$0xff]  ;;  %v5420_v0 = vld [vmem:[%s7700_s0 + $0xca] sm:$0xff] }
  0x5b   :  { %7751 = vst [vmem:[#allocation23_spill] sm:$0xff] %v5415_v2  ;;  %7752 = vst [vmem:[#allocation24_spill] sm:$0xff] %v5420_v0 }
  0x5e   :  { %368 = vrot.lane.b32.xlu0 %v5401_v16, %s4841_s14  ;;  %370 = vrot.lane.b32.xlu1 %v5406_v12, %s4841_s14  ;;  %v5429_v12 = vld [vmem:[%s7700_s0 + $0xda] sm:$0xff]  ;;  %v5434_v16 = vld [vmem:[%s7700_s0 + $0xe2] sm:$0xff] }
  0x5f   :  { %7753 = vst [vmem:[#allocation25_spill] sm:$0xff] %v5429_v12  ;;  %7754 = vst [vmem:[#allocation26_spill] sm:$0xff] %v5434_v16 }
  0x62   :  { %372 = vrot.lane.b32.xlu0 %v5415_v2, %s4841_s14  ;;  %374 = vrot.lane.b32.xlu1 %v5420_v0, %s4841_s14  ;;  %v5443_v0 = vld [vmem:[%s7700_s0 + $0xf2] sm:$0xff]  ;;  %v5448_v2 = vld [vmem:[%s7700_s0 + $0xfa] sm:$0xff] }
  0x63   :  { %7755 = vst [vmem:[#allocation27_spill] sm:$0xff] %v5443_v0  ;;  %7756 = vst [vmem:[#allocation28_spill] sm:$0xff] %v5448_v2 }
  0x66   :  { %376 = vrot.lane.b32.xlu0 %v5429_v12, %s4841_s14  ;;  %378 = vrot.lane.b32.xlu1 %v5434_v16, %s4841_s14  ;;  %v5457_v16 = vld [vmem:[%s7700_s0 + $0x10a] sm:$0xff]  ;;  %v5462_v12 = vld [vmem:[%s7700_s0 + $0x112] sm:$0xff] }
  0x67   :  { %7757 = vst [vmem:[#allocation29_spill] sm:$0xff] %v5457_v16  ;;  %7758 = vst [vmem:[#allocation30_spill] sm:$0xff] %v5462_v12 }
  0x6a   :  { %380 = vrot.lane.b32.xlu0 %v5443_v0, %s4841_s14  ;;  %382 = vrot.lane.b32.xlu1 %v5448_v2, %s4841_s14  ;;  %v5471_v2 = vld [vmem:[%s7700_s0 + $0x122] sm:$0xff]  ;;  %v5476_v0 = vld [vmem:[%s7700_s0 + $0x12a] sm:$0xff] }
  0x6b   :  { %7759 = vst [vmem:[#allocation31_spill] sm:$0xff] %v5471_v2  ;;  %7760 = vst [vmem:[#allocation32_spill] sm:$0xff] %v5476_v0 }
  0x6e   :  { %384 = vrot.lane.b32.xlu0 %v5457_v16, %s4841_s14  ;;  %386 = vrot.lane.b32.xlu1 %v5462_v12, %s4841_s14  ;;  %v5485_v12 = vld [vmem:[%s7700_s0 + $0x13a] sm:$0xff]  ;;  %v5490_v16 = vld [vmem:[%s7700_s0 + $0x142] sm:$0xff] }
  0x6f   :  { %7761 = vst [vmem:[#allocation33_spill] sm:$0xff] %v5485_v12  ;;  %7762 = vst [vmem:[#allocation34_spill] sm:$0xff] %v5490_v16 }
  0x72   :  { %388 = vrot.lane.b32.xlu0 %v5471_v2, %s4841_s14  ;;  %390 = vrot.lane.b32.xlu1 %v5476_v0, %s4841_s14  ;;  %v5501_v0 = vld [vmem:[%s7700_s0 + $0x152] sm:$0xff]  ;;  %v5506_v2 = vld [vmem:[%s7700_s0 + $0x15a] sm:$0xff] }
  0x73   :  { %7763 = vst [vmem:[#allocation35_spill] sm:$0xff] %v5506_v2 }
  0x74   :  { %v148_v63 = vpop.permute.xlu0 %147  ;;  %v152_v62 = vpop.permute.xlu1 %151 }
  0x75   :  { %244 = vst.msk [vmem:[#allocation2] sm:$0xff] %vm243_vm1, %v148_v63  ;;  %246 = vst.msk [vmem:[#allocation2 + $0x10] sm:$0xff] %vm243_vm1, %v152_v62  ;;  %v5517_v62 = vld [vmem:[%s7700_s0 + $0x16a] sm:$0xff] }
  0x76   :  { %392 = vrot.lane.b32.xlu0 %v5485_v12, %s4841_s14  ;;  %394 = vrot.lane.b32.xlu1 %v5490_v16, %s4841_s14  ;;  %v5522_v16 = vld [vmem:[%s7700_s0 + $0x172] sm:$0xff] }
  0x78   :  { %v150_v61 = vpop.permute.xlu0 %149  ;;  %v154_v63 = vpop.permute.xlu1 %153 }
  0x79   :  { %245 = vst.msk [vmem:[#allocation2 + $0x8] sm:$0xff] %vm243_vm1, %v150_v61  ;;  %247 = vst.msk [vmem:[#allocation2 + $0x18] sm:$0xff] %vm243_vm1, %v154_v63 }
  0x7a   :  { %396 = vrot.lane.b32.xlu0 %v5501_v0, %s4841_s14  ;;  %398 = vrot.lane.b32.xlu1 %v5506_v2, %s4841_s14 }
  0x7c   :  { %v156_v12 = vpop.permute.xlu0 %155  ;;  %v158_v61 = vpop.permute.xlu1 %157 }
  0x7d   :  { %248 = vst.msk [vmem:[#allocation2 + $0x20] sm:$0xff] %vm243_vm1, %v156_v12  ;;  %249 = vst.msk [vmem:[#allocation2 + $0x28] sm:$0xff] %vm243_vm1, %v158_v61 }
  0x7e   :  { %400 = vrot.lane.b32.xlu0 %v5517_v62, %s4841_s14  ;;  %402 = vrot.lane.b32.xlu1 %v5522_v16, %s4841_s14 }
  0x80   :  { %v160_v63 = vpop.permute.xlu0 %159  ;;  %v162_v2 = vpop.permute.xlu1 %161 }
  0x81   :  { %250 = vst.msk [vmem:[#allocation2 + $0x30] sm:$0xff] %vm243_vm1, %v160_v63  ;;  %251 = vst.msk [vmem:[#allocation2 + $0x38] sm:$0xff] %vm243_vm1, %v162_v2 }
  0x82   :  { %536 = vrot.lane.b32.xlu0 %v4954_v13, %s4842_s26  ;;  %538 = vrot.lane.b32.xlu1 %v4976_v17, %s4842_s26 }
  0x84   :  { %v164_v12 = vpop.permute.xlu0 %163  ;;  %v166_v61 = vpop.permute.xlu1 %165 }
  0x85   :  { %252 = vst.msk [vmem:[#allocation2 + $0x40] sm:$0xff] %vm243_vm1, %v164_v12  ;;  %253 = vst.msk [vmem:[#allocation2 + $0x48] sm:$0xff] %vm243_vm1, %v166_v61 }
  0x86   :  { %540 = vrot.lane.b32.xlu0 %v4988_v19, %s4842_s26  ;;  %542 = vrot.lane.b32.xlu1 %v4993_v20, %s4842_s26 }
  0x88   :  { %v168_v2 = vpop.permute.xlu0 %167  ;;  %v170_v63 = vpop.permute.xlu1 %169 }
  0x89   :  { %254 = vst.msk [vmem:[#allocation2 + $0x50] sm:$0xff] %vm243_vm1, %v168_v2  ;;  %255 = vst.msk [vmem:[#allocation2 + $0x58] sm:$0xff] %vm243_vm1, %v170_v63 }
  0x8a   :  { %544 = vrot.lane.b32.xlu0 %v5011_v22, %s4842_s26  ;;  %546 = vrot.lane.b32.xlu1 %v5018_v23, %s4842_s26 }
  0x8c   :  { %v172_v13 = vpop.permute.xlu0 %171  ;;  %v174_v17 = vpop.permute.xlu1 %173 }
  0x8d   :  { %256 = vst.msk [vmem:[#allocation2 + $0x60] sm:$0xff] %vm243_vm1, %v172_v13  ;;  %257 = vst.msk [vmem:[#allocation2 + $0x68] sm:$0xff] %vm243_vm1, %v174_v17 }
  0x8e   :  { %548 = vrot.lane.b32.xlu0 %v5023_v24, %s4842_s26  ;;  %550 = vrot.lane.b32.xlu1 %v5028_v25, %s4842_s26 }
  0x90   :  { %v176_v12 = vpop.permute.xlu0 %175  ;;  %v178_v61 = vpop.permute.xlu1 %177 }
  0x91   :  { %258 = vst.msk [vmem:[#allocation2 + $0x70] sm:$0xff] %vm243_vm1, %v176_v12  ;;  %259 = vst.msk [vmem:[#allocation2 + $0x78] sm:$0xff] %vm243_vm1, %v178_v61 }
  0x92   :  { %552 = vrot.lane.b32.xlu0 %v5039_v26, %s4842_s26  ;;  %554 = vrot.lane.b32.xlu1 %v5044_v27, %s4842_s26 }
  0x94   :  { %v180_v2 = vpop.permute.xlu0 %179  ;;  %v182_v63 = vpop.permute.xlu1 %181 }
  0x95   :  { %260 = vst.msk [vmem:[#allocation2 + $0x80] sm:$0xff] %vm243_vm1, %v180_v2  ;;  %261 = vst.msk [vmem:[#allocation2 + $0x88] sm:$0xff] %vm243_vm1, %v182_v63 }
  0x96   :  { %556 = vrot.lane.b32.xlu0 %v5049_v28, %s4842_s26  ;;  %558 = vrot.lane.b32.xlu1 %v5070_v31, %s4842_s26 }
  0x98   :  { %v184_v13 = vpop.permute.xlu0 %183  ;;  %v186_v17 = vpop.permute.xlu1 %185 }
  0x99   :  { %262 = vst.msk [vmem:[#allocation2 + $0x90] sm:$0xff] %vm243_vm1, %v184_v13  ;;  %263 = vst.msk [vmem:[#allocation2 + $0x98] sm:$0xff] %vm243_vm1, %v186_v17 }
  0x9a   :  { %560 = vrot.lane.b32.xlu0 %v5075_v32, %s4842_s26  ;;  %562 = vrot.lane.b32.xlu1 %v5080_v33, %s4842_s26 }
  0x9c   :  { %v188_v12 = vpop.permute.xlu0 %187  ;;  %v190_v61 = vpop.permute.xlu1 %189 }
  0x9d   :  { %264 = vst.msk [vmem:[#allocation2 + $0xa0] sm:$0xff] %vm243_vm1, %v188_v12  ;;  %265 = vst.msk [vmem:[#allocation2 + $0xa8] sm:$0xff] %vm243_vm1, %v190_v61 }
  0x9e   :  { %564 = vrot.lane.b32.xlu0 %v5095_v34, %s4842_s26  ;;  %566 = vrot.lane.b32.xlu1 %v5100_v35, %s4842_s26 }
  0xa0   :  { %v192_v2 = vpop.permute.xlu0 %191  ;;  %v194_v63 = vpop.permute.xlu1 %193 }
  0xa1   :  { %266 = vst.msk [vmem:[#allocation2 + $0xb0] sm:$0xff] %vm243_vm1, %v192_v2  ;;  %267 = vst.msk [vmem:[#allocation2 + $0xb8] sm:$0xff] %vm243_vm1, %v194_v63 }
  0xa2   :  { %568 = vrot.lane.b32.xlu0 %v5109_v36, %s4842_s26  ;;  %570 = vrot.lane.b32.xlu1 %v5114_v37, %s4842_s26 }
  0xa4   :  { %v196_v13 = vpop.permute.xlu0 %195  ;;  %v198_v17 = vpop.permute.xlu1 %197 }
  0xa5   :  { %268 = vst.msk [vmem:[#allocation2 + $0xc0] sm:$0xff] %vm243_vm1, %v196_v13  ;;  %269 = vst.msk [vmem:[#allocation2 + $0xc8] sm:$0xff] %vm243_vm1, %v198_v17 }
  0xa6   :  { %572 = vrot.lane.b32.xlu0 %v5119_v38, %s4842_s26  ;;  %574 = vrot.lane.b32.xlu1 %v5130_v39, %s4842_s26 }
  0xa8   :  { %v200_v12 = vpop.permute.xlu0 %199  ;;  %v202_v61 = vpop.permute.xlu1 %201 }
  0xa9   :  { %270 = vst.msk [vmem:[#allocation2 + $0xd0] sm:$0xff] %vm243_vm1, %v200_v12  ;;  %271 = vst.msk [vmem:[#allocation2 + $0xd8] sm:$0xff] %vm243_vm1, %v202_v61 }
  0xaa   :  { %576 = vrot.lane.b32.xlu0 %v5135_v40, %s4842_s26  ;;  %578 = vrot.lane.b32.xlu1 %v5140_v41, %s4842_s26 }
  0xac   :  { %v204_v2 = vpop.permute.xlu0 %203  ;;  %v206_v63 = vpop.permute.xlu1 %205 }
  0xad   :  { %272 = vst.msk [vmem:[#allocation2 + $0xe0] sm:$0xff] %vm243_vm1, %v204_v2  ;;  %273 = vst.msk [vmem:[#allocation2 + $0xe8] sm:$0xff] %vm243_vm1, %v206_v63 }
  0xae   :  { %580 = vrot.lane.b32.xlu0 %v5165_v44, %s4842_s26  ;;  %582 = vrot.lane.b32.xlu1 %v5172_v45, %s4842_s26 }
  0xb0   :  { %v208_v13 = vpop.permute.xlu0 %207  ;;  %v210_v17 = vpop.permute.xlu1 %209 }
  0xb1   :  { %274 = vst.msk [vmem:[#allocation2 + $0xf0] sm:$0xff] %vm243_vm1, %v208_v13  ;;  %275 = vst.msk [vmem:[#allocation2 + $0xf8] sm:$0xff] %vm243_vm1, %v210_v17  ;;  %v5623_v13 = vld [vmem:[%s7700_s0 + $0x180] sm:$0xff]  ;;  %v5628_v17 = vld [vmem:[%s7700_s0 + $0x188] sm:$0xff] }
  0xb2   :  { %584 = vrot.lane.b32.xlu0 %v5193_v48, %s4842_s26  ;;  %586 = vrot.lane.b32.xlu1 %v5200_v49, %s4842_s26 }
  0xb4   :  { %v341_v12 = vpop.permute.xlu0 %340  ;;  %v343_v61 = vpop.permute.xlu1 %342 }
  0xb5   :  { %437 = vst.msk [vmem:[#allocation2] sm:$0xff] %vm436_vm2, %v341_v12  ;;  %438 = vst.msk [vmem:[#allocation2 + $0x8] sm:$0xff] %vm436_vm2, %v343_v61 }
  0xb6   :  { %588 = vrot.lane.b32.xlu0 %v5221_v52, %s4842_s26  ;;  %590 = vrot.lane.b32.xlu1 %v5228_v53, %s4842_s26 }
  0xb8   :  { %v345_v2 = vpop.permute.xlu0 %344  ;;  %v347_v63 = vpop.permute.xlu1 %346 }
  0xb9   :  { %439 = vst.msk [vmem:[#allocation2 + $0x10] sm:$0xff] %vm436_vm2, %v345_v2  ;;  %440 = vst.msk [vmem:[#allocation2 + $0x18] sm:$0xff] %vm436_vm2, %v347_v63 }
  0xba   :  { %592 = vrot.lane.b32.xlu0 %v5249_v56, %s4842_s26  ;;  %594 = vrot.lane.b32.xlu1 %v5256_v57, %s4842_s26 }
  0xbc   :  { %v349_v12 = vpop.permute.xlu0 %348  ;;  %v351_v61 = vpop.permute.xlu1 %350 }
  0xbd   :  { %441 = vst.msk [vmem:[#allocation2 + $0x20] sm:$0xff] %vm436_vm2, %v349_v12  ;;  %442 = vst.msk [vmem:[#allocation2 + $0x28] sm:$0xff] %vm436_vm2, %v351_v61 }
  0xbe   :  { %596 = vrot.lane.b32.xlu0 %v5623_v13, %s4842_s26  ;;  %598 = vrot.lane.b32.xlu1 %v5628_v17, %s4842_s26 }
  0xc0   :  { %v353_v2 = vpop.permute.xlu0 %352  ;;  %v355_v63 = vpop.permute.xlu1 %354 }
  0xc1   :  { %443 = vst.msk [vmem:[#allocation2 + $0x30] sm:$0xff] %vm436_vm2, %v353_v2  ;;  %444 = vst.msk [vmem:[#allocation2 + $0x38] sm:$0xff] %vm436_vm2, %v355_v63 }
  0xc2   :  { %729 = vrot.lane.b32.xlu0 %v4876_v1, %s4843_s4  ;;  %731 = vrot.lane.b32.xlu1 %v4887_v3, %s4843_s4 }
  0xc4   :  { %v357_v12 = vpop.permute.xlu0 %356  ;;  %v359_v61 = vpop.permute.xlu1 %358 }
  0xc5   :  { %445 = vst.msk [vmem:[#allocation2 + $0x40] sm:$0xff] %vm436_vm2, %v357_v12  ;;  %446 = vst.msk [vmem:[#allocation2 + $0x48] sm:$0xff] %vm436_vm2, %v359_v61  ;;  %v5729_v61 = vld [vmem:[%s7700_s0 + $0x181] sm:$0xff] }
  0xc6   :  { %733 = vrot.lane.b32.xlu0 %v4895_v4, %s4843_s4  ;;  %735 = vrot.lane.b32.xlu1 %v4900_v5, %s4843_s4 }
  0xc8   :  { %v361_v2 = vpop.permute.xlu0 %360  ;;  %v363_v63 = vpop.permute.xlu1 %362 }
  0xc9   :  { %447 = vst.msk [vmem:[#allocation2 + $0x50] sm:$0xff] %vm436_vm2, %v361_v2  ;;  %448 = vst.msk [vmem:[#allocation2 + $0x58] sm:$0xff] %vm436_vm2, %v363_v63 }
  0xca   :  { %737 = vrot.lane.b32.xlu0 %v4909_v6, %s4843_s4  ;;  %739 = vrot.lane.b32.xlu1 %v4914_v7, %s4843_s4 }
  0xcc   :  { %v365_v1 = vpop.permute.xlu0 %364  ;;  %v367_v3 = vpop.permute.xlu1 %366 }
  0xcd   :  { %449 = vst.msk [vmem:[#allocation2 + $0x60] sm:$0xff] %vm436_vm2, %v365_v1  ;;  %450 = vst.msk [vmem:[#allocation2 + $0x68] sm:$0xff] %vm436_vm2, %v367_v3 }
  0xce   :  { %741 = vrot.lane.b32.xlu0 %v4923_v8, %s4843_s4  ;;  %743 = vrot.lane.b32.xlu1 %v4928_v9, %s4843_s4 }
  0xd0   :  { %v369_v4 = vpop.permute.xlu0 %368  ;;  %v371_v5 = vpop.permute.xlu1 %370 }
  0xd1   :  { %451 = vst.msk [vmem:[#allocation2 + $0x70] sm:$0xff] %vm436_vm2, %v369_v4  ;;  %452 = vst.msk [vmem:[#allocation2 + $0x78] sm:$0xff] %vm436_vm2, %v371_v5  ;;  %v7767_v4 = vld [vmem:[#allocation9_spill] sm:$0xff]  ;;  %v7768_v5 = vld [vmem:[#allocation10_spill] sm:$0xff] }
  0xd2   :  { %745 = vrot.lane.b32.xlu0 %v4937_v10, %s4843_s4  ;;  %747 = vrot.lane.b32.xlu1 %v4942_v11, %s4843_s4 }
  0xd4   :  { %v373_v6 = vpop.permute.xlu0 %372  ;;  %v375_v7 = vpop.permute.xlu1 %374 }
  0xd5   :  { %453 = vst.msk [vmem:[#allocation2 + $0x80] sm:$0xff] %vm436_vm2, %v373_v6  ;;  %454 = vst.msk [vmem:[#allocation2 + $0x88] sm:$0xff] %vm436_vm2, %v375_v7 }
  0xd6   :  { %749 = vrot.lane.b32.xlu0 %v4959_v14, %s4843_s4  ;;  %751 = vrot.lane.b32.xlu1 %v4964_v15, %s4843_s4 }
  0xd8   :  { %v377_v8 = vpop.permute.xlu0 %376  ;;  %v379_v9 = vpop.permute.xlu1 %378 }
  0xd9   :  { %455 = vst.msk [vmem:[#allocation2 + $0x90] sm:$0xff] %vm436_vm2, %v377_v8  ;;  %456 = vst.msk [vmem:[#allocation2 + $0x98] sm:$0xff] %vm436_vm2, %v379_v9  ;;  %v7769_v8 = vld [vmem:[#allocation11_spill] sm:$0xff]  ;;  %v7770_v9 = vld [vmem:[#allocation12_spill] sm:$0xff] }
  0xda   :  { %753 = vrot.lane.b32.xlu0 %v4981_v18, %s4843_s4  ;;  %755 = vrot.lane.b32.xlu1 %v5002_v21, %s4843_s4 }
  0xdc   :  { %v381_v10 = vpop.permute.xlu0 %380  ;;  %v383_v11 = vpop.permute.xlu1 %382 }
  0xdd   :  { %457 = vst.msk [vmem:[#allocation2 + $0xa0] sm:$0xff] %vm436_vm2, %v381_v10  ;;  %458 = vst.msk [vmem:[#allocation2 + $0xa8] sm:$0xff] %vm436_vm2, %v383_v11 }
  0xde   :  { %757 = vrot.lane.b32.xlu0 %v5054_v29, %s4843_s4  ;;  %759 = vrot.lane.b32.xlu1 %v5059_v30, %s4843_s4 }
  0xe0   :  { %v385_v14 = vpop.permute.xlu0 %384  ;;  %v387_v15 = vpop.permute.xlu1 %386 }
  0xe1   :  { %459 = vst.msk [vmem:[#allocation2 + $0xb0] sm:$0xff] %vm436_vm2, %v385_v14  ;;  %460 = vst.msk [vmem:[#allocation2 + $0xb8] sm:$0xff] %vm436_vm2, %v387_v15  ;;  %v7771_v14 = vld [vmem:[#allocation13_spill] sm:$0xff]  ;;  %v7772_v15 = vld [vmem:[#allocation14_spill] sm:$0xff] }
  0xe2   :  { %761 = vrot.lane.b32.xlu0 %v5155_v42, %s4843_s4  ;;  %763 = vrot.lane.b32.xlu1 %v5160_v43, %s4843_s4 }
  0xe4   :  { %v389_v18 = vpop.permute.xlu0 %388  ;;  %v391_v21 = vpop.permute.xlu1 %390 }
  0xe5   :  { %461 = vst.msk [vmem:[#allocation2 + $0xc0] sm:$0xff] %vm436_vm2, %v389_v18  ;;  %462 = vst.msk [vmem:[#allocation2 + $0xc8] sm:$0xff] %vm436_vm2, %v391_v21 }
  0xe6   :  { %765 = vrot.lane.b32.xlu0 %v5183_v46, %s4843_s4  ;;  %767 = vrot.lane.b32.xlu1 %v5188_v47, %s4843_s4 }
  0xe8   :  { %v393_v29 = vpop.permute.xlu0 %392  ;;  %v395_v30 = vpop.permute.xlu1 %394 }
  0xe9   :  { %463 = vst.msk [vmem:[#allocation2 + $0xd0] sm:$0xff] %vm436_vm2, %v393_v29  ;;  %464 = vst.msk [vmem:[#allocation2 + $0xd8] sm:$0xff] %vm436_vm2, %v395_v30  ;;  %v7773_v29 = vld [vmem:[#allocation15_spill] sm:$0xff]  ;;  %v7774_v30 = vld [vmem:[#allocation16_spill] sm:$0xff] }
  0xea   :  { %769 = vrot.lane.b32.xlu0 %v5211_v50, %s4843_s4  ;;  %771 = vrot.lane.b32.xlu1 %v5216_v51, %s4843_s4 }
  0xec   :  { %v397_v42 = vpop.permute.xlu0 %396  ;;  %v399_v43 = vpop.permute.xlu1 %398 }
  0xed   :  { %465 = vst.msk [vmem:[#allocation2 + $0xe0] sm:$0xff] %vm436_vm2, %v397_v42  ;;  %466 = vst.msk [vmem:[#allocation2 + $0xe8] sm:$0xff] %vm436_vm2, %v399_v43 }
  0xee   :  { %773 = vrot.lane.b32.xlu0 %v5239_v54, %s4843_s4  ;;  %775 = vrot.lane.b32.xlu1 %v5244_v55, %s4843_s4  ;;  %v7764_v54 = vld [vmem:[#allocation6_spill] sm:$0xff] }
  0xf0   :  { %v401_v46 = vpop.permute.xlu0 %400  ;;  %v403_v47 = vpop.permute.xlu1 %402 }
  0xf1   :  { %467 = vst.msk [vmem:[#allocation2 + $0xf0] sm:$0xff] %vm436_vm2, %v401_v46  ;;  %468 = vst.msk [vmem:[#allocation2 + $0xf8] sm:$0xff] %vm436_vm2, %v403_v47  ;;  %v7775_v46 = vld [vmem:[#allocation17_spill] sm:$0xff]  ;;  %v7776_v47 = vld [vmem:[#allocation18_spill] sm:$0xff] }
  0xf2   :  { %777 = vrot.lane.b32.xlu0 %v5267_v58, %s4843_s4  ;;  %779 = vrot.lane.b32.xlu1 %v5272_v59, %s4843_s4  ;;  %v7765_v58 = vld [vmem:[#allocation7_spill] sm:$0xff]  ;;  %v7766_v59 = vld [vmem:[#allocation8_spill] sm:$0xff] }
  0xf4   :  { %v537_v50 = vpop.permute.xlu0 %536  ;;  %v539_v51 = vpop.permute.xlu1 %538 }
  0xf5   :  { %633 = vst.msk [vmem:[#allocation2] sm:$0xff] %vm632_vm3, %v537_v50  ;;  %634 = vst.msk [vmem:[#allocation2 + $0x8] sm:$0xff] %vm632_vm3, %v539_v51 }
  0xf6   :  { %781 = vrot.lane.b32.xlu0 %v5281_v60, %s4843_s4  ;;  %783 = vrot.lane.b32.xlu1 %v7764_v54, %s4843_s4  ;;  %v5734_v60 = vld [vmem:[%s7700_s0 + $0x189] sm:$0xff] }
  0xf7   :  { %v7777_v54 = vld [vmem:[#allocation19_spill] sm:$0xff] }
  0xf8   :  { %v541_v55 = vpop.permute.xlu0 %540  ;;  %v543_v12 = vpop.permute.xlu1 %542 }
  0xf9   :  { %635 = vst.msk [vmem:[#allocation2 + $0x10] sm:$0xff] %vm632_vm3, %v541_v55  ;;  %636 = vst.msk [vmem:[#allocation2 + $0x18] sm:$0xff] %vm632_vm3, %v543_v12  ;;  %v7778_v55 = vld [vmem:[#allocation20_spill] sm:$0xff] }
  0xfa   :  { %785 = vrot.lane.b32.xlu0 %v7765_v58, %s4843_s4  ;;  %787 = vrot.lane.b32.xlu1 %v7766_v59, %s4843_s4  ;;  %v7779_v59 = vld [vmem:[#allocation21_spill] sm:$0xff] }
  0xfc   :  { %v545_v2 = vpop.permute.xlu0 %544  ;;  %v547_v63 = vpop.permute.xlu1 %546 }
  0xfd   :  { %637 = vst.msk [vmem:[#allocation2 + $0x20] sm:$0xff] %vm632_vm3, %v545_v2  ;;  %638 = vst.msk [vmem:[#allocation2 + $0x28] sm:$0xff] %vm632_vm3, %v547_v63  ;;  %v7780_v2 = vld [vmem:[#allocation22_spill] sm:$0xff] }
  0xfe   :  { %789 = vrot.lane.b32.xlu0 %v5729_v61, %s4843_s4  ;;  %791 = vrot.lane.b32.xlu1 %v5734_v60, %s4843_s4 }
 0x100   :  { %v549_v1 = vpop.permute.xlu0 %548  ;;  %v551_v3 = vpop.permute.xlu1 %550 }
 0x101   :  { %639 = vst.msk [vmem:[#allocation2 + $0x30] sm:$0xff] %vm632_vm3, %v549_v1  ;;  %640 = vst.msk [vmem:[#allocation2 + $0x38] sm:$0xff] %vm632_vm3, %v551_v3  ;;  %v7781_v3 = vld [vmem:[#allocation23_spill] sm:$0xff] }
 0x102   :  { %922 = vrot.lane.b32.xlu0 %v7767_v4, %s4844_s9  ;;  %924 = vrot.lane.b32.xlu1 %v7768_v5, %s4844_s9  ;;  %v7782_v4 = vld [vmem:[#allocation24_spill] sm:$0xff] }
 0x104   :  { %v553_v6 = vpop.permute.xlu0 %552  ;;  %v555_v7 = vpop.permute.xlu1 %554 }
 0x105   :  { %641 = vst.msk [vmem:[#allocation2 + $0x40] sm:$0xff] %vm632_vm3, %v553_v6  ;;  %642 = vst.msk [vmem:[#allocation2 + $0x48] sm:$0xff] %vm632_vm3, %v555_v7  ;;  %v7783_v7 = vld [vmem:[#allocation25_spill] sm:$0xff] }
 0x106   :  { %926 = vrot.lane.b32.xlu0 %v7769_v8, %s4844_s9  ;;  %928 = vrot.lane.b32.xlu1 %v7770_v9, %s4844_s9  ;;  %v7784_v8 = vld [vmem:[#allocation26_spill] sm:$0xff] }
 0x108   :  { %v557_v10 = vpop.permute.xlu0 %556  ;;  %v559_v11 = vpop.permute.xlu1 %558 }
 0x109   :  { %643 = vst.msk [vmem:[#allocation2 + $0x50] sm:$0xff] %vm632_vm3, %v557_v10  ;;  %644 = vst.msk [vmem:[#allocation2 + $0x58] sm:$0xff] %vm632_vm3, %v559_v11  ;;  %v7785_v11 = vld [vmem:[#allocation27_spill] sm:$0xff] }
 0x10a   :  { %930 = vrot.lane.b32.xlu0 %v7771_v14, %s4844_s9  ;;  %932 = vrot.lane.b32.xlu1 %v7772_v15, %s4844_s9  ;;  %v7786_v14 = vld [vmem:[#allocation28_spill] sm:$0xff] }
 0x10c   :  { %v561_v18 = vpop.permute.xlu0 %560  ;;  %v563_v21 = vpop.permute.xlu1 %562 }
 0x10d   :  { %645 = vst.msk [vmem:[#allocation2 + $0x60] sm:$0xff] %vm632_vm3, %v561_v18  ;;  %646 = vst.msk [vmem:[#allocation2 + $0x68] sm:$0xff] %vm632_vm3, %v563_v21  ;;  %v7787_v21 = vld [vmem:[#allocation29_spill] sm:$0xff] }
 0x10e   :  { %934 = vrot.lane.b32.xlu0 %v7773_v29, %s4844_s9  ;;  %936 = vrot.lane.b32.xlu1 %v7774_v30, %s4844_s9  ;;  %v7788_v29 = vld [vmem:[#allocation30_spill] sm:$0xff] }
 0x110   :  { %v565_v42 = vpop.permute.xlu0 %564  ;;  %v567_v43 = vpop.permute.xlu1 %566 }
 0x111   :  { %647 = vst.msk [vmem:[#allocation2 + $0x70] sm:$0xff] %vm632_vm3, %v565_v42  ;;  %648 = vst.msk [vmem:[#allocation2 + $0x78] sm:$0xff] %vm632_vm3, %v567_v43  ;;  %v7789_v43 = vld [vmem:[#allocation31_spill] sm:$0xff] }
 0x112   :  { %938 = vrot.lane.b32.xlu0 %v7775_v46, %s4844_s9  ;;  %940 = vrot.lane.b32.xlu1 %v7776_v47, %s4844_s9  ;;  %v7790_v46 = vld [vmem:[#allocation32_spill] sm:$0xff] }
 0x114   :  { %v569_v50 = vpop.permute.xlu0 %568  ;;  %v571_v51 = vpop.permute.xlu1 %570 }
 0x115   :  { %649 = vst.msk [vmem:[#allocation2 + $0x80] sm:$0xff] %vm632_vm3, %v569_v50  ;;  %650 = vst.msk [vmem:[#allocation2 + $0x88] sm:$0xff] %vm632_vm3, %v571_v51  ;;  %v7791_v51 = vld [vmem:[#allocation33_spill] sm:$0xff] }
 0x116   :  { %942 = vrot.lane.b32.xlu0 %v7777_v54, %s4844_s9  ;;  %944 = vrot.lane.b32.xlu1 %v7778_v55, %s4844_s9  ;;  %v7792_v54 = vld [vmem:[#allocation34_spill] sm:$0xff] }
 0x118   :  { %v573_v12 = vpop.permute.xlu0 %572  ;;  %v575_v58 = vpop.permute.xlu1 %574 }
 0x119   :  { %651 = vst.msk [vmem:[#allocation2 + $0x90] sm:$0xff] %vm632_vm3, %v573_v12  ;;  %652 = vst.msk [vmem:[#allocation2 + $0x98] sm:$0xff] %vm632_vm3, %v575_v58  ;;  %v7793_v58 = vld [vmem:[#allocation35_spill] sm:$0xff] }
 0x11a   :  { %946 = vrot.lane.b32.xlu0 %v7779_v59, %s4844_s9  ;;  %948 = vrot.lane.b32.xlu1 %v7780_v2, %s4844_s9 }
 0x11c   :  { %v577_v63 = vpop.permute.xlu0 %576  ;;  %v579_v1 = vpop.permute.xlu1 %578 }
 0x11d   :  { %653 = vst.msk [vmem:[#allocation2 + $0xa0] sm:$0xff] %vm632_vm3, %v577_v63  ;;  %654 = vst.msk [vmem:[#allocation2 + $0xa8] sm:$0xff] %vm632_vm3, %v579_v1  ;;  %v5835_v63 = vld [vmem:[%s7700_s0 + $0x182] sm:$0xff] }
 0x11e   :  { %950 = vrot.lane.b32.xlu0 %v7781_v3, %s4844_s9  ;;  %952 = vrot.lane.b32.xlu1 %v7782_v4, %s4844_s9 }
 0x120   :  { %v581_v5 = vpop.permute.xlu0 %580  ;;  %v583_v6 = vpop.permute.xlu1 %582 }
 0x121   :  { %655 = vst.msk [vmem:[#allocation2 + $0xb0] sm:$0xff] %vm632_vm3, %v581_v5  ;;  %656 = vst.msk [vmem:[#allocation2 + $0xb8] sm:$0xff] %vm632_vm3, %v583_v6 }
 0x122   :  { %954 = vrot.lane.b32.xlu0 %v7783_v7, %s4844_s9  ;;  %956 = vrot.lane.b32.xlu1 %v7784_v8, %s4844_s9 }
 0x124   :  { %v585_v9 = vpop.permute.xlu0 %584  ;;  %v587_v10 = vpop.permute.xlu1 %586 }
 0x125   :  { %657 = vst.msk [vmem:[#allocation2 + $0xc0] sm:$0xff] %vm632_vm3, %v585_v9  ;;  %658 = vst.msk [vmem:[#allocation2 + $0xc8] sm:$0xff] %vm632_vm3, %v587_v10  ;;  %v4177_v10 = vld [vmem:[%s7700_s0 + $0x49] sm:$0xff] }
 0x126   :  { %958 = vrot.lane.b32.xlu0 %v7785_v11, %s4844_s9  ;;  %960 = vrot.lane.b32.xlu1 %v7786_v14, %s4844_s9  ;;  %v4178_v11 = vld [vmem:[%s7700_s0 + $0x51] sm:$0xff] }
 0x128   :  { %v589_v15 = vpop.permute.xlu0 %588  ;;  %v591_v18 = vpop.permute.xlu1 %590 }
 0x129   :  { %659 = vst.msk [vmem:[#allocation2 + $0xd0] sm:$0xff] %vm632_vm3, %v589_v15  ;;  %660 = vst.msk [vmem:[#allocation2 + $0xd8] sm:$0xff] %vm632_vm3, %v591_v18  ;;  %v4179_v18 = vld [vmem:[%s7700_s0 + $0x61] sm:$0xff] }
 0x12a   :  { %962 = vrot.lane.b32.xlu0 %v7787_v21, %s4844_s9  ;;  %964 = vrot.lane.b32.xlu1 %v7788_v29, %s4844_s9  ;;  %v4180_v21 = vld [vmem:[%s7700_s0 + $0x69] sm:$0xff] }
 0x12c   :  { %v593_v30 = vpop.permute.xlu0 %592  ;;  %v595_v42 = vpop.permute.xlu1 %594 }
 0x12d   :  { %661 = vst.msk [vmem:[#allocation2 + $0xe0] sm:$0xff] %vm632_vm3, %v593_v30  ;;  %662 = vst.msk [vmem:[#allocation2 + $0xe8] sm:$0xff] %vm632_vm3, %v595_v42  ;;  %v4181_v42 = vld [vmem:[%s7700_s0 + $0x79] sm:$0xff] }
 0x12e   :  { %966 = vrot.lane.b32.xlu0 %v7789_v43, %s4844_s9  ;;  %968 = vrot.lane.b32.xlu1 %v7790_v46, %s4844_s9  ;;  %v4182_v43 = vld [vmem:[%s7700_s0 + $0x81] sm:$0xff] }
 0x130   :  { %v597_v47 = vpop.permute.xlu0 %596  ;;  %v599_v50 = vpop.permute.xlu1 %598 }
 0x131   :  { %663 = vst.msk [vmem:[#allocation2 + $0xf0] sm:$0xff] %vm632_vm3, %v597_v47  ;;  %664 = vst.msk [vmem:[#allocation2 + $0xf8] sm:$0xff] %vm632_vm3, %v599_v50  ;;  %v4183_v50 = vld [vmem:[%s7700_s0 + $0x91] sm:$0xff] }
 0x132   :  { %970 = vrot.lane.b32.xlu0 %v7791_v51, %s4844_s9  ;;  %972 = vrot.lane.b32.xlu1 %v7792_v54, %s4844_s9  ;;  %v4184_v51 = vld [vmem:[%s7700_s0 + $0x99] sm:$0xff] }
 0x134   :  { %v730_v55 = vpop.permute.xlu0 %729  ;;  %v732_v12 = vpop.permute.xlu1 %731 }
 0x135   :  { %826 = vst.msk [vmem:[#allocation2] sm:$0xff] %vm825_vm4, %v730_v55  ;;  %827 = vst.msk [vmem:[#allocation2 + $0x8] sm:$0xff] %vm825_vm4, %v732_v12  ;;  %v4185_v12 = vld [vmem:[%s7700_s0 + $0xa9] sm:$0xff] }
 0x136   :  { %974 = vrot.lane.b32.xlu0 %v5501_v0, %s4844_s9  ;;  %976 = vrot.lane.b32.xlu1 %v7793_v58, %s4844_s9  ;;  %v5840_v0 = vld [vmem:[%s7700_s0 + $0x18a] sm:$0xff] }
 0x137   :  { %v4186_v58 = vld [vmem:[%s7700_s0 + $0xb1] sm:$0xff] }
 0x138   :  { %v734_v59 = vpop.permute.xlu0 %733  ;;  %v736_v2 = vpop.permute.xlu1 %735 }
 0x139   :  { %828 = vst.msk [vmem:[#allocation2 + $0x10] sm:$0xff] %vm825_vm4, %v734_v59  ;;  %829 = vst.msk [vmem:[#allocation2 + $0x18] sm:$0xff] %vm825_vm4, %v736_v2 }
 0x13a   :  { %978 = vrot.lane.b32.xlu0 %v5517_v62, %s4844_s9  ;;  %980 = vrot.lane.b32.xlu1 %v5522_v16, %s4844_s9 }
 0x13c   :  { %v738_v1 = vpop.permute.xlu0 %737  ;;  %v740_v3 = vpop.permute.xlu1 %739 }
 0x13d   :  { %830 = vst.msk [vmem:[#allocation2 + $0x20] sm:$0xff] %vm825_vm4, %v738_v1  ;;  %831 = vst.msk [vmem:[#allocation2 + $0x28] sm:$0xff] %vm825_vm4, %v740_v3  ;;  %v4187_v1 = vld [vmem:[%s7700_s0 + $0xc1] sm:$0xff]  ;;  %v4188_v3 = vld [vmem:[%s7700_s0 + $0xc9] sm:$0xff] }
 0x13e   :  { %982 = vrot.lane.b32.xlu0 %v5835_v63, %s4844_s9  ;;  %984 = vrot.lane.b32.xlu1 %v5840_v0, %s4844_s9 }
 0x140   :  { %v742_v16 = vpop.permute.xlu0 %741  ;;  %v744_v62 = vpop.permute.xlu1 %743 }
 0x141   :  { %832 = vst.msk [vmem:[#allocation2 + $0x30] sm:$0xff] %vm825_vm4, %v742_v16  ;;  %833 = vst.msk [vmem:[#allocation2 + $0x38] sm:$0xff] %vm825_vm4, %v744_v62 }
 0x142   :  { %1118 = vrot.lane.b32.xlu0 %v4988_v19, %s4845_s15  ;;  %1120 = vrot.lane.b32.xlu1 %v4993_v20, %s4845_s15 }
 0x144   :  { %v746_v4 = vpop.permute.xlu0 %745  ;;  %v748_v5 = vpop.permute.xlu1 %747 }
 0x145   :  { %834 = vst.msk [vmem:[#allocation2 + $0x40] sm:$0xff] %vm825_vm4, %v746_v4  ;;  %835 = vst.msk [vmem:[#allocation2 + $0x48] sm:$0xff] %vm825_vm4, %v748_v5  ;;  %v4189_v4 = vld [vmem:[%s7700_s0 + $0xd9] sm:$0xff]  ;;  %v4190_v5 = vld [vmem:[%s7700_s0 + $0xe1] sm:$0xff] }
 0x146   :  { %1122 = vrot.lane.b32.xlu0 %v5011_v22, %s4845_s15  ;;  %1124 = vrot.lane.b32.xlu1 %v5018_v23, %s4845_s15 }
 0x148   :  { %v750_v6 = vpop.permute.xlu0 %749  ;;  %v752_v7 = vpop.permute.xlu1 %751 }
 0x149   :  { %836 = vst.msk [vmem:[#allocation2 + $0x50] sm:$0xff] %vm825_vm4, %v750_v6  ;;  %837 = vst.msk [vmem:[#allocation2 + $0x58] sm:$0xff] %vm825_vm4, %v752_v7 }
 0x14a   :  { %1126 = vrot.lane.b32.xlu0 %v5023_v24, %s4845_s15  ;;  %1128 = vrot.lane.b32.xlu1 %v5028_v25, %s4845_s15 }
 0x14c   :  { %v754_v19 = vpop.permute.xlu0 %753  ;;  %v756_v20 = vpop.permute.xlu1 %755 }
 0x14d   :  { %838 = vst.msk [vmem:[#allocation2 + $0x60] sm:$0xff] %vm825_vm4, %v754_v19  ;;  %839 = vst.msk [vmem:[#allocation2 + $0x68] sm:$0xff] %vm825_vm4, %v756_v20  ;;  %v4191_v19 = vld [vmem:[%s7700_s0 + $0xf1] sm:$0xff]  ;;  %v4192_v20 = vld [vmem:[%s7700_s0 + $0xf9] sm:$0xff] }
 0x14e   :  { %1130 = vrot.lane.b32.xlu0 %v5039_v26, %s4845_s15  ;;  %1132 = vrot.lane.b32.xlu1 %v5044_v27, %s4845_s15 }
 0x150   :  { %v758_v22 = vpop.permute.xlu0 %757  ;;  %v760_v23 = vpop.permute.xlu1 %759 }
 0x151   :  { %840 = vst.msk [vmem:[#allocation2 + $0x70] sm:$0xff] %vm825_vm4, %v758_v22  ;;  %841 = vst.msk [vmem:[#allocation2 + $0x78] sm:$0xff] %vm825_vm4, %v760_v23 }
 0x152   :  { %1134 = vrot.lane.b32.xlu0 %v5049_v28, %s4845_s15  ;;  %1136 = vrot.lane.b32.xlu1 %v5070_v31, %s4845_s15 }
 0x154   :  { %v762_v24 = vpop.permute.xlu0 %761  ;;  %v764_v25 = vpop.permute.xlu1 %763 }
 0x155   :  { %842 = vst.msk [vmem:[#allocation2 + $0x80] sm:$0xff] %vm825_vm4, %v762_v24  ;;  %843 = vst.msk [vmem:[#allocation2 + $0x88] sm:$0xff] %vm825_vm4, %v764_v25  ;;  %v4193_v24 = vld [vmem:[%s7700_s0 + $0x109] sm:$0xff]  ;;  %v4194_v25 = vld [vmem:[%s7700_s0 + $0x111] sm:$0xff] }
 0x156   :  { %1138 = vrot.lane.b32.xlu0 %v5075_v32, %s4845_s15  ;;  %1140 = vrot.lane.b32.xlu1 %v5080_v33, %s4845_s15 }
 0x158   :  { %v766_v26 = vpop.permute.xlu0 %765  ;;  %v768_v27 = vpop.permute.xlu1 %767 }
 0x159   :  { %844 = vst.msk [vmem:[#allocation2 + $0x90] sm:$0xff] %vm825_vm4, %v766_v26  ;;  %845 = vst.msk [vmem:[#allocation2 + $0x98] sm:$0xff] %vm825_vm4, %v768_v27 }
 0x15a   :  { %1142 = vrot.lane.b32.xlu0 %v5095_v34, %s4845_s15  ;;  %1144 = vrot.lane.b32.xlu1 %v5100_v35, %s4845_s15 }
 0x15c   :  { %v770_v28 = vpop.permute.xlu0 %769  ;;  %v772_v31 = vpop.permute.xlu1 %771 }
 0x15d   :  { %846 = vst.msk [vmem:[#allocation2 + $0xa0] sm:$0xff] %vm825_vm4, %v770_v28  ;;  %847 = vst.msk [vmem:[#allocation2 + $0xa8] sm:$0xff] %vm825_vm4, %v772_v31  ;;  %v4195_v28 = vld [vmem:[%s7700_s0 + $0x121] sm:$0xff]  ;;  %v4196_v31 = vld [vmem:[%s7700_s0 + $0x129] sm:$0xff] }
 0x15e   :  { %1146 = vrot.lane.b32.xlu0 %v5109_v36, %s4845_s15  ;;  %1148 = vrot.lane.b32.xlu1 %v5114_v37, %s4845_s15 }
 0x160   :  { %v774_v32 = vpop.permute.xlu0 %773  ;;  %v776_v33 = vpop.permute.xlu1 %775 }
 0x161   :  { %848 = vst.msk [vmem:[#allocation2 + $0xb0] sm:$0xff] %vm825_vm4, %v774_v32  ;;  %849 = vst.msk [vmem:[#allocation2 + $0xb8] sm:$0xff] %vm825_vm4, %v776_v33 }
 0x162   :  { %1150 = vrot.lane.b32.xlu0 %v5119_v38, %s4845_s15  ;;  %1152 = vrot.lane.b32.xlu1 %v5130_v39, %s4845_s15 }
 0x164   :  { %v778_v34 = vpop.permute.xlu0 %777  ;;  %v780_v35 = vpop.permute.xlu1 %779 }
 0x165   :  { %850 = vst.msk [vmem:[#allocation2 + $0xc0] sm:$0xff] %vm825_vm4, %v778_v34  ;;  %851 = vst.msk [vmem:[#allocation2 + $0xc8] sm:$0xff] %vm825_vm4, %v780_v35  ;;  %v3303_v34 = vld [vmem:[%s7701_s1] sm:$0xff]  ;;  %v3304_v35 = vld [vmem:[%s7701_s1 + $0x8] sm:$0xff] }
 0x166   :  { %1154 = vrot.lane.b32.xlu0 %v5135_v40, %s4845_s15  ;;  %1156 = vrot.lane.b32.xlu1 %v5140_v41, %s4845_s15 }
 0x168   :  { %v782_v36 = vpop.permute.xlu0 %781  ;;  %v784_v37 = vpop.permute.xlu1 %783 }
 0x169   :  { %852 = vst.msk [vmem:[#allocation2 + $0xd0] sm:$0xff] %vm825_vm4, %v782_v36  ;;  %853 = vst.msk [vmem:[#allocation2 + $0xd8] sm:$0xff] %vm825_vm4, %v784_v37  ;;  %v4779_v36 = vpack.c.bf16 %v3304_v35, %v3303_v34  ;;  %v4197_v37 = vld [vmem:[%s7700_s0 + $0x139] sm:$0xff] }
 0x16a   :  { %1158 = vrot.lane.b32.xlu0 %v5165_v44, %s4845_s15  ;;  %1160 = vrot.lane.b32.xlu1 %v5172_v45, %s4845_s15  ;;  %v4223_v35 = vld [vmem:[%s7700_s0 + $0xf2] sm:$0xff] }
 0x16b   :  { %4780 = vmatprep.subr.bf16.mxu0 %v4779_v36  ;;  %4795 = vmatprep.subr.bf16.mxu1 %v4779_v36 }
 0x16c   :  { %v786_v38 = vpop.permute.xlu0 %785  ;;  %v788_v39 = vpop.permute.xlu1 %787  ;;  %4782 = vmatpush3.bf16.msra.mxu0 %v4779_v36  ;;  %4800 = vmatpush3.bf16.msra.mxu1 %v4779_v36  ;;  %v4224_v36 = vld [vmem:[%s7700_s0 + $0xfa] sm:$0xff] }
 0x16d   :  { %854 = vst.msk [vmem:[#allocation2 + $0xe0] sm:$0xff] %vm825_vm4, %v786_v38  ;;  %855 = vst.msk [vmem:[#allocation2 + $0xe8] sm:$0xff] %vm825_vm4, %v788_v39  ;;  %v4198_v38 = vld [vmem:[%s7700_s0 + $0x141] sm:$0xff] }
 0x16e   :  { %1162 = vrot.lane.b32.xlu0 %v5193_v48, %s4845_s15  ;;  %1164 = vrot.lane.b32.xlu1 %v5200_v49, %s4845_s15 }
 0x170   :  { %v790_v40 = vpop.permute.xlu0 %789  ;;  %v792_v41 = vpop.permute.xlu1 %791 }
 0x171   :  { %856 = vst.msk [vmem:[#allocation2 + $0xf0] sm:$0xff] %vm825_vm4, %v790_v40  ;;  %857 = vst.msk [vmem:[#allocation2 + $0xf8] sm:$0xff] %vm825_vm4, %v792_v41  ;;  %v3305_v41 = vld [vmem:[%s7701_s1 + $0x10] sm:$0xff] }
 0x172   :  { %1166 = vrot.lane.b32.xlu0 %v5221_v52, %s4845_s15  ;;  %1168 = vrot.lane.b32.xlu1 %v5228_v53, %s4845_s15  ;;  %v4173_v52 = vld [vmem:[%s7700_s0 + $0x198] sm:$0xff]  ;;  %v4174_v53 = vld [vmem:[%s7700_s0 + $0x1a0] sm:$0xff] }
 0x174   :  { %v923_v44 = vpop.permute.xlu0 %922  ;;  %v925_v45 = vpop.permute.xlu1 %924 }
 0x175   :  { %1019 = vst.msk [vmem:[#allocation2] sm:$0xff] %vm1018_vm5, %v923_v44  ;;  %1020 = vst.msk [vmem:[#allocation2 + $0x8] sm:$0xff] %vm1018_vm5, %v925_v45  ;;  %v3306_v44 = vld [vmem:[%s7701_s1 + $0x18] sm:$0xff] }
 0x176   :  { %1170 = vrot.lane.b32.xlu0 %v5249_v56, %s4845_s15  ;;  %1172 = vrot.lane.b32.xlu1 %v5256_v57, %s4845_s15  ;;  %v4783_v45 = vpack.c.bf16 %v3306_v44, %v3305_v41 }
 0x178   :  { %v927_v48 = vpop.permute.xlu0 %926  ;;  %v929_v49 = vpop.permute.xlu1 %928  ;;  %4784 = vmatprep.subr.bf16.mxu0 %v4783_v45  ;;  %4796 = vmatprep.subr.bf16.mxu1 %v4783_v45 }
 0x179   :  { %1021 = vst.msk [vmem:[#allocation2 + $0x10] sm:$0xff] %vm1018_vm5, %v927_v48  ;;  %1022 = vst.msk [vmem:[#allocation2 + $0x18] sm:$0xff] %vm1018_vm5, %v929_v49  ;;  %v4199_v48 = vld [vmem:[%s7700_s0 + $0x151] sm:$0xff]  ;;  %v4200_v49 = vld [vmem:[%s7700_s0 + $0x159] sm:$0xff]  ;;  %4786 = vmatpush3.bf16.msra.mxu0 %v4783_v45  ;;  %4801 = vmatpush3.bf16.msra.mxu1 %v4783_v45 }
 0x17a   :  { %1174 = vrot.lane.b32.xlu0 %v5623_v13, %s4845_s15  ;;  %1176 = vrot.lane.b32.xlu1 %v5628_v17, %s4845_s15  ;;  %v4175_v13 = vld [vmem:[%s7700_s0 + $0x31] sm:$0xff]  ;;  %v4176_v17 = vld [vmem:[%s7700_s0 + $0x39] sm:$0xff] }
 0x17b   :  { %v4227_v45 = vld [vmem:[%s7700_s0 + $0x122] sm:$0xff] }
 0x17c   :  { %v931_v56 = vpop.permute.xlu0 %930  ;;  %v933_v57 = vpop.permute.xlu1 %932 }
 0x17d   :  { %1023 = vst.msk [vmem:[#allocation2 + $0x20] sm:$0xff] %vm1018_vm5, %v931_v56  ;;  %1024 = vst.msk [vmem:[#allocation2 + $0x28] sm:$0xff] %vm1018_vm5, %v933_v57  ;;  %v3307_v56 = vld [vmem:[%s7701_s1 + $0x20] sm:$0xff]  ;;  %v3308_v57 = vld [vmem:[%s7701_s1 + $0x28] sm:$0xff] }
 0x17e   :  { %1178 = vrot.lane.b32.xlu0 %v4173_v52, %s4845_s15  ;;  %1180 = vrot.lane.b32.xlu1 %v4174_v53, %s4845_s15 }
 0x180   :  { %v935_v8 = vpop.permute.xlu0 %934  ;;  %v937_v9 = vpop.permute.xlu1 %936 }
 0x181   :  { %1025 = vst.msk [vmem:[#allocation2 + $0x30] sm:$0xff] %vm1018_vm5, %v935_v8  ;;  %1026 = vst.msk [vmem:[#allocation2 + $0x38] sm:$0xff] %vm1018_vm5, %v937_v9  ;;  %v4202_v8 = vld [vmem:[%s7700_s0 + $0x171] sm:$0xff] }
 0x182   :  { %1311 = vrot.lane.b32.xlu0 %v4175_v13, %s4846_s25  ;;  %1313 = vrot.lane.b32.xlu1 %v4176_v17, %s4846_s25  ;;  %v4787_v13 = vpack.c.bf16 %v3308_v57, %v3307_v56  ;;  %v4201_v17 = vld [vmem:[%s7700_s0 + $0x169] sm:$0xff] }
 0x183   :  { %v4230_v56 = vld [vmem:[%s7700_s0 + $0x142] sm:$0xff] }
 0x184   :  { %v939_v14 = vpop.permute.xlu0 %938  ;;  %v941_v15 = vpop.permute.xlu1 %940  ;;  %4788 = vmatprep.subr.bf16.mxu0 %v4787_v13  ;;  %4797 = vmatprep.subr.bf16.mxu1 %v4787_v13 }
 0x185   :  { %1027 = vst.msk [vmem:[#allocation2 + $0x40] sm:$0xff] %vm1018_vm5, %v939_v14  ;;  %1028 = vst.msk [vmem:[#allocation2 + $0x48] sm:$0xff] %vm1018_vm5, %v941_v15  ;;  %4790 = vmatpush3.bf16.msra.mxu0 %v4787_v13  ;;  %v3310_v14 = vld [vmem:[%s7701_s1 + $0x38] sm:$0xff]  ;;  %4802 = vmatpush3.bf16.msra.mxu1 %v4787_v13 }
 0x186   :  { %1315 = vrot.lane.b32.xlu0 %v4177_v10, %s4846_s25  ;;  %1317 = vrot.lane.b32.xlu1 %v4178_v11, %s4846_s25  ;;  %v3309_v11 = vld [vmem:[%s7701_s1 + $0x30] sm:$0xff] }
 0x187   :  { %v4791_v15 = vpack.c.bf16 %v3310_v14, %v3309_v11  ;;  %v4233_v11 = vld [vmem:[%s7700_s0 + $0x16a] sm:$0xff]  ;;  %v4234_v14 = vld [vmem:[%s7700_s0 + $0x172] sm:$0xff] }
 0x188   :  { %v943_v29 = vpop.permute.xlu0 %942  ;;  %v945_v30 = vpop.permute.xlu1 %944 }
 0x189   :  { %1029 = vst.msk [vmem:[#allocation2 + $0x50] sm:$0xff] %vm1018_vm5, %v943_v29  ;;  %1030 = vst.msk [vmem:[#allocation2 + $0x58] sm:$0xff] %vm1018_vm5, %v945_v30  ;;  %4792 = vmatprep.subr.bf16.mxu0 %v4791_v15  ;;  %4798 = vmatprep.subr.bf16.mxu1 %v4791_v15  ;;  %v3311_v29 = vld [vmem:[%s7701_s1 + $0x40] sm:$0xff] }
 0x18a   :  { %1319 = vrot.lane.b32.xlu0 %v4179_v18, %s4846_s25  ;;  %1321 = vrot.lane.b32.xlu1 %v4180_v21, %s4846_s25  ;;  %v4205_v30 = vld [vmem:[%s7700_s0 + $0x199] sm:$0xff] }
 0x18b   :  { %4794 = vmatpush3.bf16.msra.mxu0 %v4791_v15  ;;  %4803 = vmatpush3.bf16.msra.mxu1 %v4791_v15  ;;  %v4239_v15 = vld [vmem:[%s7700_s0 + $0x1b0] sm:$0xff] }
 0x18c   :  { %v947_v46 = vpop.permute.xlu0 %946  ;;  %v949_v47 = vpop.permute.xlu1 %948  ;;  %4681 = vmatprep.subr.mxu0 %v3311_v29  ;;  %4799 = vmatprep.subr.mxu1 %v3311_v29  ;;  %1667 = vst.msk [vmem:[#allocation2 + $0x100] sm:$0xff] %vm50_vm0, %v4239_v15  ;;  %v4261_v15 = vld [vmem:[%s7700_s0 + $0x2b8] sm:$0xff] }
 0x18d   :  { %1031 = vst.msk [vmem:[#allocation2 + $0x60] sm:$0xff] %vm1018_vm5, %v947_v46  ;;  %1032 = vst.msk [vmem:[#allocation2 + $0x68] sm:$0xff] %vm1018_vm5, %v949_v47 }
 0x18e   :  { %1323 = vrot.lane.b32.xlu0 %v4181_v42, %s4846_s25  ;;  %1325 = vrot.lane.b32.xlu1 %v4182_v43, %s4846_s25  ;;  %v4206_v42 = vld [vmem:[%s7700_s0 + $0x1a1] sm:$0xff]  ;;  %1689 = vst.msk [vmem:[#allocation2 + $0x1b0] sm:$0xff] %vm50_vm0, %v4261_v15  ;;  %v4303_v15 = vld [vmem:[%s7700_s0 + $0x1b2] sm:$0xff] }
 0x18f   :  { %4682 = vmatpush3.msra.mxu0 %v3311_v29  ;;  %4804 = vmatpush3.msra.mxu1 %v3311_v29  ;;  %v4240_v29 = vld [vmem:[%s7700_s0 + $0x1b8] sm:$0xff] }
 0x190   :  { %v951_v54 = vpop.permute.xlu0 %950  ;;  %v953_v55 = vpop.permute.xlu1 %952  ;;  %1668 = vst.msk [vmem:[#allocation2 + $0x108] sm:$0xff] %vm50_vm0, %v4240_v29  ;;  %v4262_v29 = vld [vmem:[%s7700_s0 + $0x2c0] sm:$0xff] }
 0x191   :  { %1033 = vst.msk [vmem:[#allocation2 + $0x70] sm:$0xff] %vm1018_vm5, %v951_v54  ;;  %1034 = vst.msk [vmem:[#allocation2 + $0x78] sm:$0xff] %vm1018_vm5, %v953_v55  ;;  %v4210_v54 = vld [vmem:[%s7700_s0 + $0x52] sm:$0xff] }
 0x192   :  { %1327 = vrot.lane.b32.xlu0 %v4183_v50, %s4846_s25  ;;  %1329 = vrot.lane.b32.xlu1 %v4184_v51, %s4846_s25  ;;  %v4209_v51 = vld [vmem:[%s7700_s0 + $0x4a] sm:$0xff]  ;;  %1690 = vst.msk [vmem:[#allocation2 + $0x1b8] sm:$0xff] %vm50_vm0, %v4262_v29 }
 0x194   :  { %v955_v59 = vpop.permute.xlu0 %954  ;;  %v957_v2 = vpop.permute.xlu1 %956 }
 0x195   :  { %1035 = vst.msk [vmem:[#allocation2 + $0x80] sm:$0xff] %vm1018_vm5, %v955_v59  ;;  %1036 = vst.msk [vmem:[#allocation2 + $0x88] sm:$0xff] %vm1018_vm5, %v957_v2  ;;  %v4212_v59 = vld [vmem:[%s7700_s0 + $0x6a] sm:$0xff] }
 0x196   :  { %1331 = vrot.lane.b32.xlu0 %v4185_v12, %s4846_s25  ;;  %1333 = vrot.lane.b32.xlu1 %v4186_v58, %s4846_s25  ;;  %v4211_v58 = vld [vmem:[%s7700_s0 + $0x62] sm:$0xff] }
 0x198   :  { %v959_v16 = vpop.permute.xlu0 %958  ;;  %v961_v62 = vpop.permute.xlu1 %960 }
 0x199   :  { %1037 = vst.msk [vmem:[#allocation2 + $0x90] sm:$0xff] %vm1018_vm5, %v959_v16  ;;  %1038 = vst.msk [vmem:[#allocation2 + $0x98] sm:$0xff] %vm1018_vm5, %v961_v62  ;;  %v4214_v16 = vld [vmem:[%s7700_s0 + $0x82] sm:$0xff] }
 0x19a   :  { %1335 = vrot.lane.b32.xlu0 %v4187_v1, %s4846_s25  ;;  %1337 = vrot.lane.b32.xlu1 %v4188_v3, %s4846_s25  ;;  %v4213_v3 = vld [vmem:[%s7700_s0 + $0x7a] sm:$0xff] }
 0x19c   :  { %v963_v6 = vpop.permute.xlu0 %962  ;;  %v965_v7 = vpop.permute.xlu1 %964 }
 0x19d   :  { %1039 = vst.msk [vmem:[#allocation2 + $0xa0] sm:$0xff] %vm1018_vm5, %v963_v6  ;;  %1040 = vst.msk [vmem:[#allocation2 + $0xa8] sm:$0xff] %vm1018_vm5, %v965_v7  ;;  %v4216_v6 = vld [vmem:[%s7700_s0 + $0x9a] sm:$0xff] }
 0x19e   :  { %1339 = vrot.lane.b32.xlu0 %v4189_v4, %s4846_s25  ;;  %1341 = vrot.lane.b32.xlu1 %v4190_v5, %s4846_s25  ;;  %v4215_v5 = vld [vmem:[%s7700_s0 + $0x92] sm:$0xff] }
 0x1a0   :  { %v967_v22 = vpop.permute.xlu0 %966  ;;  %v969_v23 = vpop.permute.xlu1 %968 }
 0x1a1   :  { %1041 = vst.msk [vmem:[#allocation2 + $0xb0] sm:$0xff] %vm1018_vm5, %v967_v22  ;;  %1042 = vst.msk [vmem:[#allocation2 + $0xb8] sm:$0xff] %vm1018_vm5, %v969_v23  ;;  %v4218_v22 = vld [vmem:[%s7700_s0 + $0xb2] sm:$0xff] }
 0x1a2   :  { %1343 = vrot.lane.b32.xlu0 %v4191_v19, %s4846_s25  ;;  %1345 = vrot.lane.b32.xlu1 %v4192_v20, %s4846_s25  ;;  %v4217_v20 = vld [vmem:[%s7700_s0 + $0xaa] sm:$0xff] }
 0x1a4   :  { %v971_v26 = vpop.permute.xlu0 %970  ;;  %v973_v27 = vpop.permute.xlu1 %972 }
 0x1a5   :  { %1043 = vst.msk [vmem:[#allocation2 + $0xc0] sm:$0xff] %vm1018_vm5, %v971_v26  ;;  %1044 = vst.msk [vmem:[#allocation2 + $0xc8] sm:$0xff] %vm1018_vm5, %v973_v27  ;;  %v4220_v26 = vld [vmem:[%s7700_s0 + $0xca] sm:$0xff] }
 0x1a6   :  { %1347 = vrot.lane.b32.xlu0 %v4193_v24, %s4846_s25  ;;  %1349 = vrot.lane.b32.xlu1 %v4194_v25, %s4846_s25  ;;  %v4219_v25 = vld [vmem:[%s7700_s0 + $0xc2] sm:$0xff] }
 0x1a8   :  { %v975_v32 = vpop.permute.xlu0 %974  ;;  %v977_v33 = vpop.permute.xlu1 %976 }
 0x1a9   :  { %1045 = vst.msk [vmem:[#allocation2 + $0xd0] sm:$0xff] %vm1018_vm5, %v975_v32  ;;  %1046 = vst.msk [vmem:[#allocation2 + $0xd8] sm:$0xff] %vm1018_vm5, %v977_v33  ;;  %v4222_v32 = vld [vmem:[%s7700_s0 + $0xe2] sm:$0xff] }
 0x1aa   :  { %1351 = vrot.lane.b32.xlu0 %v4195_v28, %s4846_s25  ;;  %1353 = vrot.lane.b32.xlu1 %v4196_v31, %s4846_s25  ;;  %v4221_v31 = vld [vmem:[%s7700_s0 + $0xda] sm:$0xff] }
 0x1ac   :  { %v979_v39 = vpop.permute.xlu0 %978  ;;  %v981_v40 = vpop.permute.xlu1 %980 }
 0x1ad   :  { %1047 = vst.msk [vmem:[#allocation2 + $0xe0] sm:$0xff] %vm1018_vm5, %v979_v39  ;;  %1048 = vst.msk [vmem:[#allocation2 + $0xe8] sm:$0xff] %vm1018_vm5, %v981_v40  ;;  %v4225_v39 = vld [vmem:[%s7700_s0 + $0x10a] sm:$0xff]  ;;  %v4226_v40 = vld [vmem:[%s7700_s0 + $0x112] sm:$0xff] }
 0x1ae   :  { %1355 = vrot.lane.b32.xlu0 %v4197_v37, %s4846_s25  ;;  %1357 = vrot.lane.b32.xlu1 %v4198_v38, %s4846_s25 }
 0x1b0   :  { %v983_v52 = vpop.permute.xlu0 %982  ;;  %v985_v53 = vpop.permute.xlu1 %984 }
 0x1b1   :  { %1049 = vst.msk [vmem:[#allocation2 + $0xf0] sm:$0xff] %vm1018_vm5, %v983_v52  ;;  %1050 = vst.msk [vmem:[#allocation2 + $0xf8] sm:$0xff] %vm1018_vm5, %v985_v53  ;;  %v4229_v53 = vld [vmem:[%s7700_s0 + $0x13a] sm:$0xff] }
 0x1b2   :  { %1359 = vrot.lane.b32.xlu0 %v4199_v48, %s4846_s25  ;;  %1361 = vrot.lane.b32.xlu1 %v4200_v49, %s4846_s25  ;;  %v4228_v48 = vld [vmem:[%s7700_s0 + $0x12a] sm:$0xff] }
 0x1b4   :  { %v1119_v9 = vpop.permute.xlu0 %1118  ;;  %v1121_v10 = vpop.permute.xlu1 %1120 }
 0x1b5   :  { %1215 = vst.msk [vmem:[#allocation2] sm:$0xff] %vm1214_vm6, %v1119_v9  ;;  %1216 = vst.msk [vmem:[#allocation2 + $0x8] sm:$0xff] %vm1214_vm6, %v1121_v10 }
 0x1b6   :  { %1363 = vrot.lane.b32.xlu0 %v4201_v17, %s4846_s25  ;;  %1365 = vrot.lane.b32.xlu1 %v4202_v8, %s4846_s25  ;;  %v4231_v17 = vld [vmem:[%s7700_s0 + $0x152] sm:$0xff]  ;;  %v4232_v8 = vld [vmem:[%s7700_s0 + $0x15a] sm:$0xff] }
 0x1b8   :  { %v1123_v18 = vpop.permute.xlu0 %1122  ;;  %v1125_v21 = vpop.permute.xlu1 %1124 }
 0x1b9   :  { %1217 = vst.msk [vmem:[#allocation2 + $0x10] sm:$0xff] %vm1214_vm6, %v1123_v18  ;;  %1218 = vst.msk [vmem:[#allocation2 + $0x18] sm:$0xff] %vm1214_vm6, %v1125_v21 }
 0x1ba   :  { %1367 = vrot.lane.b32.xlu0 %v5729_v61, %s4846_s25  ;;  %1369 = vrot.lane.b32.xlu1 %v5734_v60, %s4846_s25  ;;  %v4207_v61 = vld [vmem:[%s7700_s0 + $0x32] sm:$0xff]  ;;  %v4208_v60 = vld [vmem:[%s7700_s0 + $0x3a] sm:$0xff] }
 0x1bc   :  { %v1127_v43 = vpop.permute.xlu0 %1126  ;;  %v1129_v46 = vpop.permute.xlu1 %1128 }
 0x1bd   :  { %1219 = vst.msk [vmem:[#allocation2 + $0x20] sm:$0xff] %vm1214_vm6, %v1127_v43  ;;  %1220 = vst.msk [vmem:[#allocation2 + $0x28] sm:$0xff] %vm1214_vm6, %v1129_v46  ;;  %v6289_v46 = vld [vmem:[%s7700_s0 + $0x1d0] sm:$0xff] }
 0x1be   :  { %1371 = vrot.lane.b32.xlu0 %v4205_v30, %s4846_s25  ;;  %1373 = vrot.lane.b32.xlu1 %v4206_v42, %s4846_s25  ;;  %v6282_v30 = vld [vmem:[%s7700_s0 + $0x1c8] sm:$0xff]  ;;  %1670 = vst.msk [vmem:[#allocation2 + $0x118] sm:$0xff] %vm50_vm0, %v6289_v46 }
 0x1bf   :  { %1669 = vst.msk [vmem:[#allocation2 + $0x110] sm:$0xff] %vm50_vm0, %v6282_v30 }
 0x1c0   :  { %v1131_v47 = vpop.permute.xlu0 %1130  ;;  %v1133_v50 = vpop.permute.xlu1 %1132 }
 0x1c1   :  { %1221 = vst.msk [vmem:[#allocation2 + $0x30] sm:$0xff] %vm1214_vm6, %v1131_v47  ;;  %1222 = vst.msk [vmem:[#allocation2 + $0x38] sm:$0xff] %vm1214_vm6, %v1133_v50  ;;  %v6308_v47 = vld [vmem:[%s7700_s0 + $0x1e0] sm:$0xff] }
 0x1c2   :  { %1504 = vrot.lane.b32.xlu0 %v4207_v61, %s4847_s22  ;;  %1506 = vrot.lane.b32.xlu1 %v4208_v60, %s4847_s22  ;;  %v4237_v61 = vld [vmem:[%s7700_s0 + $0x19a] sm:$0xff]  ;;  %v4238_v60 = vld [vmem:[%s7700_s0 + $0x1a2] sm:$0xff]  ;;  %1671 = vst.msk [vmem:[#allocation2 + $0x120] sm:$0xff] %vm50_vm0, %v6308_v47 }
 0x1c4   :  { %v1135_v55 = vpop.permute.xlu0 %1134  ;;  %v1137_v12 = vpop.permute.xlu1 %1136 }
 0x1c5   :  { %1223 = vst.msk [vmem:[#allocation2 + $0x40] sm:$0xff] %vm1214_vm6, %v1135_v55  ;;  %1224 = vst.msk [vmem:[#allocation2 + $0x48] sm:$0xff] %vm1214_vm6, %v1137_v12  ;;  %v6332_v55 = vld [vmem:[%s7700_s0 + $0x1f8] sm:$0xff] }
 0x1c6   :  { %1508 = vrot.lane.b32.xlu0 %v4209_v51, %s4847_s22  ;;  %1510 = vrot.lane.b32.xlu1 %v4210_v54, %s4847_s22  ;;  %v4272_v54 = vld [vmem:[%s7700_s0 + $0x1b9] sm:$0xff]  ;;  %1673 = vst.msk [vmem:[#allocation2 + $0x130] sm:$0xff] %vm50_vm0, %v6332_v55 }
 0x1c8   :  { %v1139_v2 = vpop.permute.xlu0 %1138  ;;  %v1141_v1 = vpop.permute.xlu1 %1140 }
 0x1c9   :  { %1225 = vst.msk [vmem:[#allocation2 + $0x50] sm:$0xff] %vm1214_vm6, %v1139_v2  ;;  %1226 = vst.msk [vmem:[#allocation2 + $0x58] sm:$0xff] %vm1214_vm6, %v1141_v1  ;;  %v6350_v2 = vld [vmem:[%s7700_s0 + $0x1c9] sm:$0xff]  ;;  %v6355_v1 = vld [vmem:[%s7700_s0 + $0x1d1] sm:$0xff] }
 0x1ca   :  { %1512 = vrot.lane.b32.xlu0 %v4211_v58, %s4847_s22  ;;  %1514 = vrot.lane.b32.xlu1 %v4212_v59, %s4847_s22  ;;  %v6339_v59 = vld [vmem:[%s7700_s0 + $0x200] sm:$0xff] }
 0x1cb   :  { %1674 = vst.msk [vmem:[#allocation2 + $0x138] sm:$0xff] %vm50_vm0, %v6339_v59 }
 0x1cc   :  { %v1143_v62 = vpop.permute.xlu0 %1142  ;;  %v1145_v4 = vpop.permute.xlu1 %1144 }
 0x1cd   :  { %1227 = vst.msk [vmem:[#allocation2 + $0x60] sm:$0xff] %vm1214_vm6, %v1143_v62  ;;  %1228 = vst.msk [vmem:[#allocation2 + $0x68] sm:$0xff] %vm1214_vm6, %v1145_v4  ;;  %v6367_v4 = vld [vmem:[%s7700_s0 + $0x218] sm:$0xff] }
 0x1ce   :  { %1516 = vrot.lane.b32.xlu0 %v4213_v3, %s4847_s22  ;;  %1518 = vrot.lane.b32.xlu1 %v4214_v16, %s4847_s22  ;;  %v6360_v3 = vld [vmem:[%s7700_s0 + $0x210] sm:$0xff]  ;;  %1676 = vst.msk [vmem:[#allocation2 + $0x148] sm:$0xff] %vm50_vm0, %v6367_v4 }
 0x1cf   :  { %1675 = vst.msk [vmem:[#allocation2 + $0x140] sm:$0xff] %vm50_vm0, %v6360_v3 }
 0x1d0   :  { %v1147_v7 = vpop.permute.xlu0 %1146  ;;  %v1149_v19 = vpop.permute.xlu1 %1148 }
 0x1d1   :  { %1229 = vst.msk [vmem:[#allocation2 + $0x70] sm:$0xff] %vm1214_vm6, %v1147_v7  ;;  %1230 = vst.msk [vmem:[#allocation2 + $0x78] sm:$0xff] %vm1214_vm6, %v1149_v19  ;;  %v6390_v7 = vld [vmem:[%s7700_s0 + $0x228] sm:$0xff] }
 0x1d2   :  { %1520 = vrot.lane.b32.xlu0 %v4215_v5, %s4847_s22  ;;  %1522 = vrot.lane.b32.xlu1 %v4216_v6, %s4847_s22  ;;  %v6380_v5 = vld [vmem:[%s7700_s0 + $0x1e1] sm:$0xff]  ;;  %v6385_v6 = vld [vmem:[%s7700_s0 + $0x1e9] sm:$0xff]  ;;  %1677 = vst.msk [vmem:[#allocation2 + $0x150] sm:$0xff] %vm50_vm0, %v6390_v7 }
 0x1d4   :  { %v1151_v23 = vpop.permute.xlu0 %1150  ;;  %v1153_v24 = vpop.permute.xlu1 %1152 }
 0x1d5   :  { %1231 = vst.msk [vmem:[#allocation2 + $0x80] sm:$0xff] %vm1214_vm6, %v1151_v23  ;;  %1232 = vst.msk [vmem:[#allocation2 + $0x88] sm:$0xff] %vm1214_vm6, %v1153_v24  ;;  %v4277_v23 = vld [vmem:[%s7700_s0 + $0x1f9] sm:$0xff]  ;;  %v4278_v24 = vld [vmem:[%s7700_s0 + $0x201] sm:$0xff] }
 0x1d6   :  { %1524 = vrot.lane.b32.xlu0 %v4217_v20, %s4847_s22  ;;  %1526 = vrot.lane.b32.xlu1 %v4218_v22, %s4847_s22  ;;  %v6397_v22 = vld [vmem:[%s7700_s0 + $0x230] sm:$0xff] }
 0x1d7   :  { %1678 = vst.msk [vmem:[#allocation2 + $0x158] sm:$0xff] %vm50_vm0, %v6397_v22 }
 0x1d8   :  { %v1155_v27 = vpop.permute.xlu0 %1154  ;;  %v1157_v28 = vpop.permute.xlu1 %1156 }
 0x1d9   :  { %1233 = vst.msk [vmem:[#allocation2 + $0x90] sm:$0xff] %vm1214_vm6, %v1155_v27  ;;  %1234 = vst.msk [vmem:[#allocation2 + $0x98] sm:$0xff] %vm1214_vm6, %v1157_v28  ;;  %v6423_v28 = vld [vmem:[%s7700_s0 + $0x248] sm:$0xff] }
 0x1da   :  { %1528 = vrot.lane.b32.xlu0 %v4219_v25, %s4847_s22  ;;  %1530 = vrot.lane.b32.xlu1 %v4220_v26, %s4847_s22  ;;  %v6416_v25 = vld [vmem:[%s7700_s0 + $0x240] sm:$0xff]  ;;  %1680 = vst.msk [vmem:[#allocation2 + $0x168] sm:$0xff] %vm50_vm0, %v6423_v28 }
 0x1db   :  { %1679 = vst.msk [vmem:[#allocation2 + $0x160] sm:$0xff] %vm50_vm0, %v6416_v25 }
 0x1dc   :  { %v1159_v33 = vpop.permute.xlu0 %1158  ;;  %v1161_v34 = vpop.permute.xlu1 %1160 }
 0x1dd   :  { %1235 = vst.msk [vmem:[#allocation2 + $0xa0] sm:$0xff] %vm1214_vm6, %v1159_v33  ;;  %1236 = vst.msk [vmem:[#allocation2 + $0xa8] sm:$0xff] %vm1214_vm6, %v1161_v34  ;;  %v6440_v33 = vld [vmem:[%s7700_s0 + $0x258] sm:$0xff] }
 0x1de   :  { %1532 = vrot.lane.b32.xlu0 %v4221_v31, %s4847_s22  ;;  %1534 = vrot.lane.b32.xlu1 %v4222_v32, %s4847_s22  ;;  %v4279_v31 = vld [vmem:[%s7700_s0 + $0x211] sm:$0xff]  ;;  %v4280_v32 = vld [vmem:[%s7700_s0 + $0x219] sm:$0xff]  ;;  %1681 = vst.msk [vmem:[#allocation2 + $0x170] sm:$0xff] %vm50_vm0, %v6440_v33 }
 0x1e0   :  { %v1163_v37 = vpop.permute.xlu0 %1162  ;;  %v1165_v38 = vpop.permute.xlu1 %1164 }
 0x1e1   :  { %1237 = vst.msk [vmem:[#allocation2 + $0xb0] sm:$0xff] %vm1214_vm6, %v1163_v37  ;;  %1238 = vst.msk [vmem:[#allocation2 + $0xb8] sm:$0xff] %vm1214_vm6, %v1165_v38  ;;  %v4281_v37 = vld [vmem:[%s7700_s0 + $0x229] sm:$0xff]  ;;  %v4282_v38 = vld [vmem:[%s7700_s0 + $0x231] sm:$0xff] }
 0x1e2   :  { %1536 = vrot.lane.b32.xlu0 %v4223_v35, %s4847_s22  ;;  %1538 = vrot.lane.b32.xlu1 %v4224_v36, %s4847_s22  ;;  %v6447_v36 = vld [vmem:[%s7700_s0 + $0x260] sm:$0xff] }
 0x1e3   :  { %1682 = vst.msk [vmem:[#allocation2 + $0x178] sm:$0xff] %vm50_vm0, %v6447_v36 }
 0x1e4   :  { %v1167_v41 = vpop.permute.xlu0 %1166  ;;  %v1169_v44 = vpop.permute.xlu1 %1168 }
 0x1e5   :  { %1239 = vst.msk [vmem:[#allocation2 + $0xc0] sm:$0xff] %vm1214_vm6, %v1167_v41  ;;  %1240 = vst.msk [vmem:[#allocation2 + $0xc8] sm:$0xff] %vm1214_vm6, %v1169_v44  ;;  %v6471_v44 = vld [vmem:[%s7700_s0 + $0x278] sm:$0xff] }
 0x1e6   :  { %1540 = vrot.lane.b32.xlu0 %v4225_v39, %s4847_s22  ;;  %1542 = vrot.lane.b32.xlu1 %v4226_v40, %s4847_s22  ;;  %v6464_v39 = vld [vmem:[%s7700_s0 + $0x270] sm:$0xff]  ;;  %1684 = vst.msk [vmem:[#allocation2 + $0x188] sm:$0xff] %vm50_vm0, %v6471_v44 }
 0x1e7   :  { %1683 = vst.msk [vmem:[#allocation2 + $0x180] sm:$0xff] %vm50_vm0, %v6464_v39 }
 0x1e8   :  { %v1171_v49 = vpop.permute.xlu0 %1170  ;;  %v1173_v52 = vpop.permute.xlu1 %1172 }
 0x1e9   :  { %1241 = vst.msk [vmem:[#allocation2 + $0xd0] sm:$0xff] %vm1214_vm6, %v1171_v49  ;;  %1242 = vst.msk [vmem:[#allocation2 + $0xd8] sm:$0xff] %vm1214_vm6, %v1173_v52  ;;  %v6488_v49 = vld [vmem:[%s7700_s0 + $0x288] sm:$0xff] }
 0x1ea   :  { %1544 = vrot.lane.b32.xlu0 %v4227_v45, %s4847_s22  ;;  %1546 = vrot.lane.b32.xlu1 %v4228_v48, %s4847_s22  ;;  %v4283_v45 = vld [vmem:[%s7700_s0 + $0x241] sm:$0xff]  ;;  %v4284_v48 = vld [vmem:[%s7700_s0 + $0x249] sm:$0xff]  ;;  %1685 = vst.msk [vmem:[#allocation2 + $0x190] sm:$0xff] %vm50_vm0, %v6488_v49 }
 0x1ec   :  { %v1175_v57 = vpop.permute.xlu0 %1174  ;;  %v1177_v13 = vpop.permute.xlu1 %1176 }
 0x1ed   :  { %1243 = vst.msk [vmem:[#allocation2 + $0xe0] sm:$0xff] %vm1214_vm6, %v1175_v57  ;;  %1244 = vst.msk [vmem:[#allocation2 + $0xe8] sm:$0xff] %vm1214_vm6, %v1177_v13  ;;  %v4285_v57 = vld [vmem:[%s7700_s0 + $0x259] sm:$0xff]  ;;  %v4286_v13 = vld [vmem:[%s7700_s0 + $0x261] sm:$0xff] }
 0x1ee   :  { %1548 = vrot.lane.b32.xlu0 %v4229_v53, %s4847_s22  ;;  %1550 = vrot.lane.b32.xlu1 %v4230_v56, %s4847_s22  ;;  %v6495_v56 = vld [vmem:[%s7700_s0 + $0x290] sm:$0xff] }
 0x1ef   :  { %1686 = vst.msk [vmem:[#allocation2 + $0x198] sm:$0xff] %vm50_vm0, %v6495_v56 }
 0x1f0   :  { %v1179_v9 = vpop.permute.xlu0 %1178  ;;  %v1181_v10 = vpop.permute.xlu1 %1180 }
 0x1f1   :  { %1245 = vst.msk [vmem:[#allocation2 + $0xf0] sm:$0xff] %vm1214_vm6, %v1179_v9  ;;  %1246 = vst.msk [vmem:[#allocation2 + $0xf8] sm:$0xff] %vm1214_vm6, %v1181_v10  ;;  %v4260_v10 = vld [vmem:[%s7700_s0 + $0x2a8] sm:$0xff] }
 0x1f2   :  { %1552 = vrot.lane.b32.xlu0 %v4231_v17, %s4847_s22  ;;  %1554 = vrot.lane.b32.xlu1 %v4232_v8, %s4847_s22  ;;  %v4259_v17 = vld [vmem:[%s7700_s0 + $0x2a0] sm:$0xff]  ;;  %1688 = vst.msk [vmem:[#allocation2 + $0x1a8] sm:$0xff] %vm50_vm0, %v4260_v10 }
 0x1f3   :  { %1687 = vst.msk [vmem:[#allocation2 + $0x1a0] sm:$0xff] %vm50_vm0, %v4259_v17  ;;  %v4301_v17 = vld [vmem:[%s7700_s0 + $0x319] sm:$0xff] }
 0x1f4   :  { %v1312_v18 = vpop.permute.xlu0 %1311  ;;  %v1314_v21 = vpop.permute.xlu1 %1313 }
 0x1f5   :  { %1408 = vst.msk [vmem:[#allocation2] sm:$0xff] %vm1407_vm7, %v1312_v18  ;;  %1409 = vst.msk [vmem:[#allocation2 + $0x8] sm:$0xff] %vm1407_vm7, %v1314_v21 }
 0x1f6   :  { %1556 = vrot.lane.b32.xlu0 %v4233_v11, %s4847_s22  ;;  %1558 = vrot.lane.b32.xlu1 %v4234_v14, %s4847_s22  ;;  %v4287_v11 = vld [vmem:[%s7700_s0 + $0x271] sm:$0xff]  ;;  %v4288_v14 = vld [vmem:[%s7700_s0 + $0x279] sm:$0xff] }
 0x1f8   :  { %v1316_v42 = vpop.permute.xlu0 %1315  ;;  %v1318_v43 = vpop.permute.xlu1 %1317 }
 0x1f9   :  { %1410 = vst.msk [vmem:[#allocation2 + $0x10] sm:$0xff] %vm1407_vm7, %v1316_v42  ;;  %1411 = vst.msk [vmem:[#allocation2 + $0x18] sm:$0xff] %vm1407_vm7, %v1318_v43  ;;  %v4289_v42 = vld [vmem:[%s7700_s0 + $0x289] sm:$0xff]  ;;  %v4290_v43 = vld [vmem:[%s7700_s0 + $0x291] sm:$0xff] }
 0x1fa   :  { %1560 = vrot.lane.b32.xlu0 %v5835_v63, %s4847_s22  ;;  %1562 = vrot.lane.b32.xlu1 %v5840_v0, %s4847_s22  ;;  %v6315_v63 = vld [vmem:[%s7700_s0 + $0x1e8] sm:$0xff]  ;;  %v4271_v0 = vld [vmem:[%s7700_s0 + $0x1b1] sm:$0xff] }
 0x1fb   :  { %1672 = vst.msk [vmem:[#allocation2 + $0x128] sm:$0xff] %vm50_vm0, %v6315_v63 }
 0x1fc   :  { %v1320_v50 = vpop.permute.xlu0 %1319  ;;  %v1322_v51 = vpop.permute.xlu1 %1321 }
 0x1fd   :  { %1412 = vst.msk [vmem:[#allocation2 + $0x20] sm:$0xff] %vm1407_vm7, %v1320_v50  ;;  %1413 = vst.msk [vmem:[#allocation2 + $0x28] sm:$0xff] %vm1407_vm7, %v1322_v51  ;;  %v4264_v51 = vld [vmem:[%s7700_s0 + $0x2d8] sm:$0xff] }
 0x1fe   :  { %1564 = vrot.lane.b32.xlu0 %v4237_v61, %s4847_s22  ;;  %1566 = vrot.lane.b32.xlu1 %v4238_v60, %s4847_s22  ;;  %v4263_v61 = vld [vmem:[%s7700_s0 + $0x2d0] sm:$0xff]  ;;  %1692 = vst.msk [vmem:[#allocation2 + $0x1c8] sm:$0xff] %vm50_vm0, %v4264_v51 }
 0x1ff   :  { %1691 = vst.msk [vmem:[#allocation2 + $0x1c0] sm:$0xff] %vm50_vm0, %v4263_v61  ;;  %v6658_v61 = vld [vmem:[%s7700_s0 + $0x1ca] sm:$0xff] }
 0x200   :  { %v1324_v12 = vpop.permute.xlu0 %1323  ;;  %v1326_v58 = vpop.permute.xlu1 %1325 }
 0x201   :  { %1414 = vst.msk [vmem:[#allocation2 + $0x30] sm:$0xff] %vm1407_vm7, %v1324_v12  ;;  %1415 = vst.msk [vmem:[#allocation2 + $0x38] sm:$0xff] %vm1407_vm7, %v1326_v58  ;;  %v4265_v12 = vld [vmem:[%s7700_s0 + $0x2e8] sm:$0xff] }
 0x202   :  { %1763 = vrot.lane.b32.xlu0 %v4271_v0, %s4840_s16  ;;  %1765 = vrot.lane.b32.xlu1 %v4272_v54, %s4840_s16  ;;  %v4291_v0 = vld [vmem:[%s7700_s0 + $0x2a1] sm:$0xff]  ;;  %v4292_v54 = vld [vmem:[%s7700_s0 + $0x2a9] sm:$0xff]  ;;  %1693 = vst.msk [vmem:[#allocation2 + $0x1d0] sm:$0xff] %vm50_vm0, %v4265_v12 }
 0x203   :  { %v6676_v12 = vld [vmem:[%s7700_s0 + $0x1e2] sm:$0xff] }
 0x204   :  { %v1328_v16 = vpop.permute.xlu0 %1327  ;;  %v1330_v62 = vpop.permute.xlu1 %1329 }
 0x205   :  { %1416 = vst.msk [vmem:[#allocation2 + $0x40] sm:$0xff] %vm1407_vm7, %v1328_v16  ;;  %1417 = vst.msk [vmem:[#allocation2 + $0x48] sm:$0xff] %vm1407_vm7, %v1330_v62  ;;  %v4266_v62 = vld [vmem:[%s7700_s0 + $0x2f0] sm:$0xff] }
 0x206   :  { %1767 = vrot.lane.b32.xlu0 %v6350_v2, %s4840_s16  ;;  %1769 = vrot.lane.b32.xlu1 %v6355_v1, %s4840_s16  ;;  %1694 = vst.msk [vmem:[#allocation2 + $0x1d8] sm:$0xff] %vm50_vm0, %v4266_v62 }
 0x208   :  { %v1332_v19 = vpop.permute.xlu0 %1331  ;;  %v1334_v20 = vpop.permute.xlu1 %1333 }
 0x209   :  { %1418 = vst.msk [vmem:[#allocation2 + $0x50] sm:$0xff] %vm1407_vm7, %v1332_v19  ;;  %1419 = vst.msk [vmem:[#allocation2 + $0x58] sm:$0xff] %vm1407_vm7, %v1334_v20  ;;  %v4293_v19 = vld [vmem:[%s7700_s0 + $0x2b9] sm:$0xff]  ;;  %v4294_v20 = vld [vmem:[%s7700_s0 + $0x2c1] sm:$0xff] }
 0x20a   :  { %1771 = vrot.lane.b32.xlu0 %v6380_v5, %s4840_s16  ;;  %1773 = vrot.lane.b32.xlu1 %v6385_v6, %s4840_s16 }
 0x20c   :  { %v1336_v26 = vpop.permute.xlu0 %1335  ;;  %v1338_v27 = vpop.permute.xlu1 %1337 }
 0x20d   :  { %1420 = vst.msk [vmem:[#allocation2 + $0x60] sm:$0xff] %vm1407_vm7, %v1336_v26  ;;  %1421 = vst.msk [vmem:[#allocation2 + $0x68] sm:$0xff] %vm1407_vm7, %v1338_v27  ;;  %v4268_v27 = vld [vmem:[%s7700_s0 + $0x308] sm:$0xff] }
 0x20e   :  { %1775 = vrot.lane.b32.xlu0 %v4277_v23, %s4840_s16  ;;  %1777 = vrot.lane.b32.xlu1 %v4278_v24, %s4840_s16  ;;  %v4267_v23 = vld [vmem:[%s7700_s0 + $0x300] sm:$0xff]  ;;  %1696 = vst.msk [vmem:[#allocation2 + $0x1e8] sm:$0xff] %vm50_vm0, %v4268_v27 }
 0x20f   :  { %1695 = vst.msk [vmem:[#allocation2 + $0x1e0] sm:$0xff] %vm50_vm0, %v4267_v23  ;;  %v6694_v23 = vld [vmem:[%s7700_s0 + $0x1fa] sm:$0xff] }
 0x210   :  { %v1340_v34 = vpop.permute.xlu0 %1339  ;;  %v1342_v35 = vpop.permute.xlu1 %1341 }
 0x211   :  { %1422 = vst.msk [vmem:[#allocation2 + $0x70] sm:$0xff] %vm1407_vm7, %v1340_v34  ;;  %1423 = vst.msk [vmem:[#allocation2 + $0x78] sm:$0xff] %vm1407_vm7, %v1342_v35  ;;  %v4269_v34 = vld [vmem:[%s7700_s0 + $0x318] sm:$0xff] }
 0x212   :  { %1779 = vrot.lane.b32.xlu0 %v4279_v31, %s4840_s16  ;;  %1781 = vrot.lane.b32.xlu1 %v4280_v32, %s4840_s16  ;;  %v4295_v31 = vld [vmem:[%s7700_s0 + $0x2d1] sm:$0xff]  ;;  %v4296_v32 = vld [vmem:[%s7700_s0 + $0x2d9] sm:$0xff]  ;;  %1697 = vst.msk [vmem:[#allocation2 + $0x1f0] sm:$0xff] %vm50_vm0, %v4269_v34 }
 0x213   :  { %v6712_v34 = vld [vmem:[%s7700_s0 + $0x212] sm:$0xff] }
 0x214   :  { %v1344_v40 = vpop.permute.xlu0 %1343  ;;  %v1346_v41 = vpop.permute.xlu1 %1345 }
 0x215   :  { %1424 = vst.msk [vmem:[#allocation2 + $0x80] sm:$0xff] %vm1407_vm7, %v1344_v40  ;;  %1425 = vst.msk [vmem:[#allocation2 + $0x88] sm:$0xff] %vm1407_vm7, %v1346_v41  ;;  %v4297_v40 = vld [vmem:[%s7700_s0 + $0x2e9] sm:$0xff]  ;;  %v4298_v41 = vld [vmem:[%s7700_s0 + $0x2f1] sm:$0xff] }
 0x216   :  { %1783 = vrot.lane.b32.xlu0 %v4281_v37, %s4840_s16  ;;  %1785 = vrot.lane.b32.xlu1 %v4282_v38, %s4840_s16  ;;  %v4270_v38 = vld [vmem:[%s7700_s0 + $0x320] sm:$0xff] }
 0x217   :  { %1698 = vst.msk [vmem:[#allocation2 + $0x1f8] sm:$0xff] %vm50_vm0, %v4270_v38 }
 0x218   :  { %v1348_v52 = vpop.permute.xlu0 %1347  ;;  %v1350_v53 = vpop.permute.xlu1 %1349 }
 0x219   :  { %1426 = vst.msk [vmem:[#allocation2 + $0x90] sm:$0xff] %vm1407_vm7, %v1348_v52  ;;  %1427 = vst.msk [vmem:[#allocation2 + $0x98] sm:$0xff] %vm1407_vm7, %v1350_v53  ;;  %v4299_v52 = vld [vmem:[%s7700_s0 + $0x301] sm:$0xff]  ;;  %v4300_v53 = vld [vmem:[%s7700_s0 + $0x309] sm:$0xff] }
 0x21a   :  { %1787 = vrot.lane.b32.xlu0 %v4283_v45, %s4840_s16  ;;  %1789 = vrot.lane.b32.xlu1 %v4284_v48, %s4840_s16 }
 0x21c   :  { %v1352_v8 = vpop.permute.xlu0 %1351  ;;  %v1354_v9 = vpop.permute.xlu1 %1353 }
 0x21d   :  { %1428 = vst.msk [vmem:[#allocation2 + $0xa0] sm:$0xff] %vm1407_vm7, %v1352_v8  ;;  %1429 = vst.msk [vmem:[#allocation2 + $0xa8] sm:$0xff] %vm1407_vm7, %v1354_v9 }
 0x21e   :  { %1791 = vrot.lane.b32.xlu0 %v4285_v57, %s4840_s16  ;;  %1793 = vrot.lane.b32.xlu1 %v4286_v13, %s4840_s16 }
 0x220   :  { %v1356_v18 = vpop.permute.xlu0 %1355  ;;  %v1358_v21 = vpop.permute.xlu1 %1357 }
 0x221   :  { %1430 = vst.msk [vmem:[#allocation2 + $0xb0] sm:$0xff] %vm1407_vm7, %v1356_v18  ;;  %1431 = vst.msk [vmem:[#allocation2 + $0xb8] sm:$0xff] %vm1407_vm7, %v1358_v21 }
 0x222   :  { %1795 = vrot.lane.b32.xlu0 %v4287_v11, %s4840_s16  ;;  %1797 = vrot.lane.b32.xlu1 %v4288_v14, %s4840_s16  ;;  %v4302_v14 = vld [vmem:[%s7700_s0 + $0x321] sm:$0xff] }
 0x224   :  { %v1360_v60 = vpop.permute.xlu0 %1359  ;;  %v1362_v50 = vpop.permute.xlu1 %1361 }
 0x225   :  { %1432 = vst.msk [vmem:[#allocation2 + $0xc0] sm:$0xff] %vm1407_vm7, %v1360_v60  ;;  %1433 = vst.msk [vmem:[#allocation2 + $0xc8] sm:$0xff] %vm1407_vm7, %v1362_v50 }
 0x226   :  { %1799 = vrot.lane.b32.xlu0 %v4289_v42, %s4840_s16  ;;  %1801 = vrot.lane.b32.xlu1 %v4290_v43, %s4840_s16  ;;  %v4304_v43 = vld [vmem:[%s7700_s0 + $0x1ba] sm:$0xff] }
 0x228   :  { %v1364_v58 = vpop.permute.xlu0 %1363  ;;  %v1366_v16 = vpop.permute.xlu1 %1365 }
 0x229   :  { %1434 = vst.msk [vmem:[#allocation2 + $0xd0] sm:$0xff] %vm1407_vm7, %v1364_v58  ;;  %1435 = vst.msk [vmem:[#allocation2 + $0xd8] sm:$0xff] %vm1407_vm7, %v1366_v16 }
 0x22a   :  { %1803 = vrot.lane.b32.xlu0 %v4291_v0, %s4840_s16  ;;  %1805 = vrot.lane.b32.xlu1 %v4292_v54, %s4840_s16  ;;  %v6663_v54 = vld [vmem:[%s7700_s0 + $0x1d2] sm:$0xff] }
 0x22c   :  { %v1368_v24 = vpop.permute.xlu0 %1367  ;;  %v1370_v26 = vpop.permute.xlu1 %1369 }
 0x22d   :  { %1436 = vst.msk [vmem:[#allocation2 + $0xe0] sm:$0xff] %vm1407_vm7, %v1368_v24  ;;  %1437 = vst.msk [vmem:[#allocation2 + $0xe8] sm:$0xff] %vm1407_vm7, %v1370_v26 }
 0x22e   :  { %1807 = vrot.lane.b32.xlu0 %v4293_v19, %s4840_s16  ;;  %1809 = vrot.lane.b32.xlu1 %v4294_v20, %s4840_s16  ;;  %v6681_v20 = vld [vmem:[%s7700_s0 + $0x1ea] sm:$0xff] }
 0x230   :  { %v1372_v35 = vpop.permute.xlu0 %1371  ;;  %v1374_v37 = vpop.permute.xlu1 %1373 }
 0x231   :  { %1438 = vst.msk [vmem:[#allocation2 + $0xf0] sm:$0xff] %vm1407_vm7, %v1372_v35  ;;  %1439 = vst.msk [vmem:[#allocation2 + $0xf8] sm:$0xff] %vm1407_vm7, %v1374_v37 }
 0x232   :  { %1811 = vrot.lane.b32.xlu0 %v4295_v31, %s4840_s16  ;;  %1813 = vrot.lane.b32.xlu1 %v4296_v32, %s4840_s16  ;;  %v6699_v32 = vld [vmem:[%s7700_s0 + $0x202] sm:$0xff] }
 0x234   :  { %v1505_v45 = vpop.permute.xlu0 %1504  ;;  %v1507_v48 = vpop.permute.xlu1 %1506 }
 0x235   :  { %1601 = vst.msk [vmem:[#allocation2] sm:$0xff] %vm1600_vm8, %v1505_v45  ;;  %1602 = vst.msk [vmem:[#allocation2 + $0x8] sm:$0xff] %vm1600_vm8, %v1507_v48  ;;  %v6730_v45 = vld [vmem:[%s7700_s0 + $0x22a] sm:$0xff] }
 0x236   :  { %1815 = vrot.lane.b32.xlu0 %v4297_v40, %s4840_s16  ;;  %1817 = vrot.lane.b32.xlu1 %v4298_v41, %s4840_s16  ;;  %v6717_v41 = vld [vmem:[%s7700_s0 + $0x21a] sm:$0xff] }
 0x238   :  { %v1509_v57 = vpop.permute.xlu0 %1508  ;;  %v1511_v13 = vpop.permute.xlu1 %1510 }
 0x239   :  { %1603 = vst.msk [vmem:[#allocation2 + $0x10] sm:$0xff] %vm1600_vm8, %v1509_v57  ;;  %1604 = vst.msk [vmem:[#allocation2 + $0x18] sm:$0xff] %vm1600_vm8, %v1511_v13  ;;  %v6735_v13 = vld [vmem:[%s7700_s0 + $0x232] sm:$0xff] }
 0x23a   :  { %1819 = vrot.lane.b32.xlu0 %v4299_v52, %s4840_s16  ;;  %1821 = vrot.lane.b32.xlu1 %v4300_v53, %s4840_s16 }
 0x23c   :  { %v1513_v8 = vpop.permute.xlu0 %1512  ;;  %v1515_v9 = vpop.permute.xlu1 %1514  ;;  %v3239_v10 = vld [vmem:[#allocation2] sm:$0xff]  ;;  %v3240_v11 = vld [vmem:[#allocation2 + $0x8] sm:$0xff] }
 0x23d   :  { %1605 = vst.msk [vmem:[#allocation2 + $0x20] sm:$0xff] %vm1600_vm8, %v1513_v8  ;;  %1606 = vst.msk [vmem:[#allocation2 + $0x28] sm:$0xff] %vm1600_vm8, %v1515_v9  ;;  %4683 = vmatprep.mubr.msk.f32.mxu0 %vm3319_vm9, %v3239_v10 }
 0x23e   :  { %1823 = vrot.lane.b32.xlu0 %v4301_v17, %s4840_s16  ;;  %4684 = vmatmul.mubr.msk.f32.vlgmr.msra.gmra.mrb[0].mxu0 %vm3319_vm9, %v3240_v11  ;;  %v6748_v17 = vld [vmem:[%s7700_s0 + $0x242] sm:$0xff] }
 0x23f   :  { %1825 = vrot.lane.b32.xlu1 %v4302_v14, %s4840_s16  ;;  %v6753_v14 = vld [vmem:[%s7700_s0 + $0x24a] sm:$0xff] }
 0x240   :  { %v1517_v18 = vpop.permute.xlu0 %1516  ;;  %v1519_v21 = vpop.permute.xlu1 %1518  ;;  %v3241_v29 = vld [vmem:[#allocation2 + $0x10] sm:$0xff]  ;;  %v3242_v42 = vld [vmem:[#allocation2 + $0x18] sm:$0xff] }
 0x241   :  { %1607 = vst.msk [vmem:[#allocation2 + $0x30] sm:$0xff] %vm1600_vm8, %v1517_v18  ;;  %1608 = vst.msk [vmem:[#allocation2 + $0x38] sm:$0xff] %vm1600_vm8, %v1519_v21  ;;  %4686 = vmatprep.mubr.msk.f32.mxu0 %vm3319_vm9, %v3241_v29 }
 0x242   :  { %1955 = vrot.lane.b32.xlu0 %v4303_v15, %s4841_s14  ;;  %4687 = vmatmul.mubr.msk.f32.gmra.mrb[2].mxu0 %vm3319_vm9, %v3242_v42  ;;  %v6766_v15 = vld [vmem:[%s7700_s0 + $0x25a] sm:$0xff] }
 0x243   :  { %1957 = vrot.lane.b32.xlu1 %v4304_v43, %s4841_s14  ;;  %v4318_v43 = vld [vmem:[%s7700_s0 + $0x262] sm:$0xff] }
 0x244   :  { %v1521_v60 = vpop.permute.xlu0 %1520  ;;  %v1523_v50 = vpop.permute.xlu1 %1522  ;;  %v3243_v51 = vld [vmem:[#allocation2 + $0x20] sm:$0xff]  ;;  %v3244_v0 = vld [vmem:[#allocation2 + $0x28] sm:$0xff] }
 0x245   :  { %1609 = vst.msk [vmem:[#allocation2 + $0x40] sm:$0xff] %vm1600_vm8, %v1521_v60  ;;  %1610 = vst.msk [vmem:[#allocation2 + $0x48] sm:$0xff] %vm1600_vm8, %v1523_v50  ;;  %4689 = vmatprep.mubr.msk.f32.mxu0 %vm3319_vm9, %v3243_v51  ;;  %v4319_v60 = vld [vmem:[%s7700_s0 + $0x272] sm:$0xff] }
 0x246   :  { %1959 = vrot.lane.b32.xlu0 %v6658_v61, %s4841_s14  ;;  %4690 = vmatmul.mubr.msk.f32.gmra.mrb[4].mxu0 %vm3319_vm9, %v3244_v0 }
 0x247   :  { %1961 = vrot.lane.b32.xlu1 %v6663_v54, %s4841_s14 }
 0x248   :  { %v1525_v58 = vpop.permute.xlu0 %1524  ;;  %v1527_v16 = vpop.permute.xlu1 %1526  ;;  %v3245_v62 = vld [vmem:[#allocation2 + $0x30] sm:$0xff]  ;;  %v3246_v19 = vld [vmem:[#allocation2 + $0x38] sm:$0xff] }
 0x249   :  { %1611 = vst.msk [vmem:[#allocation2 + $0x50] sm:$0xff] %vm1600_vm8, %v1525_v58  ;;  %1612 = vst.msk [vmem:[#allocation2 + $0x58] sm:$0xff] %vm1600_vm8, %v1527_v16  ;;  %4692 = vmatprep.mubr.msk.f32.mxu0 %vm3319_vm9, %v3245_v62  ;;  %v4320_v16 = vld [vmem:[%s7700_s0 + $0x27a] sm:$0xff]  ;;  %v4321_v62 = vld [vmem:[%s7700_s0 + $0x28a] sm:$0xff] }
 0x24a   :  { %1963 = vrot.lane.b32.xlu0 %v6676_v12, %s4841_s14  ;;  %4693 = vmatmul.mubr.msk.f32.gmra.mrb[6].mxu0 %vm3319_vm9, %v3246_v19 }
 0x24b   :  { %1965 = vrot.lane.b32.xlu1 %v6681_v20, %s4841_s14 }
 0x24c   :  { %v1529_v24 = vpop.permute.xlu0 %1528  ;;  %v1531_v26 = vpop.permute.xlu1 %1530  ;;  %v3247_v27 = vld [vmem:[#allocation2 + $0x40] sm:$0xff]  ;;  %v3248_v31 = vld [vmem:[#allocation2 + $0x48] sm:$0xff] }
 0x24d   :  { %1613 = vst.msk [vmem:[#allocation2 + $0x60] sm:$0xff] %vm1600_vm8, %v1529_v24  ;;  %1614 = vst.msk [vmem:[#allocation2 + $0x68] sm:$0xff] %vm1600_vm8, %v1531_v26  ;;  %4695 = vmatprep.mubr.msk.f32.mxu0 %vm3319_vm9, %v3247_v27 }
 0x24e   :  { %1967 = vrot.lane.b32.xlu0 %v6694_v23, %s4841_s14  ;;  %4696 = vmatmul.mubr.msk.f32.gmra.mrb[8].mxu0 %vm3319_vm9, %v3248_v31  ;;  %v4322_v31 = vld [vmem:[%s7700_s0 + $0x292] sm:$0xff] }
 0x24f   :  { %1969 = vrot.lane.b32.xlu1 %v6699_v32, %s4841_s14 }
 0x250   :  { %v1533_v35 = vpop.permute.xlu0 %1532  ;;  %v1535_v37 = vpop.permute.xlu1 %1534  ;;  %v3249_v38 = vld [vmem:[#allocation2 + $0x50] sm:$0xff]  ;;  %v3250_v40 = vld [vmem:[#allocation2 + $0x58] sm:$0xff] }
 0x251   :  { %1615 = vst.msk [vmem:[#allocation2 + $0x70] sm:$0xff] %vm1600_vm8, %v1533_v35  ;;  %1616 = vst.msk [vmem:[#allocation2 + $0x78] sm:$0xff] %vm1600_vm8, %v1535_v37  ;;  %4698 = vmatprep.mubr.msk.f32.mxu0 %vm3319_vm9, %v3249_v38  ;;  %v4323_v35 = vld [vmem:[%s7700_s0 + $0x2a2] sm:$0xff] }
 0x252   :  { %1971 = vrot.lane.b32.xlu0 %v6712_v34, %s4841_s14  ;;  %4699 = vmatmul.mubr.msk.f32.gmra.mrb[10].mxu0 %vm3319_vm9, %v3250_v40 }
 0x253   :  { %1973 = vrot.lane.b32.xlu1 %v6717_v41, %s4841_s14 }
 0x254   :  { %v1537_v48 = vpop.permute.xlu0 %1536  ;;  %v1539_v52 = vpop.permute.xlu1 %1538  ;;  %v3251_v53 = vld [vmem:[#allocation2 + $0x60] sm:$0xff]  ;;  %v3252_v57 = vld [vmem:[#allocation2 + $0x68] sm:$0xff] }
 0x255   :  { %1617 = vst.msk [vmem:[#allocation2 + $0x80] sm:$0xff] %vm1600_vm8, %v1537_v48  ;;  %1618 = vst.msk [vmem:[#allocation2 + $0x88] sm:$0xff] %vm1600_vm8, %v1539_v52  ;;  %4701 = vmatprep.mubr.msk.f32.mxu0 %vm3319_vm9, %v3251_v53  ;;  %v4324_v52 = vld [vmem:[%s7700_s0 + $0x2aa] sm:$0xff]  ;;  %v4325_v53 = vld [vmem:[%s7700_s0 + $0x2ba] sm:$0xff] }
 0x256   :  { %1975 = vrot.lane.b32.xlu0 %v6730_v45, %s4841_s14  ;;  %4702 = vmatmul.mubr.msk.f32.gmra.mrb[12].mxu0 %vm3319_vm9, %v3252_v57 }
 0x257   :  { %1977 = vrot.lane.b32.xlu1 %v6735_v13, %s4841_s14 }
 0x258   :  { %v1541_v8 = vpop.permute.xlu0 %1540  ;;  %v1543_v9 = vpop.permute.xlu1 %1542  ;;  %v3253_v10 = vld [vmem:[#allocation2 + $0x70] sm:$0xff]  ;;  %v3254_v11 = vld [vmem:[#allocation2 + $0x78] sm:$0xff] }
 0x259   :  { %1619 = vst.msk [vmem:[#allocation2 + $0x90] sm:$0xff] %vm1600_vm8, %v1541_v8  ;;  %1620 = vst.msk [vmem:[#allocation2 + $0x98] sm:$0xff] %vm1600_vm8, %v1543_v9  ;;  %4704 = vmatprep.mubr.msk.f32.mxu0 %vm3319_vm9, %v3253_v10 }
 0x25a   :  { %1979 = vrot.lane.b32.xlu0 %v6748_v17, %s4841_s14  ;;  %4705 = vmatmul.mubr.msk.f32.gmra.mrb[14].mxu0 %vm3319_vm9, %v3254_v11  ;;  %v4326_v11 = vld [vmem:[%s7700_s0 + $0x2c2] sm:$0xff] }
 0x25b   :  { %1981 = vrot.lane.b32.xlu1 %v6753_v14, %s4841_s14 }
 0x25c   :  { %v1545_v18 = vpop.permute.xlu0 %1544  ;;  %v1547_v21 = vpop.permute.xlu1 %1546  ;;  %v3255_v29 = vld [vmem:[#allocation2 + $0x80] sm:$0xff]  ;;  %v3256_v42 = vld [vmem:[#allocation2 + $0x88] sm:$0xff] }
 0x25d   :  { %1621 = vst.msk [vmem:[#allocation2 + $0xa0] sm:$0xff] %vm1600_vm8, %v1545_v18  ;;  %1622 = vst.msk [vmem:[#allocation2 + $0xa8] sm:$0xff] %vm1600_vm8, %v1547_v21  ;;  %4707 = vmatprep.mubr.msk.f32.mxu0 %vm3319_vm9, %v3255_v29  ;;  %v4327_v18 = vld [vmem:[%s7700_s0 + $0x2d2] sm:$0xff] }
 0x25e   :  { %1983 = vrot.lane.b32.xlu0 %v6766_v15, %s4841_s14  ;;  %4708 = vmatmul.mubr.msk.f32.gmra.mrb[16].mxu0 %vm3319_vm9, %v3256_v42 }
 0x25f   :  { %1985 = vrot.lane.b32.xlu1 %v4318_v43, %s4841_s14 }
 0x260   :  { %v1549_v50 = vpop.permute.xlu0 %1548  ;;  %v1551_v51 = vpop.permute.xlu1 %1550  ;;  %v3257_v0 = vld [vmem:[#allocation2 + $0x90] sm:$0xff]  ;;  %v3258_v58 = vld [vmem:[#allocation2 + $0x98] sm:$0xff] }
 0x261   :  { %1623 = vst.msk [vmem:[#allocation2 + $0xb0] sm:$0xff] %vm1600_vm8, %v1549_v50  ;;  %1624 = vst.msk [vmem:[#allocation2 + $0xb8] sm:$0xff] %vm1600_vm8, %v1551_v51  ;;  %4710 = vmatprep.mubr.msk.f32.mxu0 %vm3319_vm9, %v3257_v0  ;;  %v4329_v50 = vld [vmem:[%s7700_s0 + $0x2ea] sm:$0xff] }
 0x262   :  { %1987 = vrot.lane.b32.xlu0 %v4319_v60, %s4841_s14  ;;  %4711 = vmatmul.mubr.msk.f32.gmra.mrb[18].mxu0 %vm3319_vm9, %v3258_v58  ;;  %v4328_v60 = vld [vmem:[%s7700_s0 + $0x2da] sm:$0xff] }
 0x263   :  { %1989 = vrot.lane.b32.xlu1 %v4320_v16, %s4841_s14 }
 0x264   :  { %v1553_v19 = vpop.permute.xlu0 %1552  ;;  %v1555_v24 = vpop.permute.xlu1 %1554  ;;  %v3259_v26 = vld [vmem:[#allocation2 + $0xa0] sm:$0xff]  ;;  %v3260_v27 = vld [vmem:[#allocation2 + $0xa8] sm:$0xff] }
 0x265   :  { %1625 = vst.msk [vmem:[#allocation2 + $0xc0] sm:$0xff] %vm1600_vm8, %v1553_v19  ;;  %1626 = vst.msk [vmem:[#allocation2 + $0xc8] sm:$0xff] %vm1600_vm8, %v1555_v24  ;;  %4713 = vmatprep.mubr.msk.f32.mxu0 %vm3319_vm9, %v3259_v26  ;;  %v4331_v19 = vld [vmem:[%s7700_s0 + $0x302] sm:$0xff] }
 0x266   :  { %1991 = vrot.lane.b32.xlu0 %v4321_v62, %s4841_s14  ;;  %4714 = vmatmul.mubr.msk.f32.gmra.mrb[20].mxu0 %vm3319_vm9, %v3260_v27  ;;  %v4330_v62 = vld [vmem:[%s7700_s0 + $0x2f2] sm:$0xff] }
 0x267   :  { %1993 = vrot.lane.b32.xlu1 %v4322_v31, %s4841_s14 }
 0x268   :  { %v1557_v37 = vpop.permute.xlu0 %1556  ;;  %v1559_v38 = vpop.permute.xlu1 %1558  ;;  %v3261_v40 = vld [vmem:[#allocation2 + $0xb0] sm:$0xff]  ;;  %v3262_v48 = vld [vmem:[#allocation2 + $0xb8] sm:$0xff] }
 0x269   :  { %1627 = vst.msk [vmem:[#allocation2 + $0xd0] sm:$0xff] %vm1600_vm8, %v1557_v37  ;;  %1628 = vst.msk [vmem:[#allocation2 + $0xd8] sm:$0xff] %vm1600_vm8, %v1559_v38  ;;  %4716 = vmatprep.mubr.msk.f32.mxu0 %vm3319_vm9, %v3261_v40  ;;  %v4333_v37 = vld [vmem:[%s7700_s0 + $0x31a] sm:$0xff] }
 0x26a   :  { %1995 = vrot.lane.b32.xlu0 %v4323_v35, %s4841_s14  ;;  %4717 = vmatmul.mubr.msk.f32.gmra.mrb[22].mxu0 %vm3319_vm9, %v3262_v48  ;;  %v4332_v35 = vld [vmem:[%s7700_s0 + $0x30a] sm:$0xff]  ;;  %v4334_v48 = vld [vmem:[%s7700_s0 + $0x322] sm:$0xff] }
 0x26b   :  { %1997 = vrot.lane.b32.xlu1 %v4324_v52, %s4841_s14 }
 0x26c   :  { %v1561_v57 = vpop.permute.xlu0 %1560  ;;  %v1563_v8 = vpop.permute.xlu1 %1562  ;;  %v3263_v9 = vld [vmem:[#allocation2 + $0xc0] sm:$0xff]  ;;  %v3264_v10 = vld [vmem:[#allocation2 + $0xc8] sm:$0xff] }
 0x26d   :  { %1629 = vst.msk [vmem:[#allocation2 + $0xe0] sm:$0xff] %vm1600_vm8, %v1561_v57  ;;  %1630 = vst.msk [vmem:[#allocation2 + $0xe8] sm:$0xff] %vm1600_vm8, %v1563_v8  ;;  %4719 = vmatprep.mubr.msk.f32.mxu0 %vm3319_vm9, %v3263_v9 }
 0x26e   :  { %1999 = vrot.lane.b32.xlu0 %v4325_v53, %s4841_s14  ;;  %4720 = vmatmul.mubr.msk.f32.gmra.mrb[24].mxu0 %vm3319_vm9, %v3264_v10 }
 0x26f   :  { %2001 = vrot.lane.b32.xlu1 %v4326_v11, %s4841_s14 }
 0x270   :  { %v1565_v21 = vpop.permute.xlu0 %1564  ;;  %v1567_v29 = vpop.permute.xlu1 %1566  ;;  %v3265_v42 = vld [vmem:[#allocation2 + $0xd0] sm:$0xff]  ;;  %v3266_v43 = vld [vmem:[#allocation2 + $0xd8] sm:$0xff] }
 0x271   :  { %1631 = vst.msk [vmem:[#allocation2 + $0xf0] sm:$0xff] %vm1600_vm8, %v1565_v21  ;;  %1632 = vst.msk [vmem:[#allocation2 + $0xf8] sm:$0xff] %vm1600_vm8, %v1567_v29  ;;  %4722 = vmatprep.mubr.msk.f32.mxu0 %vm3319_vm9, %v3265_v42 }
 0x272   :  { %2003 = vrot.lane.b32.xlu0 %v4327_v18, %s4841_s14  ;;  %4723 = vmatmul.mubr.msk.f32.gmra.mrb[26].mxu0 %vm3319_vm9, %v3266_v43 }
 0x273   :  { %2005 = vrot.lane.b32.xlu1 %v4328_v60, %s4841_s14 }
 0x274   :  { %v1764_v51 = vpop.permute.xlu0 %1763  ;;  %v1766_v0 = vpop.permute.xlu1 %1765  ;;  %v3267_v58 = vld [vmem:[#allocation2 + $0xe0] sm:$0xff]  ;;  %v3268_v16 = vld [vmem:[#allocation2 + $0xe8] sm:$0xff] }
 0x275   :  { %1859 = vst.msk [vmem:[#allocation2 + $0x100] sm:$0xff] %vm243_vm1, %v1764_v51  ;;  %1860 = vst.msk [vmem:[#allocation2 + $0x108] sm:$0xff] %vm243_vm1, %v1766_v0  ;;  %4725 = vmatprep.mubr.msk.f32.mxu0 %vm3319_vm9, %v3267_v58 }
 0x276   :  { %2007 = vrot.lane.b32.xlu0 %v4329_v50, %s4841_s14  ;;  %4726 = vmatmul.mubr.msk.f32.gmra.mrb[28].mxu0 %vm3319_vm9, %v3268_v16 }
 0x277   :  { %2009 = vrot.lane.b32.xlu1 %v4330_v62, %s4841_s14 }
 0x278   :  { %v1768_v24 = vpop.permute.xlu0 %1767  ;;  %v1770_v26 = vpop.permute.xlu1 %1769  ;;  %v3269_v27 = vld [vmem:[#allocation2 + $0xf0] sm:$0xff]  ;;  %v3270_v31 = vld [vmem:[#allocation2 + $0xf8] sm:$0xff] }
 0x279   :  { %1861 = vst.msk [vmem:[#allocation2 + $0x110] sm:$0xff] %vm243_vm1, %v1768_v24  ;;  %1862 = vst.msk [vmem:[#allocation2 + $0x118] sm:$0xff] %vm243_vm1, %v1770_v26  ;;  %4728 = vmatprep.mubr.msk.f32.mxu0 %vm3319_vm9, %v3269_v27 }
 0x27a   :  { %2011 = vrot.lane.b32.xlu0 %v4331_v19, %s4841_s14  ;;  %4729 = vmatmul.mubr.msk.f32.gmra.mrb[30].mxu0 %vm3319_vm9, %v3270_v31 }
 0x27b   :  { %2013 = vrot.lane.b32.xlu1 %v4332_v35, %s4841_s14 }
 0x27c   :  { %v1772_v38 = vpop.permute.xlu0 %1771  ;;  %v1774_v40 = vpop.permute.xlu1 %1773 }
 0x27d   :  { %1863 = vst.msk [vmem:[#allocation2 + $0x120] sm:$0xff] %vm243_vm1, %v1772_v38  ;;  %1864 = vst.msk [vmem:[#allocation2 + $0x128] sm:$0xff] %vm243_vm1, %v1774_v40 }
 0x27e   :  { %2015 = vrot.lane.b32.xlu0 %v4333_v37, %s4841_s14 }
 0x27f   :  { %2017 = vrot.lane.b32.xlu1 %v4334_v48, %s4841_s14 }
 0x280   :  { %v1776_v52 = vpop.permute.xlu0 %1775  ;;  %v1778_v53 = vpop.permute.xlu1 %1777 }
 0x281   :  { %1865 = vst.msk [vmem:[#allocation2 + $0x130] sm:$0xff] %vm243_vm1, %v1776_v52  ;;  %1866 = vst.msk [vmem:[#allocation2 + $0x138] sm:$0xff] %vm243_vm1, %v1778_v53 }
 0x282   :  { %2149 = vrot.lane.b32.xlu0 %v6282_v30, %s4842_s26 }
 0x283   :  { %2151 = vrot.lane.b32.xlu1 %v6289_v46, %s4842_s26 }
 0x284   :  { %v1780_v57 = vpop.permute.xlu0 %1779  ;;  %v1782_v8 = vpop.permute.xlu1 %1781 }
 0x285   :  { %1867 = vst.msk [vmem:[#allocation2 + $0x140] sm:$0xff] %vm243_vm1, %v1780_v57  ;;  %1868 = vst.msk [vmem:[#allocation2 + $0x148] sm:$0xff] %vm243_vm1, %v1782_v8 }
 0x286   :  { %2153 = vrot.lane.b32.xlu0 %v6308_v47, %s4842_s26 }
 0x287   :  { %2155 = vrot.lane.b32.xlu1 %v6315_v63, %s4842_s26 }
 0x288   :  { %v1784_v9 = vpop.permute.xlu0 %1783  ;;  %v1786_v10 = vpop.permute.xlu1 %1785 }
 0x289   :  { %1869 = vst.msk [vmem:[#allocation2 + $0x150] sm:$0xff] %vm243_vm1, %v1784_v9  ;;  %1870 = vst.msk [vmem:[#allocation2 + $0x158] sm:$0xff] %vm243_vm1, %v1786_v10 }
 0x28a   :  { %2157 = vrot.lane.b32.xlu0 %v6332_v55, %s4842_s26 }
 0x28b   :  { %2159 = vrot.lane.b32.xlu1 %v6339_v59, %s4842_s26 }
 0x28c   :  { %v1788_v30 = vpop.permute.xlu0 %1787  ;;  %v1790_v46 = vpop.permute.xlu1 %1789 }
 0x28d   :  { %1871 = vst.msk [vmem:[#allocation2 + $0x160] sm:$0xff] %vm243_vm1, %v1788_v30  ;;  %1872 = vst.msk [vmem:[#allocation2 + $0x168] sm:$0xff] %vm243_vm1, %v1790_v46 }
 0x28e   :  { %2161 = vrot.lane.b32.xlu0 %v6360_v3, %s4842_s26 }
 0x28f   :  { %2163 = vrot.lane.b32.xlu1 %v6367_v4, %s4842_s26 }
 0x290   :  { %v1792_v11 = vpop.permute.xlu0 %1791  ;;  %v1794_v18 = vpop.permute.xlu1 %1793 }
 0x291   :  { %1873 = vst.msk [vmem:[#allocation2 + $0x170] sm:$0xff] %vm243_vm1, %v1792_v11  ;;  %1874 = vst.msk [vmem:[#allocation2 + $0x178] sm:$0xff] %vm243_vm1, %v1794_v18 }
 0x292   :  { %2165 = vrot.lane.b32.xlu0 %v6390_v7, %s4842_s26 }
 0x293   :  { %2167 = vrot.lane.b32.xlu1 %v6397_v22, %s4842_s26 }
 0x294   :  { %v1796_v21 = vpop.permute.xlu0 %1795  ;;  %v1798_v29 = vpop.permute.xlu1 %1797 }
 0x295   :  { %1875 = vst.msk [vmem:[#allocation2 + $0x180] sm:$0xff] %vm243_vm1, %v1796_v21  ;;  %1876 = vst.msk [vmem:[#allocation2 + $0x188] sm:$0xff] %vm243_vm1, %v1798_v29 }
 0x296   :  { %2169 = vrot.lane.b32.xlu0 %v6416_v25, %s4842_s26 }
 0x297   :  { %2171 = vrot.lane.b32.xlu1 %v6423_v28, %s4842_s26 }
 0x298   :  { %v1800_v42 = vpop.permute.xlu0 %1799  ;;  %v1802_v43 = vpop.permute.xlu1 %1801 }
 0x299   :  { %1877 = vst.msk [vmem:[#allocation2 + $0x190] sm:$0xff] %vm243_vm1, %v1800_v42  ;;  %1878 = vst.msk [vmem:[#allocation2 + $0x198] sm:$0xff] %vm243_vm1, %v1802_v43 }
 0x29a   :  { %2173 = vrot.lane.b32.xlu0 %v6440_v33, %s4842_s26 }
 0x29b   :  { %2175 = vrot.lane.b32.xlu1 %v6447_v36, %s4842_s26 }
 0x29c   :  { %v1804_v60 = vpop.permute.xlu0 %1803  ;;  %v1806_v50 = vpop.permute.xlu1 %1805 }
 0x29d   :  { %1879 = vst.msk [vmem:[#allocation2 + $0x1a0] sm:$0xff] %vm243_vm1, %v1804_v60  ;;  %1880 = vst.msk [vmem:[#allocation2 + $0x1a8] sm:$0xff] %vm243_vm1, %v1806_v50 }
 0x29e   :  { %2177 = vrot.lane.b32.xlu0 %v6464_v39, %s4842_s26 }
 0x29f   :  { %2179 = vrot.lane.b32.xlu1 %v6471_v44, %s4842_s26 }
 0x2a0   :  { %v1808_v51 = vpop.permute.xlu0 %1807  ;;  %v1810_v0 = vpop.permute.xlu1 %1809 }
 0x2a1   :  { %1881 = vst.msk [vmem:[#allocation2 + $0x1b0] sm:$0xff] %vm243_vm1, %v1808_v51  ;;  %1882 = vst.msk [vmem:[#allocation2 + $0x1b8] sm:$0xff] %vm243_vm1, %v1810_v0 }
 0x2a2   :  { %2181 = vrot.lane.b32.xlu0 %v6488_v49, %s4842_s26 }
 0x2a3   :  { %2183 = vrot.lane.b32.xlu1 %v6495_v56, %s4842_s26 }
 0x2a4   :  { %v1812_v58 = vpop.permute.xlu0 %1811  ;;  %v1814_v16 = vpop.permute.xlu1 %1813 }
 0x2a5   :  { %1883 = vst.msk [vmem:[#allocation2 + $0x1c0] sm:$0xff] %vm243_vm1, %v1812_v58  ;;  %1884 = vst.msk [vmem:[#allocation2 + $0x1c8] sm:$0xff] %vm243_vm1, %v1814_v16 }
 0x2a6   :  { %2341 = vrot.lane.b32.xlu0 %v6350_v2, %s4843_s4 }
 0x2a7   :  { %2343 = vrot.lane.b32.xlu1 %v6355_v1, %s4843_s4 }
 0x2a8   :  { %v1816_v62 = vpop.permute.xlu0 %1815  ;;  %v1818_v19 = vpop.permute.xlu1 %1817 }
 0x2a9   :  { %1885 = vst.msk [vmem:[#allocation2 + $0x1d0] sm:$0xff] %vm243_vm1, %v1816_v62  ;;  %1886 = vst.msk [vmem:[#allocation2 + $0x1d8] sm:$0xff] %vm243_vm1, %v1818_v19 }
 0x2aa   :  { %2533 = vrot.lane.b32.xlu0 %v6658_v61, %s4844_s9 }
 0x2ab   :  { %2535 = vrot.lane.b32.xlu1 %v6663_v54, %s4844_s9 }
 0x2ac   :  { %v1820_v24 = vpop.permute.xlu0 %1819  ;;  %v1822_v26 = vpop.permute.xlu1 %1821 }
 0x2ad   :  { %1887 = vst.msk [vmem:[#allocation2 + $0x1e0] sm:$0xff] %vm243_vm1, %v1820_v24  ;;  %1888 = vst.msk [vmem:[#allocation2 + $0x1e8] sm:$0xff] %vm243_vm1, %v1822_v26 }
 0x2ae   :  { %2727 = vrot.lane.b32.xlu0 %v6308_v47, %s4845_s15 }
 0x2af   :  { %2729 = vrot.lane.b32.xlu1 %v6315_v63, %s4845_s15 }
 0x2b0   :  { %v1824_v2 = vpop.permute.xlu0 %1823 }
 0x2b1   :  { %1889 = vst.msk [vmem:[#allocation2 + $0x1f0] sm:$0xff] %vm243_vm1, %v1824_v2  ;;  %v1826_v1 = vpop.permute.xlu1 %1825 }
 0x2b2   :  { %1890 = vst.msk [vmem:[#allocation2 + $0x1f8] sm:$0xff] %vm243_vm1, %v1826_v1  ;;  %2919 = vrot.lane.b32.xlu0 %v6380_v5, %s4846_s25  ;;  %v7099_v1 = vld [vmem:[%s7702_s2] ss:$0 sm:$0xff] }
 0x2b3   :  { %2345 = vrot.lane.b32.xlu1 %v6380_v5, %s4843_s4 }
 0x2b4   :  { %v1956_v61 = vpop.permute.xlu0 %1955 }
 0x2b5   :  { %2051 = vst.msk [vmem:[#allocation2 + $0x100] sm:$0xff] %vm436_vm2, %v1956_v61  ;;  %v1958_v54 = vpop.permute.xlu1 %1957 }
 0x2b6   :  { %2052 = vst.msk [vmem:[#allocation2 + $0x108] sm:$0xff] %vm436_vm2, %v1958_v54  ;;  %2921 = vrot.lane.b32.xlu0 %v6385_v6, %s4846_s25 }
 0x2b7   :  { %3111 = vrot.lane.b32.xlu1 %v6676_v12, %s4847_s22 }
 0x2b8   :  { %v1960_v47 = vpop.permute.xlu0 %1959 }
 0x2b9   :  { %2053 = vst.msk [vmem:[#allocation2 + $0x110] sm:$0xff] %vm436_vm2, %v1960_v47  ;;  %v1962_v63 = vpop.permute.xlu1 %1961 }
 0x2ba   :  { %2054 = vst.msk [vmem:[#allocation2 + $0x118] sm:$0xff] %vm436_vm2, %v1962_v63  ;;  %2347 = vrot.lane.b32.xlu0 %v6385_v6, %s4843_s4  ;;  %v4465_v6 = vld [vmem:[%s7700_s0 + $0x1f9] sm:$0xff] }
 0x2bb   :  { %2537 = vrot.lane.b32.xlu1 %v6676_v12, %s4844_s9 }
 0x2bc   :  { %v1964_v5 = vpop.permute.xlu0 %1963 }
 0x2bd   :  { %2055 = vst.msk [vmem:[#allocation2 + $0x120] sm:$0xff] %vm436_vm2, %v1964_v5  ;;  %v1966_v27 = vpop.permute.xlu1 %1965  ;;  %v4473_v5 = vld [vmem:[%s7700_s0 + $0x259] sm:$0xff] }
 0x2be   :  { %2056 = vst.msk [vmem:[#allocation2 + $0x128] sm:$0xff] %vm436_vm2, %v1966_v27  ;;  %3113 = vrot.lane.b32.xlu0 %v6681_v20, %s4847_s22 }
 0x2bf   :  { %2539 = vrot.lane.b32.xlu1 %v6681_v20, %s4844_s9 }
 0x2c0   :  { %v1968_v31 = vpop.permute.xlu0 %1967 }
 0x2c1   :  { %2057 = vst.msk [vmem:[#allocation2 + $0x130] sm:$0xff] %vm436_vm2, %v1968_v31  ;;  %v1970_v35 = vpop.permute.xlu1 %1969 }
 0x2c2   :  { %2058 = vst.msk [vmem:[#allocation2 + $0x138] sm:$0xff] %vm436_vm2, %v1970_v35  ;;  %2731 = vrot.lane.b32.xlu0 %v6332_v55, %s4845_s15  ;;  %v4466_v55 = vld [vmem:[%s7700_s0 + $0x201] sm:$0xff] }
 0x2c3   :  { %2733 = vrot.lane.b32.xlu1 %v6339_v59, %s4845_s15 }
 0x2c4   :  { %v1972_v12 = vpop.permute.xlu0 %1971 }
 0x2c5   :  { %2059 = vst.msk [vmem:[#allocation2 + $0x140] sm:$0xff] %vm436_vm2, %v1972_v12  ;;  %v1974_v20 = vpop.permute.xlu1 %1973 }
 0x2c6   :  { %2060 = vst.msk [vmem:[#allocation2 + $0x148] sm:$0xff] %vm436_vm2, %v1974_v20  ;;  %2923 = vrot.lane.b32.xlu0 %v4465_v6, %s4846_s25 }
 0x2c7   :  { %2349 = vrot.lane.b32.xlu1 %v4465_v6, %s4843_s4 }
 0x2c8   :  { %v1976_v37 = vpop.permute.xlu0 %1975 }
 0x2c9   :  { %2061 = vst.msk [vmem:[#allocation2 + $0x150] sm:$0xff] %vm436_vm2, %v1976_v37  ;;  %v1978_v59 = vpop.permute.xlu1 %1977 }
 0x2ca   :  { %2062 = vst.msk [vmem:[#allocation2 + $0x158] sm:$0xff] %vm436_vm2, %v1978_v59  ;;  %2925 = vrot.lane.b32.xlu0 %v4466_v55, %s4846_s25 }
 0x2cb   :  { %3115 = vrot.lane.b32.xlu1 %v6694_v23, %s4847_s22 }
 0x2cc   :  { %v1980_v38 = vpop.permute.xlu0 %1979 }
 0x2cd   :  { %2063 = vst.msk [vmem:[#allocation2 + $0x160] sm:$0xff] %vm436_vm2, %v1980_v38  ;;  %v1982_v40 = vpop.permute.xlu1 %1981 }
 0x2ce   :  { %2064 = vst.msk [vmem:[#allocation2 + $0x168] sm:$0xff] %vm436_vm2, %v1982_v40  ;;  %2351 = vrot.lane.b32.xlu0 %v4466_v55, %s4843_s4  ;;  %v4474_v55 = vld [vmem:[%s7700_s0 + $0x261] sm:$0xff] }
 0x2cf   :  { %2541 = vrot.lane.b32.xlu1 %v6694_v23, %s4844_s9  ;;  %v4467_v23 = vld [vmem:[%s7700_s0 + $0x211] sm:$0xff] }
 0x2d0   :  { %v1984_v48 = vpop.permute.xlu0 %1983 }
 0x2d1   :  { %2065 = vst.msk [vmem:[#allocation2 + $0x170] sm:$0xff] %vm436_vm2, %v1984_v48  ;;  %v1986_v52 = vpop.permute.xlu1 %1985 }
 0x2d2   :  { %2066 = vst.msk [vmem:[#allocation2 + $0x178] sm:$0xff] %vm436_vm2, %v1986_v52  ;;  %3117 = vrot.lane.b32.xlu0 %v6699_v32, %s4847_s22 }
 0x2d3   :  { %2543 = vrot.lane.b32.xlu1 %v6699_v32, %s4844_s9 }
 0x2d4   :  { %v1988_v53 = vpop.permute.xlu0 %1987 }
 0x2d5   :  { %2067 = vst.msk [vmem:[#allocation2 + $0x180] sm:$0xff] %vm436_vm2, %v1988_v53  ;;  %v1990_v57 = vpop.permute.xlu1 %1989 }
 0x2d6   :  { %2068 = vst.msk [vmem:[#allocation2 + $0x188] sm:$0xff] %vm436_vm2, %v1990_v57  ;;  %2735 = vrot.lane.b32.xlu0 %v6360_v3, %s4845_s15  ;;  %v4468_v3 = vld [vmem:[%s7700_s0 + $0x219] sm:$0xff] }
 0x2d7   :  { %2737 = vrot.lane.b32.xlu1 %v6367_v4, %s4845_s15 }
 0x2d8   :  { %v1992_v8 = vpop.permute.xlu0 %1991 }
 0x2d9   :  { %2069 = vst.msk [vmem:[#allocation2 + $0x190] sm:$0xff] %vm436_vm2, %v1992_v8  ;;  %v1994_v32 = vpop.permute.xlu1 %1993 }
 0x2da   :  { %2070 = vst.msk [vmem:[#allocation2 + $0x198] sm:$0xff] %vm436_vm2, %v1994_v32  ;;  %2927 = vrot.lane.b32.xlu0 %v4467_v23, %s4846_s25  ;;  %v4411_v32 = vld [vmem:[%s7700_s0 + $0x25a] sm:$0xff] }
 0x2db   :  { %2353 = vrot.lane.b32.xlu1 %v4467_v23, %s4843_s4 }
 0x2dc   :  { %v1996_v9 = vpop.permute.xlu0 %1995 }
 0x2dd   :  { %2071 = vst.msk [vmem:[#allocation2 + $0x1a0] sm:$0xff] %vm436_vm2, %v1996_v9  ;;  %v1998_v4 = vpop.permute.xlu1 %1997 }
 0x2de   :  { %2072 = vst.msk [vmem:[#allocation2 + $0x1a8] sm:$0xff] %vm436_vm2, %v1998_v4  ;;  %2929 = vrot.lane.b32.xlu0 %v4468_v3, %s4846_s25 }
 0x2df   :  { %3119 = vrot.lane.b32.xlu1 %v6712_v34, %s4847_s22 }
 0x2e0   :  { %v2000_v10 = vpop.permute.xlu0 %1999 }
 0x2e1   :  { %2073 = vst.msk [vmem:[#allocation2 + $0x1b0] sm:$0xff] %vm436_vm2, %v2000_v10  ;;  %v2002_v30 = vpop.permute.xlu1 %2001 }
 0x2e2   :  { %2074 = vst.msk [vmem:[#allocation2 + $0x1b8] sm:$0xff] %vm436_vm2, %v2002_v30  ;;  %2355 = vrot.lane.b32.xlu0 %v4468_v3, %s4843_s4 }
 0x2e3   :  { %2545 = vrot.lane.b32.xlu1 %v6712_v34, %s4844_s9  ;;  %v4469_v34 = vld [vmem:[%s7700_s0 + $0x229] sm:$0xff] }
 0x2e4   :  { %v2004_v46 = vpop.permute.xlu0 %2003 }
 0x2e5   :  { %2075 = vst.msk [vmem:[#allocation2 + $0x1c0] sm:$0xff] %vm436_vm2, %v2004_v46  ;;  %v2006_v11 = vpop.permute.xlu1 %2005  ;;  %v4506_v46 = vld [vmem:[%s7700_s0 + $0x262] sm:$0xff] }
 0x2e6   :  { %2076 = vst.msk [vmem:[#allocation2 + $0x1c8] sm:$0xff] %vm436_vm2, %v2006_v11  ;;  %3121 = vrot.lane.b32.xlu0 %v6717_v41, %s4847_s22 }
 0x2e7   :  { %2547 = vrot.lane.b32.xlu1 %v6717_v41, %s4844_s9 }
 0x2e8   :  { %v2008_v18 = vpop.permute.xlu0 %2007 }
 0x2e9   :  { %2077 = vst.msk [vmem:[#allocation2 + $0x1d0] sm:$0xff] %vm436_vm2, %v2008_v18  ;;  %v2010_v21 = vpop.permute.xlu1 %2009 }
 0x2ea   :  { %2078 = vst.msk [vmem:[#allocation2 + $0x1d8] sm:$0xff] %vm436_vm2, %v2010_v21  ;;  %2739 = vrot.lane.b32.xlu0 %v6390_v7, %s4845_s15  ;;  %v4470_v7 = vld [vmem:[%s7700_s0 + $0x231] sm:$0xff] }
 0x2eb   :  { %2741 = vrot.lane.b32.xlu1 %v6397_v22, %s4845_s15 }
 0x2ec   :  { %v2012_v29 = vpop.permute.xlu0 %2011 }
 0x2ed   :  { %2079 = vst.msk [vmem:[#allocation2 + $0x1e0] sm:$0xff] %vm436_vm2, %v2012_v29  ;;  %v2014_v41 = vpop.permute.xlu1 %2013 }
 0x2ee   :  { %2080 = vst.msk [vmem:[#allocation2 + $0x1e8] sm:$0xff] %vm436_vm2, %v2014_v41  ;;  %2931 = vrot.lane.b32.xlu0 %v4469_v34, %s4846_s25 }
 0x2ef   :  { %2357 = vrot.lane.b32.xlu1 %v4469_v34, %s4843_s4 }
 0x2f0   :  { %v2016_v42 = vpop.permute.xlu0 %2015 }
 0x2f1   :  { %2081 = vst.msk [vmem:[#allocation2 + $0x1f0] sm:$0xff] %vm436_vm2, %v2016_v42  ;;  %v2018_v22 = vpop.permute.xlu1 %2017 }
 0x2f2   :  { %2082 = vst.msk [vmem:[#allocation2 + $0x1f8] sm:$0xff] %vm436_vm2, %v2018_v22  ;;  %2933 = vrot.lane.b32.xlu0 %v4470_v7, %s4846_s25 }
 0x2f3   :  { %3123 = vrot.lane.b32.xlu1 %v6730_v45, %s4847_s22 }
 0x2f4   :  { %v2150_v43 = vpop.permute.xlu0 %2149 }
 0x2f5   :  { %2245 = vst.msk [vmem:[#allocation2 + $0x100] sm:$0xff] %vm632_vm3, %v2150_v43  ;;  %v2152_v60 = vpop.permute.xlu1 %2151 }
 0x2f6   :  { %2246 = vst.msk [vmem:[#allocation2 + $0x108] sm:$0xff] %vm632_vm3, %v2152_v60  ;;  %2359 = vrot.lane.b32.xlu0 %v4470_v7, %s4843_s4 }
 0x2f7   :  { %2549 = vrot.lane.b32.xlu1 %v6730_v45, %s4844_s9  ;;  %v4471_v45 = vld [vmem:[%s7700_s0 + $0x241] sm:$0xff] }
 0x2f8   :  { %v2154_v50 = vpop.permute.xlu0 %2153 }
 0x2f9   :  { %2247 = vst.msk [vmem:[#allocation2 + $0x110] sm:$0xff] %vm632_vm3, %v2154_v50  ;;  %v2156_v51 = vpop.permute.xlu1 %2155 }
 0x2fa   :  { %2248 = vst.msk [vmem:[#allocation2 + $0x118] sm:$0xff] %vm632_vm3, %v2156_v51  ;;  %3125 = vrot.lane.b32.xlu0 %v6735_v13, %s4847_s22 }
 0x2fb   :  { %2551 = vrot.lane.b32.xlu1 %v6735_v13, %s4844_s9 }
 0x2fc   :  { %v2158_v0 = vpop.permute.xlu0 %2157 }
 0x2fd   :  { %2249 = vst.msk [vmem:[#allocation2 + $0x120] sm:$0xff] %vm632_vm3, %v2158_v0  ;;  %v2160_v58 = vpop.permute.xlu1 %2159 }
 0x2fe   :  { %2250 = vst.msk [vmem:[#allocation2 + $0x128] sm:$0xff] %vm632_vm3, %v2160_v58  ;;  %2743 = vrot.lane.b32.xlu0 %v6416_v25, %s4845_s15  ;;  %v4472_v25 = vld [vmem:[%s7700_s0 + $0x249] sm:$0xff] }
 0x2ff   :  { %2745 = vrot.lane.b32.xlu1 %v6423_v28, %s4845_s15 }
 0x300   :  { %v2162_v16 = vpop.permute.xlu0 %2161 }
 0x301   :  { %2251 = vst.msk [vmem:[#allocation2 + $0x130] sm:$0xff] %vm632_vm3, %v2162_v16  ;;  %v2164_v13 = vpop.permute.xlu1 %2163  ;;  %v4475_v16 = vld [vmem:[%s7700_s0 + $0x271] sm:$0xff] }
 0x302   :  { %2252 = vst.msk [vmem:[#allocation2 + $0x138] sm:$0xff] %vm632_vm3, %v2164_v13  ;;  %2935 = vrot.lane.b32.xlu0 %v4471_v45, %s4846_s25 }
 0x303   :  { %2361 = vrot.lane.b32.xlu1 %v4471_v45, %s4843_s4 }
 0x304   :  { %v2166_v62 = vpop.permute.xlu0 %2165 }
 0x305   :  { %2253 = vst.msk [vmem:[#allocation2 + $0x140] sm:$0xff] %vm632_vm3, %v2166_v62  ;;  %v2168_v28 = vpop.permute.xlu1 %2167 }
 0x306   :  { %2254 = vst.msk [vmem:[#allocation2 + $0x148] sm:$0xff] %vm632_vm3, %v2168_v28  ;;  %2937 = vrot.lane.b32.xlu0 %v4472_v25, %s4846_s25 }
 0x307   :  { %3127 = vrot.lane.b32.xlu1 %v6748_v17, %s4847_s22 }
 0x308   :  { %v2170_v19 = vpop.permute.xlu0 %2169 }
 0x309   :  { %2255 = vst.msk [vmem:[#allocation2 + $0x150] sm:$0xff] %vm632_vm3, %v2170_v19  ;;  %v2172_v24 = vpop.permute.xlu1 %2171 }
 0x30a   :  { %2256 = vst.msk [vmem:[#allocation2 + $0x158] sm:$0xff] %vm632_vm3, %v2172_v24  ;;  %2363 = vrot.lane.b32.xlu0 %v4472_v25, %s4843_s4 }
 0x30b   :  { %2553 = vrot.lane.b32.xlu1 %v6748_v17, %s4844_s9 }
 0x30c   :  { %v2174_v26 = vpop.permute.xlu0 %2173 }
 0x30d   :  { %2257 = vst.msk [vmem:[#allocation2 + $0x160] sm:$0xff] %vm632_vm3, %v2174_v26  ;;  %v2176_v2 = vpop.permute.xlu1 %2175  ;;  %v4476_v26 = vld [vmem:[%s7700_s0 + $0x279] sm:$0xff] }
 0x30e   :  { %2258 = vst.msk [vmem:[#allocation2 + $0x168] sm:$0xff] %vm632_vm3, %v2176_v2  ;;  %3129 = vrot.lane.b32.xlu0 %v6753_v14, %s4847_s22 }
 0x30f   :  { %2555 = vrot.lane.b32.xlu1 %v6753_v14, %s4844_s9 }
 0x310   :  { %v2178_v61 = vpop.permute.xlu0 %2177 }
 0x311   :  { %2259 = vst.msk [vmem:[#allocation2 + $0x170] sm:$0xff] %vm632_vm3, %v2178_v61  ;;  %v2180_v17 = vpop.permute.xlu1 %2179  ;;  %v4685_v54 = vpop.f32.mrb[0].mxu0 }
 0x312   :  { %2260 = vst.msk [vmem:[#allocation2 + $0x178] sm:$0xff] %vm632_vm3, %v2180_v17  ;;  %v3584_v47 = vadd.f32 %v4685_v54, %v7099_v1  ;;  %2747 = vrot.lane.b32.xlu0 %v6440_v33, %s4845_s15  ;;  %v3578_v63 = vpop.f32.mrb[1].mxu0  ;;  %v4507_v17 = vld [vmem:[%s7700_s0 + $0x272] sm:$0xff] }
 0x313   :  { %v3579_v14 = vadd.f32 %v7099_v1, %v3578_v63  ;;  %2749 = vrot.lane.b32.xlu1 %v6447_v36, %s4845_s15 }
 0x314   :  { %v3898_v27 = vmax.f32 %v3584_v47, 0.0  ;;  %v2182_v31 = vpop.permute.xlu0 %2181 }
 0x315   :  { %v3897_v35 = vmax.f32 %v3579_v14, 0.0  ;;  %2261 = vst.msk [vmem:[#allocation2 + $0x180] sm:$0xff] %vm632_vm3, %v2182_v31  ;;  %v2184_v6 = vpop.permute.xlu1 %2183  ;;  %v4688_v12 = vpop.f32.mrb[2].mxu0 }
 0x316   :  { %3962 = vst [vmem:[#allocation3 + $0x8] sm:$0xff] %v3898_v27  ;;  %2262 = vst.msk [vmem:[#allocation2 + $0x188] sm:$0xff] %vm632_vm3, %v2184_v6  ;;  %v3594_v33 = vadd.f32 %v4688_v12, %v7099_v1  ;;  %2939 = vrot.lane.b32.xlu0 %v4473_v5, %s4846_s25  ;;  %v3588_v20 = vpop.f32.mrb[3].mxu0 }
 0x317   :  { %3961 = vst [vmem:[#allocation3] sm:$0xff] %v3897_v35  ;;  %v3589_v36 = vadd.f32 %v7099_v1, %v3588_v20  ;;  %2365 = vrot.lane.b32.xlu1 %v4473_v5, %s4843_s4 }
 0x318   :  { %v3900_v37 = vmax.f32 %v3594_v33, 0.0  ;;  %v2342_v59 = vpop.permute.xlu0 %2341 }
 0x319   :  { %v3899_v38 = vmax.f32 %v3589_v36, 0.0  ;;  %2437 = vst.msk [vmem:[#allocation2 + $0x100] sm:$0xff] %vm825_vm4, %v2342_v59  ;;  %v2344_v40 = vpop.permute.xlu1 %2343  ;;  %v4691_v48 = vpop.f32.mrb[4].mxu0  ;;  %v4508_v59 = vld [vmem:[%s7700_s0 + $0x27a] sm:$0xff] }
 0x31a   :  { %3964 = vst [vmem:[#allocation3 + $0x18] sm:$0xff] %v3900_v37  ;;  %2438 = vst.msk [vmem:[#allocation2 + $0x108] sm:$0xff] %vm825_vm4, %v2344_v40  ;;  %v3604_v52 = vadd.f32 %v4691_v48, %v7099_v1  ;;  %2941 = vrot.lane.b32.xlu0 %v4474_v55, %s4846_s25  ;;  %v3598_v53 = vpop.f32.mrb[5].mxu0 }
 0x31b   :  { %3963 = vst [vmem:[#allocation3 + $0x10] sm:$0xff] %v3899_v38  ;;  %v3599_v57 = vadd.f32 %v7099_v1, %v3598_v53  ;;  %3131 = vrot.lane.b32.xlu1 %v6766_v15, %s4847_s22 }
 0x31c   :  { %v3902_v23 = vmax.f32 %v3604_v52, 0.0  ;;  %v2534_v8 = vpop.permute.xlu0 %2533 }
 0x31d   :  { %v3901_v3 = vmax.f32 %v3599_v57, 0.0  ;;  %2629 = vst.msk [vmem:[#allocation2 + $0x100] sm:$0xff] %vm1018_vm5, %v2534_v8  ;;  %v2536_v9 = vpop.permute.xlu1 %2535  ;;  %v4694_v4 = vpop.f32.mrb[6].mxu0 }
 0x31e   :  { %3966 = vst [vmem:[#allocation3 + $0x28] sm:$0xff] %v3902_v23  ;;  %2630 = vst.msk [vmem:[#allocation2 + $0x108] sm:$0xff] %vm1018_vm5, %v2536_v9  ;;  %v3614_v10 = vadd.f32 %v4694_v4, %v7099_v1  ;;  %2367 = vrot.lane.b32.xlu0 %v4474_v55, %s4843_s4  ;;  %v3608_v30 = vpop.f32.mrb[7].mxu0 }
 0x31f   :  { %3965 = vst [vmem:[#allocation3 + $0x20] sm:$0xff] %v3901_v3  ;;  %v3609_v15 = vadd.f32 %v7099_v1, %v3608_v30  ;;  %2557 = vrot.lane.b32.xlu1 %v4411_v32, %s4844_s9 }
 0x320   :  { %v3904_v11 = vmax.f32 %v3614_v10, 0.0  ;;  %v2728_v18 = vpop.permute.xlu0 %2727 }
 0x321   :  { %v3903_v21 = vmax.f32 %v3609_v15, 0.0  ;;  %2823 = vst.msk [vmem:[#allocation2 + $0x100] sm:$0xff] %vm1214_vm6, %v2728_v18  ;;  %v2730_v34 = vpop.permute.xlu1 %2729  ;;  %v4697_v29 = vpop.f32.mrb[8].mxu0  ;;  %v4477_v18 = vld [vmem:[%s7700_s0 + $0x289] sm:$0xff] }
 0x322   :  { %3968 = vst [vmem:[#allocation3 + $0x38] sm:$0xff] %v3904_v11  ;;  %2824 = vst.msk [vmem:[#allocation2 + $0x108] sm:$0xff] %vm1214_vm6, %v2730_v34  ;;  %v3624_v41 = vadd.f32 %v4697_v29, %v7099_v1  ;;  %3133 = vrot.lane.b32.xlu0 %v4506_v46, %s4847_s22  ;;  %v3618_v7 = vpop.f32.mrb[9].mxu0 }
 0x323   :  { %3967 = vst [vmem:[#allocation3 + $0x30] sm:$0xff] %v3903_v21  ;;  %v3619_v42 = vadd.f32 %v7099_v1, %v3618_v7  ;;  %2559 = vrot.lane.b32.xlu1 %v4506_v46, %s4844_s9 }
 0x324   :  { %v3906_v22 = vmax.f32 %v3624_v41, 0.0  ;;  %v2920_v43 = vpop.permute.xlu0 %2919 }
 0x325   :  { %v3905_v60 = vmax.f32 %v3619_v42, 0.0  ;;  %3015 = vst.msk [vmem:[#allocation2 + $0x100] sm:$0xff] %vm1407_vm7, %v2920_v43  ;;  %v2346_v50 = vpop.permute.xlu1 %2345  ;;  %v4700_v51 = vpop.f32.mrb[10].mxu0 }
 0x326   :  { %3970 = vst [vmem:[#allocation3 + $0x48] sm:$0xff] %v3906_v22  ;;  %2439 = vst.msk [vmem:[#allocation2 + $0x110] sm:$0xff] %vm825_vm4, %v2346_v50  ;;  %v3634_v0 = vadd.f32 %v4700_v51, %v7099_v1  ;;  %2751 = vrot.lane.b32.xlu0 %v6464_v39, %s4845_s15  ;;  %v3628_v58 = vpop.f32.mrb[11].mxu0  ;;  %v4478_v22 = vld [vmem:[%s7700_s0 + $0x291] sm:$0xff] }
 0x327   :  { %3969 = vst [vmem:[#allocation3 + $0x40] sm:$0xff] %v3905_v60  ;;  %v3629_v45 = vadd.f32 %v7099_v1, %v3628_v58  ;;  %2753 = vrot.lane.b32.xlu1 %v6471_v44, %s4845_s15  ;;  %v4509_v50 = vld [vmem:[%s7700_s0 + $0x28a] sm:$0xff] }
 0x328   :  { %v3908_v13 = vmax.f32 %v3634_v0, 0.0  ;;  %v2922_v25 = vpop.permute.xlu0 %2921 }
 0x329   :  { %v3907_v62 = vmax.f32 %v3629_v45, 0.0  ;;  %3016 = vst.msk [vmem:[#allocation2 + $0x108] sm:$0xff] %vm1407_vm7, %v2922_v25  ;;  %v3112_v28 = vpop.permute.xlu1 %3111  ;;  %v4703_v19 = vpop.f32.mrb[12].mxu0 }
 0x32a   :  { %3972 = vst [vmem:[#allocation3 + $0x58] sm:$0xff] %v3908_v13  ;;  %3207 = vst.msk [vmem:[#allocation2 + $0x100] sm:$0xff] %vm1600_vm8, %v3112_v28  ;;  %v3644_v39 = vadd.f32 %v4703_v19, %v7099_v1  ;;  %2943 = vrot.lane.b32.xlu0 %v4475_v16, %s4846_s25  ;;  %v3638_v24 = vpop.f32.mrb[13].mxu0 }
 0x32b   :  { %3971 = vst [vmem:[#allocation3 + $0x50] sm:$0xff] %v3907_v62  ;;  %v3639_v44 = vadd.f32 %v7099_v1, %v3638_v24  ;;  %2369 = vrot.lane.b32.xlu1 %v4475_v16, %s4843_s4 }
 0x32c   :  { %v3910_v2 = vmax.f32 %v3644_v39, 0.0  ;;  %v2348_v61 = vpop.permute.xlu0 %2347 }
 0x32d   :  { %v3909_v54 = vmax.f32 %v3639_v44, 0.0  ;;  %2440 = vst.msk [vmem:[#allocation2 + $0x118] sm:$0xff] %vm825_vm4, %v2348_v61  ;;  %v2538_v47 = vpop.permute.xlu1 %2537  ;;  %v4706_v63 = vpop.f32.mrb[14].mxu0  ;;  %v4510_v61 = vld [vmem:[%s7700_s0 + $0x292] sm:$0xff] }
 0x32e   :  { %3974 = vst [vmem:[#allocation3 + $0x68] sm:$0xff] %v3910_v2  ;;  %2631 = vst.msk [vmem:[#allocation2 + $0x110] sm:$0xff] %vm1018_vm5, %v2538_v47  ;;  %v3654_v14 = vadd.f32 %v4706_v63, %v7099_v1  ;;  %2945 = vrot.lane.b32.xlu0 %v4476_v26, %s4846_s25  ;;  %v3648_v5 = vpop.f32.mrb[15].mxu0 }
 0x32f   :  { %3973 = vst [vmem:[#allocation3 + $0x60] sm:$0xff] %v3909_v54  ;;  %v3649_v27 = vadd.f32 %v7099_v1, %v3648_v5  ;;  %3135 = vrot.lane.b32.xlu1 %v4507_v17, %s4847_s22 }
 0x330   :  { %v3912_v31 = vmax.f32 %v3654_v14, 0.0  ;;  %v3114_v35 = vpop.permute.xlu0 %3113 }
 0x331   :  { %v3911_v6 = vmax.f32 %v3649_v27, 0.0  ;;  %3208 = vst.msk [vmem:[#allocation2 + $0x108] sm:$0xff] %vm1600_vm8, %v3114_v35  ;;  %v2540_v12 = vpop.permute.xlu1 %2539  ;;  %v4709_v33 = vpop.f32.mrb[16].mxu0  ;;  %v3271_v20 = vld [vmem:[#allocation2 + $0x100] sm:$0xff] }
 0x332   :  { %3976 = vst [vmem:[#allocation3 + $0x78] sm:$0xff] %v3912_v31  ;;  %2632 = vst.msk [vmem:[#allocation2 + $0x118] sm:$0xff] %vm1018_vm5, %v2540_v12  ;;  %v3664_v36 = vadd.f32 %v4709_v33, %v7099_v1  ;;  %2371 = vrot.lane.b32.xlu0 %v4476_v26, %s4843_s4  ;;  %v3658_v55 = vpop.f32.mrb[17].mxu0  ;;  %4731 = vmatprep.mubr.msk.f32.mxu1 %vm3319_vm9, %v3271_v20  ;;  %v4447_v35 = vld [vmem:[%s7700_s0 + $0x2a0] sm:$0xff] }
 0x333   :  { %3975 = vst [vmem:[#allocation3 + $0x70] sm:$0xff] %v3911_v6  ;;  %v3659_v37 = vadd.f32 %v7099_v1, %v3658_v55  ;;  %2561 = vrot.lane.b32.xlu1 %v4507_v17, %s4844_s9 }
 0x334   :  { %v3914_v38 = vmax.f32 %v3664_v36, 0.0  ;;  %v2732_v40 = vpop.permute.xlu0 %2731 }
 0x335   :  { %v3913_v48 = vmax.f32 %v3659_v37, 0.0  ;;  %2825 = vst.msk [vmem:[#allocation2 + $0x110] sm:$0xff] %vm1214_vm6, %v2732_v40  ;;  %v2734_v52 = vpop.permute.xlu1 %2733  ;;  %v4712_v53 = vpop.f32.mrb[18].mxu0  ;;  %v4448_v40 = vld [vmem:[%s7700_s0 + $0x2a8] sm:$0xff] }
 0x336   :  { %3978 = vst [vmem:[#allocation3 + $0x88] sm:$0xff] %v3914_v38  ;;  %2826 = vst.msk [vmem:[#allocation2 + $0x118] sm:$0xff] %vm1214_vm6, %v2734_v52  ;;  %v3674_v57 = vadd.f32 %v4712_v53, %v7099_v1  ;;  %3137 = vrot.lane.b32.xlu0 %v4508_v59, %s4847_s22  ;;  %v3668_v23 = vpop.f32.mrb[19].mxu0  ;;  %v4479_v53 = vld [vmem:[%s7700_s0 + $0x2a1] sm:$0xff] }
 0x337   :  { %3977 = vst [vmem:[#allocation3 + $0x80] sm:$0xff] %v3913_v48  ;;  %v3669_v8 = vadd.f32 %v7099_v1, %v3668_v23  ;;  %2563 = vrot.lane.b32.xlu1 %v4508_v59, %s4844_s9 }
 0x338   :  { %v3916_v32 = vmax.f32 %v3674_v57, 0.0  ;;  %v2924_v3 = vpop.permute.xlu0 %2923  ;;  %v3272_v9 = vld [vmem:[#allocation2 + $0x108] sm:$0xff] }
 0x339   :  { %v3915_v4 = vmax.f32 %v3669_v8, 0.0  ;;  %3017 = vst.msk [vmem:[#allocation2 + $0x110] sm:$0xff] %vm1407_vm7, %v2924_v3  ;;  %v2350_v10 = vpop.permute.xlu1 %2349  ;;  %v4715_v30 = vpop.f32.mrb[20].mxu0  ;;  %4732 = vmatmul.mubr.msk.f32.vlgmr.msra.gmra.mrb[0].mxu1 %vm3319_vm9, %v3272_v9  ;;  %v4511_v9 = vld [vmem:[%s7700_s0 + $0x2a2] sm:$0xff] }
 0x33a   :  { %3980 = vst [vmem:[#allocation3 + $0x98] sm:$0xff] %v3916_v32  ;;  %2441 = vst.msk [vmem:[#allocation2 + $0x120] sm:$0xff] %vm825_vm4, %v2350_v10  ;;  %v3684_v15 = vadd.f32 %v4715_v30, %v7099_v1  ;;  %2755 = vrot.lane.b32.xlu0 %v6488_v49, %s4845_s15  ;;  %v3678_v46 = vpop.f32.mrb[21].mxu0  ;;  %v4480_v32 = vld [vmem:[%s7700_s0 + $0x2a9] sm:$0xff] }
 0x33b   :  { %3979 = vst [vmem:[#allocation3 + $0x90] sm:$0xff] %v3915_v4  ;;  %v3679_v11 = vadd.f32 %v7099_v1, %v3678_v46  ;;  %2757 = vrot.lane.b32.xlu1 %v6495_v56, %s4845_s15  ;;  %v4512_v46 = vld [vmem:[%s7700_s0 + $0x2aa] sm:$0xff] }
 0x33c   :  { %v3918_v21 = vmax.f32 %v3684_v15, 0.0  ;;  %v2926_v34 = vpop.permute.xlu0 %2925 }
 0x33d   :  { %v3917_v29 = vmax.f32 %v3679_v11, 0.0  ;;  %3018 = vst.msk [vmem:[#allocation2 + $0x118] sm:$0xff] %vm1407_vm7, %v2926_v34  ;;  %v3116_v41 = vpop.permute.xlu1 %3115  ;;  %v4718_v7 = vpop.f32.mrb[22].mxu0  ;;  %v4449_v34 = vld [vmem:[%s7700_s0 + $0x2b8] sm:$0xff] }
 0x33e   :  { %3982 = vst [vmem:[#allocation3 + $0xa8] sm:$0xff] %v3918_v21  ;;  %3209 = vst.msk [vmem:[#allocation2 + $0x110] sm:$0xff] %vm1600_vm8, %v3116_v41  ;;  %v3694_v49 = vadd.f32 %v4718_v7, %v7099_v1  ;;  %2947 = vrot.lane.b32.xlu0 %v4477_v18, %s4846_s25  ;;  %v3688_v42 = vpop.f32.mrb[23].mxu0  ;;  %v4450_v7 = vld [vmem:[%s7700_s0 + $0x2c0] sm:$0xff] }
 0x33f   :  { %3981 = vst [vmem:[#allocation3 + $0xa0] sm:$0xff] %v3917_v29  ;;  %v3689_v56 = vadd.f32 %v7099_v1, %v3688_v42  ;;  %2373 = vrot.lane.b32.xlu1 %v4477_v18, %s4843_s4  ;;  %v4481_v42 = vld [vmem:[%s7700_s0 + $0x2b9] sm:$0xff] }
 0x340   :  { %v3920_v43 = vmax.f32 %v3694_v49, 0.0  ;;  %v2352_v60 = vpop.permute.xlu0 %2351 }
 0x341   :  { %v3919_v51 = vmax.f32 %v3689_v56, 0.0  ;;  %2442 = vst.msk [vmem:[#allocation2 + $0x128] sm:$0xff] %vm825_vm4, %v2352_v60  ;;  %v2542_v0 = vpop.permute.xlu1 %2541  ;;  %v4721_v58 = vpop.f32.mrb[24].mxu0 }
 0x342   :  { %3984 = vst [vmem:[#allocation3 + $0xb8] sm:$0xff] %v3920_v43  ;;  %2633 = vst.msk [vmem:[#allocation2 + $0x120] sm:$0xff] %vm1018_vm5, %v2542_v0  ;;  %v3704_v45 = vadd.f32 %v4721_v58, %v7099_v1  ;;  %2949 = vrot.lane.b32.xlu0 %v4478_v22, %s4846_s25  ;;  %v3698_v16 = vpop.f32.mrb[25].mxu0  ;;  %v4513_v0 = vld [vmem:[%s7700_s0 + $0x2ba] sm:$0xff] }
 0x343   :  { %3983 = vst [vmem:[#allocation3 + $0xb0] sm:$0xff] %v3919_v51  ;;  %v3699_v13 = vadd.f32 %v7099_v1, %v3698_v16  ;;  %3139 = vrot.lane.b32.xlu1 %v4509_v50, %s4847_s22 }
 0x344   :  { %v3922_v25 = vmax.f32 %v3704_v45, 0.0  ;;  %v3118_v62 = vpop.permute.xlu0 %3117 }
 0x345   :  { %v3921_v28 = vmax.f32 %v3699_v13, 0.0  ;;  %3210 = vst.msk [vmem:[#allocation2 + $0x118] sm:$0xff] %vm1600_vm8, %v3118_v62  ;;  %v2544_v19 = vpop.permute.xlu1 %2543  ;;  %v4724_v39 = vpop.f32.mrb[26].mxu0  ;;  %v3273_v24 = vld [vmem:[#allocation2 + $0x110] sm:$0xff] }
 0x346   :  { %3986 = vst [vmem:[#allocation3 + $0xc8] sm:$0xff] %v3922_v25  ;;  %2634 = vst.msk [vmem:[#allocation2 + $0x128] sm:$0xff] %vm1018_vm5, %v2544_v19  ;;  %v3714_v44 = vadd.f32 %v4724_v39, %v7099_v1  ;;  %2375 = vrot.lane.b32.xlu0 %v4478_v22, %s4843_s4  ;;  %v3708_v26 = vpop.f32.mrb[27].mxu0  ;;  %4734 = vmatprep.mubr.msk.f32.mxu1 %vm3319_vm9, %v3273_v24  ;;  %v4514_v25 = vld [vmem:[%s7700_s0 + $0x2c2] sm:$0xff]  ;;  %v4451_v19 = vld [vmem:[%s7700_s0 + $0x2d0] sm:$0xff] }
 0x347   :  { %3985 = vst [vmem:[#allocation3 + $0xc0] sm:$0xff] %v3921_v28  ;;  %v3709_v2 = vadd.f32 %v7099_v1, %v3708_v26  ;;  %2565 = vrot.lane.b32.xlu1 %v4509_v50, %s4844_s9  ;;  %v4482_v50 = vld [vmem:[%s7700_s0 + $0x2c1] sm:$0xff] }
 0x348   :  { %v3924_v17 = vmax.f32 %v3714_v44, 0.0  ;;  %v2736_v54 = vpop.permute.xlu0 %2735  ;;  %v4452_v44 = vld [vmem:[%s7700_s0 + $0x2d8] sm:$0xff] }
 0x349   :  { %v3923_v47 = vmax.f32 %v3709_v2, 0.0  ;;  %2827 = vst.msk [vmem:[#allocation2 + $0x120] sm:$0xff] %vm1214_vm6, %v2736_v54  ;;  %v2738_v63 = vpop.permute.xlu1 %2737  ;;  %v4727_v14 = vpop.f32.mrb[28].mxu0  ;;  %v4483_v2 = vld [vmem:[%s7700_s0 + $0x2d1] sm:$0xff] }
 0x34a   :  { %3988 = vst [vmem:[#allocation3 + $0xd8] sm:$0xff] %v3924_v17  ;;  %2828 = vst.msk [vmem:[#allocation2 + $0x128] sm:$0xff] %vm1214_vm6, %v2738_v63  ;;  %v3724_v5 = vadd.f32 %v4727_v14, %v7099_v1  ;;  %3141 = vrot.lane.b32.xlu0 %v4510_v61, %s4847_s22  ;;  %v3718_v27 = vpop.f32.mrb[29].mxu0  ;;  %v4484_v63 = vld [vmem:[%s7700_s0 + $0x2d9] sm:$0xff] }
 0x34b   :  { %3987 = vst [vmem:[#allocation3 + $0xd0] sm:$0xff] %v3923_v47  ;;  %v3719_v31 = vadd.f32 %v7099_v1, %v3718_v27  ;;  %2567 = vrot.lane.b32.xlu1 %v4510_v61, %s4844_s9  ;;  %v4515_v27 = vld [vmem:[%s7700_s0 + $0x2d2] sm:$0xff] }
 0x34c   :  { %v3926_v6 = vmax.f32 %v3724_v5, 0.0  ;;  %v2928_v12 = vpop.permute.xlu0 %2927  ;;  %v3274_v33 = vld [vmem:[#allocation2 + $0x118] sm:$0xff] }
 0x34d   :  { %v3925_v20 = vmax.f32 %v3719_v31, 0.0  ;;  %3019 = vst.msk [vmem:[#allocation2 + $0x120] sm:$0xff] %vm1407_vm7, %v2928_v12  ;;  %v2354_v36 = vpop.permute.xlu1 %2353  ;;  %v4730_v55 = vpop.f32.mrb[30].mxu0  ;;  %4735 = vmatmul.mubr.msk.f32.gmra.mrb[2].mxu1 %vm3319_vm9, %v3274_v33  ;;  %v4516_v12 = vld [vmem:[%s7700_s0 + $0x2da] sm:$0xff] }
 0x34e   :  { %3990 = vst [vmem:[#allocation3 + $0xe8] sm:$0xff] %v3926_v6  ;;  %2443 = vst.msk [vmem:[#allocation2 + $0x130] sm:$0xff] %vm825_vm4, %v2354_v36  ;;  %v3734_v37 = vadd.f32 %v4730_v55, %v7099_v1  ;;  %2759 = vrot.lane.b32.xlu0 %v4447_v35, %s4845_s15  ;;  %v3728_v59 = vpop.f32.mrb[31].mxu0  ;;  %v4453_v36 = vld [vmem:[%s7700_s0 + $0x2e8] sm:$0xff] }
 0x34f   :  { %3989 = vst [vmem:[#allocation3 + $0xe0] sm:$0xff] %v3925_v20  ;;  %v3729_v38 = vadd.f32 %v7099_v1, %v3728_v59  ;;  %2185 = vrot.lane.b32.xlu1 %v4447_v35, %s4842_s26 }
 0x350   :  { %v3928_v48 = vmax.f32 %v3734_v37, 0.0  ;;  %v2930_v52 = vpop.permute.xlu0 %2929 }
 0x351   :  { %v3927_v57 = vmax.f32 %v3729_v38, 0.0  ;;  %3020 = vst.msk [vmem:[#allocation2 + $0x128] sm:$0xff] %vm1407_vm7, %v2930_v52  ;;  %v3120_v23 = vpop.permute.xlu1 %3119  ;;  %v4454_v38 = vld [vmem:[%s7700_s0 + $0x2f0] sm:$0xff] }
 0x352   :  { %3992 = vst [vmem:[#allocation3 + $0xf8] sm:$0xff] %v3928_v48  ;;  %3211 = vst.msk [vmem:[#allocation2 + $0x120] sm:$0xff] %vm1600_vm8, %v3120_v23  ;;  %2761 = vrot.lane.b32.xlu0 %v4448_v40, %s4845_s15  ;;  %v4485_v48 = vld [vmem:[%s7700_s0 + $0x2e9] sm:$0xff] }
 0x353   :  { %3991 = vst [vmem:[#allocation3 + $0xf0] sm:$0xff] %v3927_v57  ;;  %2951 = vrot.lane.b32.xlu1 %v4479_v53, %s4846_s25 }
 0x354   :  { %v2356_v1 = vpop.permute.xlu0 %2355 }
 0x355   :  { %2444 = vst.msk [vmem:[#allocation2 + $0x138] sm:$0xff] %vm825_vm4, %v2356_v1  ;;  %v2546_v8 = vpop.permute.xlu1 %2545  ;;  %v4486_v1 = vld [vmem:[%s7700_s0 + $0x2f1] sm:$0xff] }
 0x356   :  { %2635 = vst.msk [vmem:[#allocation2 + $0x130] sm:$0xff] %vm1018_vm5, %v2546_v8  ;;  %2187 = vrot.lane.b32.xlu0 %v4448_v40, %s4842_s26 }
 0x357   :  { %2377 = vrot.lane.b32.xlu1 %v4479_v53, %s4843_s4 }
 0x358   :  { %v3122_v3 = vpop.permute.xlu0 %3121 }
 0x359   :  { %3212 = vst.msk [vmem:[#allocation2 + $0x128] sm:$0xff] %vm1600_vm8, %v3122_v3  ;;  %v2548_v4 = vpop.permute.xlu1 %2547  ;;  %v3275_v10 = vld [vmem:[#allocation2 + $0x120] sm:$0xff] }
 0x35a   :  { %2636 = vst.msk [vmem:[#allocation2 + $0x138] sm:$0xff] %vm1018_vm5, %v2548_v4  ;;  %2953 = vrot.lane.b32.xlu0 %v4480_v32, %s4846_s25  ;;  %4737 = vmatprep.mubr.msk.f32.mxu1 %vm3319_vm9, %v3275_v10  ;;  %v4518_v10 = vld [vmem:[%s7700_s0 + $0x2f2] sm:$0xff] }
 0x35b   :  { %3143 = vrot.lane.b32.xlu1 %v4511_v9, %s4847_s22 }
 0x35c   :  { %v2740_v30 = vpop.permute.xlu0 %2739 }
 0x35d   :  { %2829 = vst.msk [vmem:[#allocation2 + $0x130] sm:$0xff] %vm1214_vm6, %v2740_v30  ;;  %v2742_v15 = vpop.permute.xlu1 %2741 }
 0x35e   :  { %2830 = vst.msk [vmem:[#allocation2 + $0x138] sm:$0xff] %vm1214_vm6, %v2742_v15  ;;  %2379 = vrot.lane.b32.xlu0 %v4480_v32, %s4843_s4  ;;  %v4517_v32 = vld [vmem:[%s7700_s0 + $0x2ea] sm:$0xff] }
 0x35f   :  { %2569 = vrot.lane.b32.xlu1 %v4511_v9, %s4844_s9 }
 0x360   :  { %v2932_v11 = vpop.permute.xlu0 %2931  ;;  %v3276_v18 = vld [vmem:[#allocation2 + $0x128] sm:$0xff] }
 0x361   :  { %3021 = vst.msk [vmem:[#allocation2 + $0x130] sm:$0xff] %vm1407_vm7, %v2932_v11  ;;  %v2358_v21 = vpop.permute.xlu1 %2357  ;;  %4738 = vmatmul.mubr.msk.f32.gmra.mrb[4].mxu1 %vm3319_vm9, %v3276_v18  ;;  %v4455_v11 = vld [vmem:[%s7700_s0 + $0x300] sm:$0xff] }
 0x362   :  { %2445 = vst.msk [vmem:[#allocation2 + $0x140] sm:$0xff] %vm825_vm4, %v2358_v21  ;;  %3145 = vrot.lane.b32.xlu0 %v4512_v46, %s4847_s22 }
 0x363   :  { %2571 = vrot.lane.b32.xlu1 %v4512_v46, %s4844_s9 }
 0x364   :  { %v2934_v29 = vpop.permute.xlu0 %2933 }
 0x365   :  { %3022 = vst.msk [vmem:[#allocation2 + $0x138] sm:$0xff] %vm1407_vm7, %v2934_v29  ;;  %v3124_v41 = vpop.permute.xlu1 %3123 }
 0x366   :  { %3213 = vst.msk [vmem:[#allocation2 + $0x130] sm:$0xff] %vm1600_vm8, %v3124_v41  ;;  %2763 = vrot.lane.b32.xlu0 %v4449_v34, %s4845_s15 }
 0x367   :  { %2189 = vrot.lane.b32.xlu1 %v4449_v34, %s4842_s26  ;;  %v4456_v34 = vld [vmem:[%s7700_s0 + $0x308] sm:$0xff] }
 0x368   :  { %v2360_v49 = vpop.permute.xlu0 %2359 }
 0x369   :  { %2446 = vst.msk [vmem:[#allocation2 + $0x148] sm:$0xff] %vm825_vm4, %v2360_v49  ;;  %v2550_v56 = vpop.permute.xlu1 %2549 }
 0x36a   :  { %2637 = vst.msk [vmem:[#allocation2 + $0x140] sm:$0xff] %vm1018_vm5, %v2550_v56  ;;  %2765 = vrot.lane.b32.xlu0 %v4450_v7, %s4845_s15 }
 0x36b   :  { %2955 = vrot.lane.b32.xlu1 %v4481_v42, %s4846_s25 }
 0x36c   :  { %v3126_v22 = vpop.permute.xlu0 %3125 }
 0x36d   :  { %3214 = vst.msk [vmem:[#allocation2 + $0x138] sm:$0xff] %vm1600_vm8, %v3126_v22  ;;  %v2552_v43 = vpop.permute.xlu1 %2551  ;;  %v3277_v60 = vld [vmem:[#allocation2 + $0x130] sm:$0xff] }
 0x36e   :  { %2638 = vst.msk [vmem:[#allocation2 + $0x148] sm:$0xff] %vm1018_vm5, %v2552_v43  ;;  %2191 = vrot.lane.b32.xlu0 %v4450_v7, %s4842_s26  ;;  %4740 = vmatprep.mubr.msk.f32.mxu1 %vm3319_vm9, %v3277_v60  ;;  %v4487_v7 = vld [vmem:[%s7700_s0 + $0x301] sm:$0xff]  ;;  %v4488_v22 = vld [vmem:[%s7700_s0 + $0x309] sm:$0xff] }
 0x36f   :  { %2381 = vrot.lane.b32.xlu1 %v4481_v42, %s4843_s4  ;;  %v4519_v60 = vld [vmem:[%s7700_s0 + $0x302] sm:$0xff] }
 0x370   :  { %v2744_v51 = vpop.permute.xlu0 %2743 }
 0x371   :  { %2831 = vst.msk [vmem:[#allocation2 + $0x140] sm:$0xff] %vm1214_vm6, %v2744_v51  ;;  %v2746_v58 = vpop.permute.xlu1 %2745 }
 0x372   :  { %2832 = vst.msk [vmem:[#allocation2 + $0x148] sm:$0xff] %vm1214_vm6, %v2746_v58  ;;  %2957 = vrot.lane.b32.xlu0 %v4482_v50, %s4846_s25 }
 0x373   :  { %3147 = vrot.lane.b32.xlu1 %v4513_v0, %s4847_s22 }
 0x374   :  { %v2936_v45 = vpop.permute.xlu0 %2935  ;;  %v3278_v16 = vld [vmem:[#allocation2 + $0x138] sm:$0xff] }
 0x375   :  { %3023 = vst.msk [vmem:[#allocation2 + $0x140] sm:$0xff] %vm1407_vm7, %v2936_v45  ;;  %v2362_v13 = vpop.permute.xlu1 %2361  ;;  %4741 = vmatmul.mubr.msk.f32.gmra.mrb[6].mxu1 %vm3319_vm9, %v3278_v16  ;;  %v4520_v45 = vld [vmem:[%s7700_s0 + $0x30a] sm:$0xff] }
 0x376   :  { %2447 = vst.msk [vmem:[#allocation2 + $0x150] sm:$0xff] %vm825_vm4, %v2362_v13  ;;  %2383 = vrot.lane.b32.xlu0 %v4482_v50, %s4843_s4 }
 0x377   :  { %2573 = vrot.lane.b32.xlu1 %v4513_v0, %s4844_s9 }
 0x378   :  { %v2938_v62 = vpop.permute.xlu0 %2937 }
 0x379   :  { %3024 = vst.msk [vmem:[#allocation2 + $0x148] sm:$0xff] %vm1407_vm7, %v2938_v62  ;;  %v3128_v28 = vpop.permute.xlu1 %3127 }
 0x37a   :  { %3215 = vst.msk [vmem:[#allocation2 + $0x140] sm:$0xff] %vm1600_vm8, %v3128_v28  ;;  %3149 = vrot.lane.b32.xlu0 %v4514_v25, %s4847_s22 }
 0x37b   :  { %2575 = vrot.lane.b32.xlu1 %v4514_v25, %s4844_s9  ;;  %v4457_v25 = vld [vmem:[%s7700_s0 + $0x318] sm:$0xff] }
 0x37c   :  { %v2364_v39 = vpop.permute.xlu0 %2363 }
 0x37d   :  { %2448 = vst.msk [vmem:[#allocation2 + $0x158] sm:$0xff] %vm825_vm4, %v2364_v39  ;;  %v2554_v24 = vpop.permute.xlu1 %2553  ;;  %v4458_v39 = vld [vmem:[%s7700_s0 + $0x320] sm:$0xff] }
 0x37e   :  { %2639 = vst.msk [vmem:[#allocation2 + $0x150] sm:$0xff] %vm1018_vm5, %v2554_v24  ;;  %2767 = vrot.lane.b32.xlu0 %v4451_v19, %s4845_s15 }
 0x37f   :  { %2193 = vrot.lane.b32.xlu1 %v4451_v19, %s4842_s26 }
 0x380   :  { %v3130_v26 = vpop.permute.xlu0 %3129 }
 0x381   :  { %3216 = vst.msk [vmem:[#allocation2 + $0x148] sm:$0xff] %vm1600_vm8, %v3130_v26  ;;  %v2556_v61 = vpop.permute.xlu1 %2555  ;;  %v3279_v17 = vld [vmem:[#allocation2 + $0x140] sm:$0xff] }
 0x382   :  { %2640 = vst.msk [vmem:[#allocation2 + $0x158] sm:$0xff] %vm1018_vm5, %v2556_v61  ;;  %2769 = vrot.lane.b32.xlu0 %v4452_v44, %s4845_s15  ;;  %4743 = vmatprep.mubr.msk.f32.mxu1 %vm3319_vm9, %v3279_v17  ;;  %v4490_v17 = vld [vmem:[%s7700_s0 + $0x321] sm:$0xff] }
 0x383   :  { %2959 = vrot.lane.b32.xlu1 %v4483_v2, %s4846_s25 }
 0x384   :  { %v2748_v54 = vpop.permute.xlu0 %2747 }
 0x385   :  { %2833 = vst.msk [vmem:[#allocation2 + $0x150] sm:$0xff] %vm1214_vm6, %v2748_v54  ;;  %v2750_v47 = vpop.permute.xlu1 %2749 }
 0x386   :  { %2834 = vst.msk [vmem:[#allocation2 + $0x158] sm:$0xff] %vm1214_vm6, %v2750_v47  ;;  %2195 = vrot.lane.b32.xlu0 %v4452_v44, %s4842_s26  ;;  %v4489_v44 = vld [vmem:[%s7700_s0 + $0x319] sm:$0xff] }
 0x387   :  { %2385 = vrot.lane.b32.xlu1 %v4483_v2, %s4843_s4  ;;  %v4521_v47 = vld [vmem:[%s7700_s0 + $0x31a] sm:$0xff] }
 0x388   :  { %v2940_v14 = vpop.permute.xlu0 %2939  ;;  %v3280_v5 = vld [vmem:[#allocation2 + $0x148] sm:$0xff] }
 0x389   :  { %3025 = vst.msk [vmem:[#allocation2 + $0x150] sm:$0xff] %vm1407_vm7, %v2940_v14  ;;  %v2366_v31 = vpop.permute.xlu1 %2365  ;;  %4744 = vmatmul.mubr.msk.f32.gmra.mrb[8].mxu1 %vm3319_vm9, %v3280_v5 }
 0x38a   :  { %2449 = vst.msk [vmem:[#allocation2 + $0x160] sm:$0xff] %vm825_vm4, %v2366_v31  ;;  %2961 = vrot.lane.b32.xlu0 %v4484_v63, %s4846_s25  ;;  %v4522_v31 = vld [vmem:[%s7700_s0 + $0x322] sm:$0xff] }
 0x38b   :  { %3151 = vrot.lane.b32.xlu1 %v4515_v27, %s4847_s22 }
 0x38c   :  { %v2942_v35 = vpop.permute.xlu0 %2941 }
 0x38d   :  { %3026 = vst.msk [vmem:[#allocation2 + $0x158] sm:$0xff] %vm1407_vm7, %v2942_v35  ;;  %v3132_v6 = vpop.permute.xlu1 %3131 }
 0x38e   :  { %3217 = vst.msk [vmem:[#allocation2 + $0x150] sm:$0xff] %vm1600_vm8, %v3132_v6  ;;  %2387 = vrot.lane.b32.xlu0 %v4484_v63, %s4843_s4 }
 0x38f   :  { %2577 = vrot.lane.b32.xlu1 %v4515_v27, %s4844_s9 }
 0x390   :  { %v2368_v33 = vpop.permute.xlu0 %2367 }
 0x391   :  { %2450 = vst.msk [vmem:[#allocation2 + $0x168] sm:$0xff] %vm825_vm4, %v2368_v33  ;;  %v2558_v20 = vpop.permute.xlu1 %2557 }
 0x392   :  { %2641 = vst.msk [vmem:[#allocation2 + $0x160] sm:$0xff] %vm1018_vm5, %v2558_v20  ;;  %3153 = vrot.lane.b32.xlu0 %v4516_v12, %s4847_s22 }
 0x393   :  { %2579 = vrot.lane.b32.xlu1 %v4516_v12, %s4844_s9  ;;  %v4459_v12 = vld [vmem:[%s7700_s0 + $0x330] sm:$0xff] }
 0x394   :  { %v3134_v55 = vpop.permute.xlu0 %3133 }
 0x395   :  { %3218 = vst.msk [vmem:[#allocation2 + $0x158] sm:$0xff] %vm1600_vm8, %v3134_v55  ;;  %v2560_v37 = vpop.permute.xlu1 %2559  ;;  %v3281_v59 = vld [vmem:[#allocation2 + $0x150] sm:$0xff]  ;;  %v4460_v55 = vld [vmem:[%s7700_s0 + $0x338] sm:$0xff] }
 0x396   :  { %2642 = vst.msk [vmem:[#allocation2 + $0x168] sm:$0xff] %vm1018_vm5, %v2560_v37  ;;  %2771 = vrot.lane.b32.xlu0 %v4453_v36, %s4845_s15  ;;  %4746 = vmatprep.mubr.msk.f32.mxu1 %vm3319_vm9, %v3281_v59  ;;  %v4491_v59 = vld [vmem:[%s7700_s0 + $0x331] sm:$0xff] }
 0x397   :  { %2197 = vrot.lane.b32.xlu1 %v4453_v36, %s4842_s26 }
 0x398   :  { %v2752_v40 = vpop.permute.xlu0 %2751 }
 0x399   :  { %2835 = vst.msk [vmem:[#allocation2 + $0x160] sm:$0xff] %vm1214_vm6, %v2752_v40  ;;  %v2754_v52 = vpop.permute.xlu1 %2753 }
 0x39a   :  { %2836 = vst.msk [vmem:[#allocation2 + $0x168] sm:$0xff] %vm1214_vm6, %v2754_v52  ;;  %2773 = vrot.lane.b32.xlu0 %v4454_v38, %s4845_s15  ;;  %v4492_v52 = vld [vmem:[%s7700_s0 + $0x339] sm:$0xff] }
 0x39b   :  { %2963 = vrot.lane.b32.xlu1 %v4485_v48, %s4846_s25 }
 0x39c   :  { %v2944_v53 = vpop.permute.xlu0 %2943  ;;  %v3282_v57 = vld [vmem:[#allocation2 + $0x158] sm:$0xff] }
 0x39d   :  { %3027 = vst.msk [vmem:[#allocation2 + $0x160] sm:$0xff] %vm1407_vm7, %v2944_v53  ;;  %v2370_v23 = vpop.permute.xlu1 %2369  ;;  %4747 = vmatmul.mubr.msk.f32.gmra.mrb[10].mxu1 %vm3319_vm9, %v3282_v57  ;;  %v4523_v57 = vld [vmem:[%s7700_s0 + $0x332] sm:$0xff] }
 0x39e   :  { %2451 = vst.msk [vmem:[#allocation2 + $0x170] sm:$0xff] %vm825_vm4, %v2370_v23  ;;  %2199 = vrot.lane.b32.xlu0 %v4454_v38, %s4842_s26 }
 0x39f   :  { %2389 = vrot.lane.b32.xlu1 %v4485_v48, %s4843_s4 }
 0x3a0   :  { %v2946_v8 = vpop.permute.xlu0 %2945 }
 0x3a1   :  { %3028 = vst.msk [vmem:[#allocation2 + $0x168] sm:$0xff] %vm1407_vm7, %v2946_v8  ;;  %v3136_v3 = vpop.permute.xlu1 %3135 }
 0x3a2   :  { %3219 = vst.msk [vmem:[#allocation2 + $0x160] sm:$0xff] %vm1600_vm8, %v3136_v3  ;;  %2965 = vrot.lane.b32.xlu0 %v4486_v1, %s4846_s25  ;;  %v4524_v3 = vld [vmem:[%s7700_s0 + $0x33a] sm:$0xff] }
 0x3a3   :  { %3155 = vrot.lane.b32.xlu1 %v4517_v32, %s4847_s22 }
 0x3a4   :  { %v2372_v9 = vpop.permute.xlu0 %2371 }
 0x3a5   :  { %2452 = vst.msk [vmem:[#allocation2 + $0x178] sm:$0xff] %vm825_vm4, %v2372_v9  ;;  %v2562_v4 = vpop.permute.xlu1 %2561 }
 0x3a6   :  { %2643 = vst.msk [vmem:[#allocation2 + $0x170] sm:$0xff] %vm1018_vm5, %v2562_v4  ;;  %2391 = vrot.lane.b32.xlu0 %v4486_v1, %s4843_s4 }
 0x3a7   :  { %2581 = vrot.lane.b32.xlu1 %v4517_v32, %s4844_s9 }
 0x3a8   :  { %v3138_v30 = vpop.permute.xlu0 %3137 }
 0x3a9   :  { %3220 = vst.msk [vmem:[#allocation2 + $0x168] sm:$0xff] %vm1600_vm8, %v3138_v30  ;;  %v2564_v15 = vpop.permute.xlu1 %2563  ;;  %v3283_v46 = vld [vmem:[#allocation2 + $0x160] sm:$0xff] }
 0x3aa   :  { %2644 = vst.msk [vmem:[#allocation2 + $0x178] sm:$0xff] %vm1018_vm5, %v2564_v15  ;;  %3157 = vrot.lane.b32.xlu0 %v4518_v10, %s4847_s22  ;;  %4749 = vmatprep.mubr.msk.f32.mxu1 %vm3319_vm9, %v3283_v46  ;;  %v4462_v46 = vld [vmem:[%s7700_s0 + $0x350] sm:$0xff] }
 0x3ab   :  { %2583 = vrot.lane.b32.xlu1 %v4518_v10, %s4844_s9  ;;  %v4461_v10 = vld [vmem:[%s7700_s0 + $0x348] sm:$0xff] }
 0x3ac   :  { %v2756_v18 = vpop.permute.xlu0 %2755 }
 0x3ad   :  { %2837 = vst.msk [vmem:[#allocation2 + $0x170] sm:$0xff] %vm1214_vm6, %v2756_v18  ;;  %v2758_v21 = vpop.permute.xlu1 %2757  ;;  %v4493_v18 = vld [vmem:[%s7700_s0 + $0x349] sm:$0xff] }
 0x3ae   :  { %2838 = vst.msk [vmem:[#allocation2 + $0x178] sm:$0xff] %vm1214_vm6, %v2758_v21  ;;  %2775 = vrot.lane.b32.xlu0 %v4455_v11, %s4845_s15 }
 0x3af   :  { %2201 = vrot.lane.b32.xlu1 %v4455_v11, %s4842_s26 }
 0x3b0   :  { %v2948_v29 = vpop.permute.xlu0 %2947  ;;  %v3284_v41 = vld [vmem:[#allocation2 + $0x168] sm:$0xff] }
 0x3b1   :  { %3029 = vst.msk [vmem:[#allocation2 + $0x170] sm:$0xff] %vm1407_vm7, %v2948_v29  ;;  %v2374_v49 = vpop.permute.xlu1 %2373  ;;  %4750 = vmatmul.mubr.msk.f32.gmra.mrb[12].mxu1 %vm3319_vm9, %v3284_v41  ;;  %v4525_v41 = vld [vmem:[%s7700_s0 + $0x34a] sm:$0xff] }
 0x3b2   :  { %2453 = vst.msk [vmem:[#allocation2 + $0x180] sm:$0xff] %vm825_vm4, %v2374_v49  ;;  %2777 = vrot.lane.b32.xlu0 %v4456_v34, %s4845_s15  ;;  %v4526_v49 = vld [vmem:[%s7700_s0 + $0x352] sm:$0xff] }
 0x3b3   :  { %2967 = vrot.lane.b32.xlu1 %v4487_v7, %s4846_s25 }
 0x3b4   :  { %v2950_v42 = vpop.permute.xlu0 %2949 }
 0x3b5   :  { %3030 = vst.msk [vmem:[#allocation2 + $0x178] sm:$0xff] %vm1407_vm7, %v2950_v42  ;;  %v3140_v56 = vpop.permute.xlu1 %3139 }
 0x3b6   :  { %3221 = vst.msk [vmem:[#allocation2 + $0x170] sm:$0xff] %vm1600_vm8, %v3140_v56  ;;  %2203 = vrot.lane.b32.xlu0 %v4456_v34, %s4842_s26  ;;  %v4494_v34 = vld [vmem:[%s7700_s0 + $0x351] sm:$0xff] }
 0x3b7   :  { %2393 = vrot.lane.b32.xlu1 %v4487_v7, %s4843_s4 }
 0x3b8   :  { %v2376_v43 = vpop.permute.xlu0 %2375 }
 0x3b9   :  { %2454 = vst.msk [vmem:[#allocation2 + $0x188] sm:$0xff] %vm825_vm4, %v2376_v43  ;;  %v2566_v50 = vpop.permute.xlu1 %2565 }
 0x3ba   :  { %2645 = vst.msk [vmem:[#allocation2 + $0x180] sm:$0xff] %vm1018_vm5, %v2566_v50  ;;  %2969 = vrot.lane.b32.xlu0 %v4488_v22, %s4846_s25 }
 0x3bb   :  { %3159 = vrot.lane.b32.xlu1 %v4519_v60, %s4847_s22 }
 0x3bc   :  { %v3142_v51 = vpop.permute.xlu0 %3141 }
 0x3bd   :  { %3222 = vst.msk [vmem:[#allocation2 + $0x178] sm:$0xff] %vm1600_vm8, %v3142_v51  ;;  %v2568_v0 = vpop.permute.xlu1 %2567  ;;  %v3285_v58 = vld [vmem:[#allocation2 + $0x170] sm:$0xff] }
 0x3be   :  { %2646 = vst.msk [vmem:[#allocation2 + $0x188] sm:$0xff] %vm1018_vm5, %v2568_v0  ;;  %2395 = vrot.lane.b32.xlu0 %v4488_v22, %s4843_s4  ;;  %4752 = vmatprep.mubr.msk.f32.mxu1 %vm3319_vm9, %v3285_v58 }
 0x3bf   :  { %2585 = vrot.lane.b32.xlu1 %v4519_v60, %s4844_s9 }
 0x3c0   :  { %v2760_v16 = vpop.permute.xlu0 %2759 }
 0x3c1   :  { %2839 = vst.msk [vmem:[#allocation2 + $0x180] sm:$0xff] %vm1214_vm6, %v2760_v16  ;;  %v2186_v13 = vpop.permute.xlu1 %2185 }
 0x3c2   :  { %2263 = vst.msk [vmem:[#allocation2 + $0x190] sm:$0xff] %vm632_vm3, %v2186_v13  ;;  %3161 = vrot.lane.b32.xlu0 %v4520_v45, %s4847_s22  ;;  %v7591_v13 = vld [vmem:[%s7702_s2] ss:$0 sm:$0xff]  ;;  %s4848_s2 = smov [#allocation3]  }
 0x3c3   :  { %2587 = vrot.lane.b32.xlu1 %v4520_v45, %s4844_s9 }
 0x3c4   :  { %v2762_v62 = vpop.permute.xlu0 %2761  ;;  %v3286_v28 = vld [vmem:[#allocation2 + $0x178] sm:$0xff] }
 0x3c5   :  { %2840 = vst.msk [vmem:[#allocation2 + $0x188] sm:$0xff] %vm1214_vm6, %v2762_v62  ;;  %v2952_v19 = vpop.permute.xlu1 %2951  ;;  %4753 = vmatmul.mubr.msk.f32.gmra.mrb[14].mxu1 %vm3319_vm9, %v3286_v28 }
 0x3c6   :  { %3031 = vst.msk [vmem:[#allocation2 + $0x180] sm:$0xff] %vm1407_vm7, %v2952_v19  ;;  %2779 = vrot.lane.b32.xlu0 %v4457_v25, %s4845_s15 }
 0x3c7   :  { %2205 = vrot.lane.b32.xlu1 %v4457_v25, %s4842_s26 }
 0x3c8   :  { %v2188_v24 = vpop.permute.xlu0 %2187 }
 0x3c9   :  { %2264 = vst.msk [vmem:[#allocation2 + $0x198] sm:$0xff] %vm632_vm3, %v2188_v24  ;;  %v2378_v26 = vpop.permute.xlu1 %2377 }
 0x3ca   :  { %2455 = vst.msk [vmem:[#allocation2 + $0x190] sm:$0xff] %vm825_vm4, %v2378_v26  ;;  %2781 = vrot.lane.b32.xlu0 %v4458_v39, %s4845_s15 }
 0x3cb   :  { %2971 = vrot.lane.b32.xlu1 %v4489_v44, %s4846_s25 }
 0x3cc   :  { %v2954_v2 = vpop.permute.xlu0 %2953 }
 0x3cd   :  { %3032 = vst.msk [vmem:[#allocation2 + $0x188] sm:$0xff] %vm1407_vm7, %v2954_v2  ;;  %v3144_v61 = vpop.permute.xlu1 %3143 }
 0x3ce   :  { %3223 = vst.msk [vmem:[#allocation2 + $0x180] sm:$0xff] %vm1600_vm8, %v3144_v61  ;;  %2207 = vrot.lane.b32.xlu0 %v4458_v39, %s4842_s26 }
 0x3cf   :  { %2397 = vrot.lane.b32.xlu1 %v4489_v44, %s4843_s4 }
 0x3d0   :  { %v2380_v54 = vpop.permute.xlu0 %2379 }
 0x3d1   :  { %2456 = vst.msk [vmem:[#allocation2 + $0x198] sm:$0xff] %vm825_vm4, %v2380_v54  ;;  %v2570_v63 = vpop.permute.xlu1 %2569 }
 0x3d2   :  { %2647 = vst.msk [vmem:[#allocation2 + $0x190] sm:$0xff] %vm1018_vm5, %v2570_v63  ;;  %2973 = vrot.lane.b32.xlu0 %v4490_v17, %s4846_s25 }
 0x3d3   :  { %3163 = vrot.lane.b32.xlu1 %v4521_v47, %s4847_s22 }
 0x3d4   :  { %v3146_v14 = vpop.permute.xlu0 %3145 }
 0x3d5   :  { %3224 = vst.msk [vmem:[#allocation2 + $0x188] sm:$0xff] %vm1600_vm8, %v3146_v14  ;;  %v2572_v5 = vpop.permute.xlu1 %2571  ;;  %v3287_v27 = vld [vmem:[#allocation2 + $0x180] sm:$0xff] }
 0x3d6   :  { %2648 = vst.msk [vmem:[#allocation2 + $0x198] sm:$0xff] %vm1018_vm5, %v2572_v5  ;;  %2399 = vrot.lane.b32.xlu0 %v4490_v17, %s4843_s4  ;;  %4755 = vmatprep.mubr.msk.f32.mxu1 %vm3319_vm9, %v3287_v27 }
 0x3d7   :  { %2589 = vrot.lane.b32.xlu1 %v4521_v47, %s4844_s9 }
 0x3d8   :  { %v2764_v35 = vpop.permute.xlu0 %2763 }
 0x3d9   :  { %2841 = vst.msk [vmem:[#allocation2 + $0x190] sm:$0xff] %vm1214_vm6, %v2764_v35  ;;  %v2190_v6 = vpop.permute.xlu1 %2189 }
 0x3da   :  { %2265 = vst.msk [vmem:[#allocation2 + $0x1a0] sm:$0xff] %vm632_vm3, %v2190_v6  ;;  %3165 = vrot.lane.b32.xlu0 %v4522_v31, %s4847_s22 }
 0x3db   :  { %2591 = vrot.lane.b32.xlu1 %v4522_v31, %s4844_s9 }
 0x3dc   :  { %v2766_v33 = vpop.permute.xlu0 %2765  ;;  %v3288_v20 = vld [vmem:[#allocation2 + $0x188] sm:$0xff] }
 0x3dd   :  { %2842 = vst.msk [vmem:[#allocation2 + $0x198] sm:$0xff] %vm1214_vm6, %v2766_v33  ;;  %v2956_v36 = vpop.permute.xlu1 %2955  ;;  %4756 = vmatmul.mubr.msk.f32.gmra.mrb[16].mxu1 %vm3319_vm9, %v3288_v20 }
 0x3de   :  { %3033 = vst.msk [vmem:[#allocation2 + $0x190] sm:$0xff] %vm1407_vm7, %v2956_v36  ;;  %2783 = vrot.lane.b32.xlu0 %v4459_v12, %s4845_s15 }
 0x3df   :  { %2209 = vrot.lane.b32.xlu1 %v4459_v12, %s4842_s26 }
 0x3e0   :  { %v2192_v37 = vpop.permute.xlu0 %2191 }
 0x3e1   :  { %2266 = vst.msk [vmem:[#allocation2 + $0x1a8] sm:$0xff] %vm632_vm3, %v2192_v37  ;;  %v2382_v38 = vpop.permute.xlu1 %2381 }
 0x3e2   :  { %2457 = vst.msk [vmem:[#allocation2 + $0x1a0] sm:$0xff] %vm825_vm4, %v2382_v38  ;;  %2785 = vrot.lane.b32.xlu0 %v4460_v55, %s4845_s15 }
 0x3e3   :  { %2975 = vrot.lane.b32.xlu1 %v4491_v59, %s4846_s25 }
 0x3e4   :  { %v2958_v40 = vpop.permute.xlu0 %2957 }
 0x3e5   :  { %3034 = vst.msk [vmem:[#allocation2 + $0x198] sm:$0xff] %vm1407_vm7, %v2958_v40  ;;  %v3148_v48 = vpop.permute.xlu1 %3147 }
 0x3e6   :  { %3225 = vst.msk [vmem:[#allocation2 + $0x190] sm:$0xff] %vm1600_vm8, %v3148_v48  ;;  %2211 = vrot.lane.b32.xlu0 %v4460_v55, %s4842_s26 }
 0x3e7   :  { %2401 = vrot.lane.b32.xlu1 %v4491_v59, %s4843_s4 }
 0x3e8   :  { %v2384_v53 = vpop.permute.xlu0 %2383 }
 0x3e9   :  { %2458 = vst.msk [vmem:[#allocation2 + $0x1a8] sm:$0xff] %vm825_vm4, %v2384_v53  ;;  %v2574_v23 = vpop.permute.xlu1 %2573 }
 0x3ea   :  { %2649 = vst.msk [vmem:[#allocation2 + $0x1a0] sm:$0xff] %vm1018_vm5, %v2574_v23  ;;  %2977 = vrot.lane.b32.xlu0 %v4492_v52, %s4846_s25 }
 0x3eb   :  { %3167 = vrot.lane.b32.xlu1 %v4523_v57, %s4847_s22 }
 0x3ec   :  { %v3150_v1 = vpop.permute.xlu0 %3149 }
 0x3ed   :  { %3226 = vst.msk [vmem:[#allocation2 + $0x198] sm:$0xff] %vm1600_vm8, %v3150_v1  ;;  %v2576_v8 = vpop.permute.xlu1 %2575  ;;  %v3289_v32 = vld [vmem:[#allocation2 + $0x190] sm:$0xff] }
 0x3ee   :  { %2650 = vst.msk [vmem:[#allocation2 + $0x1a8] sm:$0xff] %vm1018_vm5, %v2576_v8  ;;  %2403 = vrot.lane.b32.xlu0 %v4492_v52, %s4843_s4  ;;  %4758 = vmatprep.mubr.msk.f32.mxu1 %vm3319_vm9, %v3289_v32 }
 0x3ef   :  { %2593 = vrot.lane.b32.xlu1 %v4523_v57, %s4844_s9 }
 0x3f0   :  { %v2768_v9 = vpop.permute.xlu0 %2767 }
 0x3f1   :  { %2843 = vst.msk [vmem:[#allocation2 + $0x1a0] sm:$0xff] %vm1214_vm6, %v2768_v9  ;;  %v2194_v4 = vpop.permute.xlu1 %2193 }
 0x3f2   :  { %2267 = vst.msk [vmem:[#allocation2 + $0x1b0] sm:$0xff] %vm632_vm3, %v2194_v4  ;;  %3169 = vrot.lane.b32.xlu0 %v4524_v3, %s4847_s22 }
 0x3f3   :  { %2595 = vrot.lane.b32.xlu1 %v4524_v3, %s4844_s9 }
 0x3f4   :  { %v2770_v30 = vpop.permute.xlu0 %2769  ;;  %v3290_v15 = vld [vmem:[#allocation2 + $0x198] sm:$0xff] }
 0x3f5   :  { %2844 = vst.msk [vmem:[#allocation2 + $0x1a8] sm:$0xff] %vm1214_vm6, %v2770_v30  ;;  %v2960_v11 = vpop.permute.xlu1 %2959  ;;  %4759 = vmatmul.mubr.msk.f32.gmra.mrb[18].mxu1 %vm3319_vm9, %v3290_v15 }
 0x3f6   :  { %3035 = vst.msk [vmem:[#allocation2 + $0x1a0] sm:$0xff] %vm1407_vm7, %v2960_v11  ;;  %2787 = vrot.lane.b32.xlu0 %v4461_v10, %s4845_s15 }
 0x3f7   :  { %2789 = vrot.lane.b32.xlu1 %v4462_v46, %s4845_s15 }
 0x3f8   :  { %v2196_v21 = vpop.permute.xlu0 %2195 }
 0x3f9   :  { %2268 = vst.msk [vmem:[#allocation2 + $0x1b8] sm:$0xff] %vm632_vm3, %v2196_v21  ;;  %v2386_v29 = vpop.permute.xlu1 %2385 }
 0x3fa   :  { %2459 = vst.msk [vmem:[#allocation2 + $0x1b0] sm:$0xff] %vm825_vm4, %v2386_v29  ;;  %2979 = vrot.lane.b32.xlu0 %v4493_v18, %s4846_s25 }
 0x3fb   :  { %2981 = vrot.lane.b32.xlu1 %v4494_v34, %s4846_s25 }
 0x3fc   :  { %v2962_v7 = vpop.permute.xlu0 %2961 }
 0x3fd   :  { %3036 = vst.msk [vmem:[#allocation2 + $0x1a8] sm:$0xff] %vm1407_vm7, %v2962_v7  ;;  %v3152_v42 = vpop.permute.xlu1 %3151 }
 0x3fe   :  { %3227 = vst.msk [vmem:[#allocation2 + $0x1a0] sm:$0xff] %vm1600_vm8, %v3152_v42  ;;  %3171 = vrot.lane.b32.xlu0 %v4525_v41, %s4847_s22 }
 0x3ff   :  { %3173 = vrot.lane.b32.xlu1 %v4526_v49, %s4847_s22  ;;  %s4031_s22 = sshll.u32 %s4848_s2, 4  ;;  %s4032_s22 = int_to_ptr.vmem [resolvable:$true] %s4031_s22 }
 0x400   :  { %v2388_v56 = vpop.permute.xlu0 %2387  ;;  %s4816_s18 = scalar_lea.vmem %s4032_s22, 8192  ;;  %p4821_p1 = scmp.lt.s32.totalorder %s4032_s22, %s4032_s22 }
 0x401   :  { %2460 = vst.msk [vmem:[#allocation2 + $0x1b8] sm:$0xff] %vm825_vm4, %v2388_v56  ;;  %v2578_v22 = vpop.permute.xlu1 %2577  ;;  %p4817_p0 = scmp.ne.s32.totalorder %s4032_s22, %s4816_s18  ;;  %p4822_p2 = scmp.lt.s32.totalorder %s4816_s18, %s4816_s18 }
 0x402   :  { %2651 = vst.msk [vmem:[#allocation2 + $0x1b0] sm:$0xff] %vm1018_vm5, %v2578_v22 }
 0x403   :  { %p4823_p3 = por %p4822_p2, %p4821_p1 }
 0x404   :  { %v3154_v43 = vpop.permute.xlu0 %3153 }
 0x405   :  { %3228 = vst.msk [vmem:[#allocation2 + $0x1a8] sm:$0xff] %vm1600_vm8, %v3154_v43  ;;  %v2580_v60 = vpop.permute.xlu1 %2579  ;;  %v3291_v50 = vld [vmem:[#allocation2 + $0x1a0] sm:$0xff]  ;;  %p4824_p4 = pnand %p4823_p3, %p4817_p0 }
 0x406   :  { %2652 = vst.msk [vmem:[#allocation2 + $0x1b8] sm:$0xff] %vm1018_vm5, %v2580_v60  ;;  %4761 = vmatprep.mubr.msk.f32.mxu1 %vm3319_vm9, %v3291_v50 }
 0x408   :  { %v2772_v51 = vpop.permute.xlu0 %2771 }
 0x409   :  { %2845 = vst.msk [vmem:[#allocation2 + $0x1b0] sm:$0xff] %vm1214_vm6, %v2772_v51  ;;  %v2198_v0 = vpop.permute.xlu1 %2197 }
 0x40a   :  { %2269 = vst.msk [vmem:[#allocation2 + $0x1c0] sm:$0xff] %vm632_vm3, %v2198_v0 }
 0x40c   :  { %v2774_v58 = vpop.permute.xlu0 %2773  ;;  %v4733_v45 = vpop.f32.mrb[0].mxu1  ;;  %v3292_v16 = vld [vmem:[#allocation2 + $0x1a8] sm:$0xff] }
 0x40d   :  { %2846 = vst.msk [vmem:[#allocation2 + $0x1b8] sm:$0xff] %vm1214_vm6, %v2774_v58  ;;  %v3744_v25 = vadd.f32 %v7591_v13, %v4733_v45  ;;  %v2964_v62 = vpop.permute.xlu1 %2963  ;;  %v3738_v28 = vpop.f32.mrb[1].mxu1  ;;  %4762 = vmatmul.mubr.msk.f32.gmra.mrb[20].mxu1 %vm3319_vm9, %v3292_v16 }
 0x40e   :  { %3037 = vst.msk [vmem:[#allocation2 + $0x1b0] sm:$0xff] %vm1407_vm7, %v2964_v62  ;;  %v3739_v19 = vadd.f32 %v7591_v13, %v3738_v28 }
 0x40f   :  { %v3930_v39 = vmax.f32 %v3744_v25, 0.0 }
 0x410   :  { %v3929_v24 = vmax.f32 %v3739_v19, 0.0  ;;  %v2200_v44 = vpop.permute.xlu0 %2199 }
 0x411   :  { %3995 = vst [vmem:[#allocation3 + $0x108] sm:$0xff] %v3930_v39  ;;  %2270 = vst.msk [vmem:[#allocation2 + $0x1c8] sm:$0xff] %vm632_vm3, %v2200_v44  ;;  %v2390_v26 = vpop.permute.xlu1 %2389 }
 0x412   :  { %3994 = vst [vmem:[#allocation3 + $0x100] sm:$0xff] %v3929_v24  ;;  %2461 = vst.msk [vmem:[#allocation2 + $0x1c0] sm:$0xff] %vm825_vm4, %v2390_v26 }
 0x414   :  { %v2966_v2 = vpop.permute.xlu0 %2965 }
 0x415   :  { %3038 = vst.msk [vmem:[#allocation2 + $0x1b8] sm:$0xff] %vm1407_vm7, %v2966_v2  ;;  %v3156_v61 = vpop.permute.xlu1 %3155 }
 0x416   :  { %3229 = vst.msk [vmem:[#allocation2 + $0x1b0] sm:$0xff] %vm1600_vm8, %v3156_v61 }
 0x418   :  { %v2392_v17 = vpop.permute.xlu0 %2391 }
 0x419   :  { %2462 = vst.msk [vmem:[#allocation2 + $0x1c8] sm:$0xff] %vm825_vm4, %v2392_v17  ;;  %v2582_v54 = vpop.permute.xlu1 %2581 }
 0x41a   :  { %2653 = vst.msk [vmem:[#allocation2 + $0x1c0] sm:$0xff] %vm1018_vm5, %v2582_v54 }
 0x41c   :  { %v3158_v47 = vpop.permute.xlu0 %3157 }
 0x41d   :  { %3230 = vst.msk [vmem:[#allocation2 + $0x1b8] sm:$0xff] %vm1600_vm8, %v3158_v47  ;;  %v2584_v63 = vpop.permute.xlu1 %2583  ;;  %v3293_v14 = vld [vmem:[#allocation2 + $0x1b0] sm:$0xff] }
 0x41e   :  { %2654 = vst.msk [vmem:[#allocation2 + $0x1c8] sm:$0xff] %vm1018_vm5, %v2584_v63  ;;  %4764 = vmatprep.mubr.msk.f32.mxu1 %vm3319_vm9, %v3293_v14 }
 0x420   :  { %v2776_v5 = vpop.permute.xlu0 %2775  ;;  %v4736_v27 = vpop.f32.mrb[2].mxu1 }
 0x421   :  { %2847 = vst.msk [vmem:[#allocation2 + $0x1c0] sm:$0xff] %vm1214_vm6, %v2776_v5  ;;  %v3754_v31 = vadd.f32 %v7591_v13, %v4736_v27  ;;  %v2202_v35 = vpop.permute.xlu1 %2201  ;;  %v3748_v6 = vpop.f32.mrb[3].mxu1 }
 0x422   :  { %2271 = vst.msk [vmem:[#allocation2 + $0x1d0] sm:$0xff] %vm632_vm3, %v2202_v35  ;;  %v3749_v12 = vadd.f32 %v7591_v13, %v3748_v6 }
 0x423   :  { %v3932_v33 = vmax.f32 %v3754_v31, 0.0 }
 0x424   :  { %v3931_v20 = vmax.f32 %v3749_v12, 0.0  ;;  %v2778_v36 = vpop.permute.xlu0 %2777  ;;  %v3294_v55 = vld [vmem:[#allocation2 + $0x1b8] sm:$0xff] }
 0x425   :  { %3997 = vst [vmem:[#allocation3 + $0x118] sm:$0xff] %v3932_v33  ;;  %2848 = vst.msk [vmem:[#allocation2 + $0x1c8] sm:$0xff] %vm1214_vm6, %v2778_v36  ;;  %v2968_v37 = vpop.permute.xlu1 %2967  ;;  %4765 = vmatmul.mubr.msk.f32.gmra.mrb[22].mxu1 %vm3319_vm9, %v3294_v55 }
 0x426   :  { %3996 = vst [vmem:[#allocation3 + $0x110] sm:$0xff] %v3931_v20  ;;  %3039 = vst.msk [vmem:[#allocation2 + $0x1c0] sm:$0xff] %vm1407_vm7, %v2968_v37 }
 0x428   :  { %v2204_v59 = vpop.permute.xlu0 %2203 }
 0x429   :  { %2272 = vst.msk [vmem:[#allocation2 + $0x1d8] sm:$0xff] %vm632_vm3, %v2204_v59  ;;  %v2394_v38 = vpop.permute.xlu1 %2393 }
 0x42a   :  { %2463 = vst.msk [vmem:[#allocation2 + $0x1d0] sm:$0xff] %vm825_vm4, %v2394_v38 }
 0x42c   :  { %v2970_v40 = vpop.permute.xlu0 %2969 }
 0x42d   :  { %3040 = vst.msk [vmem:[#allocation2 + $0x1c8] sm:$0xff] %vm1407_vm7, %v2970_v40  ;;  %v3160_v48 = vpop.permute.xlu1 %3159 }
 0x42e   :  { %3231 = vst.msk [vmem:[#allocation2 + $0x1c0] sm:$0xff] %vm1600_vm8, %v3160_v48 }
 0x430   :  { %v2396_v52 = vpop.permute.xlu0 %2395 }
 0x431   :  { %2464 = vst.msk [vmem:[#allocation2 + $0x1d8] sm:$0xff] %vm825_vm4, %v2396_v52  ;;  %v2586_v53 = vpop.permute.xlu1 %2585 }
 0x432   :  { %2655 = vst.msk [vmem:[#allocation2 + $0x1d0] sm:$0xff] %vm1018_vm5, %v2586_v53 }
 0x434   :  { %v3162_v57 = vpop.permute.xlu0 %3161  ;;  %v4739_v23 = vpop.f32.mrb[4].mxu1 }
 0x435   :  { %3232 = vst.msk [vmem:[#allocation2 + $0x1c8] sm:$0xff] %vm1600_vm8, %v3162_v57  ;;  %v3764_v1 = vadd.f32 %v7591_v13, %v4739_v23  ;;  %v2588_v8 = vpop.permute.xlu1 %2587  ;;  %v3758_v32 = vpop.f32.mrb[5].mxu1  ;;  %v3295_v3 = vld [vmem:[#allocation2 + $0x1c0] sm:$0xff] }
 0x436   :  { %2656 = vst.msk [vmem:[#allocation2 + $0x1d8] sm:$0xff] %vm1018_vm5, %v2588_v8  ;;  %v3759_v9 = vadd.f32 %v7591_v13, %v3758_v32  ;;  %4767 = vmatprep.mubr.msk.f32.mxu1 %vm3319_vm9, %v3295_v3 }
 0x437   :  { %v3934_v4 = vmax.f32 %v3764_v1, 0.0 }
 0x438   :  { %v3933_v10 = vmax.f32 %v3759_v9, 0.0  ;;  %v2780_v30 = vpop.permute.xlu0 %2779 }
 0x439   :  { %3999 = vst [vmem:[#allocation3 + $0x128] sm:$0xff] %v3934_v4  ;;  %2849 = vst.msk [vmem:[#allocation2 + $0x1d0] sm:$0xff] %vm1214_vm6, %v2780_v30  ;;  %v2206_v15 = vpop.permute.xlu1 %2205 }
 0x43a   :  { %3998 = vst [vmem:[#allocation3 + $0x120] sm:$0xff] %v3933_v10  ;;  %2273 = vst.msk [vmem:[#allocation2 + $0x1e0] sm:$0xff] %vm632_vm3, %v2206_v15 }
 0x43c   :  { %v2782_v46 = vpop.permute.xlu0 %2781  ;;  %v3296_v11 = vld [vmem:[#allocation2 + $0x1c8] sm:$0xff] }
 0x43d   :  { %2850 = vst.msk [vmem:[#allocation2 + $0x1d8] sm:$0xff] %vm1214_vm6, %v2782_v46  ;;  %v2972_v18 = vpop.permute.xlu1 %2971  ;;  %4768 = vmatmul.mubr.msk.f32.gmra.mrb[24].mxu1 %vm3319_vm9, %v3296_v11 }
 0x43e   :  { %3041 = vst.msk [vmem:[#allocation2 + $0x1d0] sm:$0xff] %vm1407_vm7, %v2972_v18 }
 0x440   :  { %v2208_v21 = vpop.permute.xlu0 %2207 }
 0x441   :  { %2274 = vst.msk [vmem:[#allocation2 + $0x1e8] sm:$0xff] %vm632_vm3, %v2208_v21  ;;  %v2398_v34 = vpop.permute.xlu1 %2397 }
 0x442   :  { %2465 = vst.msk [vmem:[#allocation2 + $0x1e0] sm:$0xff] %vm825_vm4, %v2398_v34 }
 0x444   :  { %v2974_v29 = vpop.permute.xlu0 %2973 }
 0x445   :  { %3042 = vst.msk [vmem:[#allocation2 + $0x1d8] sm:$0xff] %vm1407_vm7, %v2974_v29  ;;  %v3164_v41 = vpop.permute.xlu1 %3163 }
 0x446   :  { %3233 = vst.msk [vmem:[#allocation2 + $0x1d0] sm:$0xff] %vm1600_vm8, %v3164_v41 }
 0x448   :  { %v2400_v7 = vpop.permute.xlu0 %2399  ;;  %v4742_v49 = vpop.f32.mrb[6].mxu1 }
 0x449   :  { %2466 = vst.msk [vmem:[#allocation2 + $0x1e8] sm:$0xff] %vm825_vm4, %v2400_v7  ;;  %v3774_v42 = vadd.f32 %v7591_v13, %v4742_v49  ;;  %v2590_v56 = vpop.permute.xlu1 %2589  ;;  %v3768_v22 = vpop.f32.mrb[7].mxu1 }
 0x44a   :  { %2657 = vst.msk [vmem:[#allocation2 + $0x1e0] sm:$0xff] %vm1018_vm5, %v2590_v56  ;;  %v3769_v43 = vadd.f32 %v7591_v13, %v3768_v22 }
 0x44b   :  { %v3936_v60 = vmax.f32 %v3774_v42, 0.0 }
 0x44c   :  { %v3935_v50 = vmax.f32 %v3769_v43, 0.0  ;;  %v3166_v51 = vpop.permute.xlu0 %3165 }
 0x44d   :  { %4001 = vst [vmem:[#allocation3 + $0x138] sm:$0xff] %v3936_v60  ;;  %3234 = vst.msk [vmem:[#allocation2 + $0x1d8] sm:$0xff] %vm1600_vm8, %v3166_v51  ;;  %v2592_v0 = vpop.permute.xlu1 %2591  ;;  %v3297_v58 = vld [vmem:[#allocation2 + $0x1d0] sm:$0xff] }
 0x44e   :  { %4000 = vst [vmem:[#allocation3 + $0x130] sm:$0xff] %v3935_v50  ;;  %2658 = vst.msk [vmem:[#allocation2 + $0x1e8] sm:$0xff] %vm1018_vm5, %v2592_v0  ;;  %4770 = vmatprep.mubr.msk.f32.mxu1 %vm3319_vm9, %v3297_v58 }
 0x450   :  { %v2784_v45 = vpop.permute.xlu0 %2783 }
 0x451   :  { %2851 = vst.msk [vmem:[#allocation2 + $0x1e0] sm:$0xff] %vm1214_vm6, %v2784_v45  ;;  %v2210_v16 = vpop.permute.xlu1 %2209 }
 0x452   :  { %2275 = vst.msk [vmem:[#allocation2 + $0x1f0] sm:$0xff] %vm632_vm3, %v2210_v16 }
 0x454   :  { %v2786_v25 = vpop.permute.xlu0 %2785  ;;  %v3298_v62 = vld [vmem:[#allocation2 + $0x1d8] sm:$0xff] }
 0x455   :  { %2852 = vst.msk [vmem:[#allocation2 + $0x1e8] sm:$0xff] %vm1214_vm6, %v2786_v25  ;;  %v2976_v28 = vpop.permute.xlu1 %2975  ;;  %4771 = vmatmul.mubr.msk.f32.gmra.mrb[26].mxu1 %vm3319_vm9, %v3298_v62 }
 0x456   :  { %3043 = vst.msk [vmem:[#allocation2 + $0x1e0] sm:$0xff] %vm1407_vm7, %v2976_v28 }
 0x458   :  { %v2212_v19 = vpop.permute.xlu0 %2211 }
 0x459   :  { %2276 = vst.msk [vmem:[#allocation2 + $0x1f8] sm:$0xff] %vm632_vm3, %v2212_v19  ;;  %v2402_v39 = vpop.permute.xlu1 %2401 }
 0x45a   :  { %2467 = vst.msk [vmem:[#allocation2 + $0x1f0] sm:$0xff] %vm825_vm4, %v2402_v39 }
 0x45c   :  { %v2978_v24 = vpop.permute.xlu0 %2977  ;;  %v4745_v44 = vpop.f32.mrb[8].mxu1 }
 0x45d   :  { %3044 = vst.msk [vmem:[#allocation2 + $0x1e8] sm:$0xff] %vm1407_vm7, %v2978_v24  ;;  %v3784_v26 = vadd.f32 %v7591_v13, %v4745_v44  ;;  %v3168_v2 = vpop.permute.xlu1 %3167  ;;  %v3778_v61 = vpop.f32.mrb[9].mxu1 }
 0x45e   :  { %3235 = vst.msk [vmem:[#allocation2 + $0x1e0] sm:$0xff] %vm1600_vm8, %v3168_v2  ;;  %v3779_v17 = vadd.f32 %v7591_v13, %v3778_v61 }
 0x45f   :  { %v3938_v54 = vmax.f32 %v3784_v26, 0.0 }
 0x460   :  { %v3937_v47 = vmax.f32 %v3779_v17, 0.0  ;;  %v2404_v63 = vpop.permute.xlu0 %2403 }
 0x461   :  { %4003 = vst [vmem:[#allocation3 + $0x148] sm:$0xff] %v3938_v54  ;;  %2468 = vst.msk [vmem:[#allocation2 + $0x1f8] sm:$0xff] %vm825_vm4, %v2404_v63  ;;  %v2594_v14 = vpop.permute.xlu1 %2593 }
 0x462   :  { %4002 = vst [vmem:[#allocation3 + $0x140] sm:$0xff] %v3937_v47  ;;  %2659 = vst.msk [vmem:[#allocation2 + $0x1f0] sm:$0xff] %vm1018_vm5, %v2594_v14 }
 0x464   :  { %v3170_v5 = vpop.permute.xlu0 %3169 }
 0x465   :  { %3236 = vst.msk [vmem:[#allocation2 + $0x1e8] sm:$0xff] %vm1600_vm8, %v3170_v5  ;;  %v2596_v27 = vpop.permute.xlu1 %2595  ;;  %v3299_v31 = vld [vmem:[#allocation2 + $0x1e0] sm:$0xff] }
 0x466   :  { %2660 = vst.msk [vmem:[#allocation2 + $0x1f8] sm:$0xff] %vm1018_vm5, %v2596_v27  ;;  %4773 = vmatprep.mubr.msk.f32.mxu1 %vm3319_vm9, %v3299_v31 }
 0x468   :  { %v2788_v35 = vpop.permute.xlu0 %2787 }
 0x469   :  { %2853 = vst.msk [vmem:[#allocation2 + $0x1f0] sm:$0xff] %vm1214_vm6, %v2788_v35  ;;  %v2790_v6 = vpop.permute.xlu1 %2789 }
 0x46a   :  { %2854 = vst.msk [vmem:[#allocation2 + $0x1f8] sm:$0xff] %vm1214_vm6, %v2790_v6 }
 0x46c   :  { %v2980_v12 = vpop.permute.xlu0 %2979  ;;  %v3300_v33 = vld [vmem:[#allocation2 + $0x1e8] sm:$0xff] }
 0x46d   :  { %3045 = vst.msk [vmem:[#allocation2 + $0x1f0] sm:$0xff] %vm1407_vm7, %v2980_v12  ;;  %v2982_v20 = vpop.permute.xlu1 %2981  ;;  %4774 = vmatmul.mubr.msk.f32.gmra.mrb[28].mxu1 %vm3319_vm9, %v3300_v33 }
 0x46e   :  { %3046 = vst.msk [vmem:[#allocation2 + $0x1f8] sm:$0xff] %vm1407_vm7, %v2982_v20 }
 0x470   :  { %v3172_v36 = vpop.permute.xlu0 %3171  ;;  %v4748_v55 = vpop.f32.mrb[10].mxu1 }
 0x471   :  { %3237 = vst.msk [vmem:[#allocation2 + $0x1f0] sm:$0xff] %vm1600_vm8, %v3172_v36  ;;  %v3794_v37 = vadd.f32 %v7591_v13, %v4748_v55  ;;  %v3174_v59 = vpop.permute.xlu1 %3173  ;;  %v3788_v38 = vpop.f32.mrb[11].mxu1 }
 0x472   :  { %3238 = vst.msk [vmem:[#allocation2 + $0x1f8] sm:$0xff] %vm1600_vm8, %v3174_v59  ;;  %v3789_v40 = vadd.f32 %v7591_v13, %v3788_v38 }
 0x473   :  { %v3940_v48 = vmax.f32 %v3794_v37, 0.0 }
 0x474   :  { %v3939_v52 = vmax.f32 %v3789_v40, 0.0 }
 0x475   :  { %4005 = vst [vmem:[#allocation3 + $0x158] sm:$0xff] %v3940_v48 }
 0x476   :  { %4004 = vst [vmem:[#allocation3 + $0x150] sm:$0xff] %v3939_v52 }
 0x478   :  { %v3301_v53 = vld [vmem:[#allocation2 + $0x1f0] sm:$0xff] }
 0x479   :  { %4776 = vmatprep.mubr.msk.f32.mxu1 %vm3319_vm9, %v3301_v53  ;;  %v3302_v57 = vld [vmem:[#allocation2 + $0x1f8] sm:$0xff] }
 0x47a   :  { %4777 = vmatmul.mubr.msk.f32.gmra.mrb[30].mxu1 %vm3319_vm9, %v3302_v57 }
 0x484   :  { %v4751_v23 = vpop.f32.mrb[12].mxu1 }
 0x485   :  { %v3804_v1 = vadd.f32 %v7591_v13, %v4751_v23  ;;  %v3798_v8 = vpop.f32.mrb[13].mxu1 }
 0x486   :  { %v3799_v32 = vadd.f32 %v7591_v13, %v3798_v8 }
 0x487   :  { %v3942_v3 = vmax.f32 %v3804_v1, 0.0 }
 0x488   :  { %v3941_v9 = vmax.f32 %v3799_v32, 0.0 }
 0x489   :  { %4007 = vst [vmem:[#allocation3 + $0x168] sm:$0xff] %v3942_v3 }
 0x48a   :  { %4006 = vst [vmem:[#allocation3 + $0x160] sm:$0xff] %v3941_v9 }
 0x498   :  { %v4754_v4 = vpop.f32.mrb[14].mxu1 }
 0x499   :  { %v3814_v10 = vadd.f32 %v7591_v13, %v4754_v4  ;;  %v3808_v30 = vpop.f32.mrb[15].mxu1 }
 0x49a   :  { %v3809_v15 = vadd.f32 %v7591_v13, %v3808_v30 }
 0x49b   :  { %v3944_v46 = vmax.f32 %v3814_v10, 0.0 }
 0x49c   :  { %v3943_v11 = vmax.f32 %v3809_v15, 0.0 }
 0x49d   :  { %4009 = vst [vmem:[#allocation3 + $0x178] sm:$0xff] %v3944_v46 }
 0x49e   :  { %4008 = vst [vmem:[#allocation3 + $0x170] sm:$0xff] %v3943_v11 }
 0x4b0   :  { %v4757_v18 = vpop.f32.mrb[16].mxu1 }
 0x4b1   :  { %v3824_v21 = vadd.f32 %v7591_v13, %v4757_v18  ;;  %v3818_v34 = vpop.f32.mrb[17].mxu1 }
 0x4b2   :  { %v3819_v29 = vadd.f32 %v7591_v13, %v3818_v34 }
 0x4b3   :  { %v3946_v41 = vmax.f32 %v3824_v21, 0.0 }
 0x4b4   :  { %v3945_v7 = vmax.f32 %v3819_v29, 0.0 }
 0x4b5   :  { %4011 = vst [vmem:[#allocation3 + $0x188] sm:$0xff] %v3946_v41 }
 0x4b6   :  { %4010 = vst [vmem:[#allocation3 + $0x180] sm:$0xff] %v3945_v7 }
 0x4c8   :  { %v4760_v49 = vpop.f32.mrb[18].mxu1 }
 0x4c9   :  { %v3834_v42 = vadd.f32 %v7591_v13, %v4760_v49  ;;  %v3828_v56 = vpop.f32.mrb[19].mxu1 }
 0x4ca   :  { %v3829_v22 = vadd.f32 %v7591_v13, %v3828_v56 }
 0x4cb   :  { %v3948_v43 = vmax.f32 %v3834_v42, 0.0 }
 0x4cc   :  { %v3947_v60 = vmax.f32 %v3829_v22, 0.0 }
 0x4cd   :  { %4013 = vst [vmem:[#allocation3 + $0x198] sm:$0xff] %v3948_v43 }
 0x4ce   :  { %4012 = vst [vmem:[#allocation3 + $0x190] sm:$0xff] %v3947_v60 }
 0x4e0   :  { %v4763_v50 = vpop.f32.mrb[20].mxu1 }
 0x4e1   :  { %v3844_v51 = vadd.f32 %v7591_v13, %v4763_v50  ;;  %v3838_v0 = vpop.f32.mrb[21].mxu1 }
 0x4e2   :  { %v3839_v58 = vadd.f32 %v7591_v13, %v3838_v0 }
 0x4e3   :  { %v3950_v45 = vmax.f32 %v3844_v51, 0.0 }
 0x4e4   :  { %v3949_v16 = vmax.f32 %v3839_v58, 0.0 }
 0x4e5   :  { %4015 = vst [vmem:[#allocation3 + $0x1a8] sm:$0xff] %v3950_v45 }
 0x4e6   :  { %4014 = vst [vmem:[#allocation3 + $0x1a0] sm:$0xff] %v3949_v16 }
 0x4f8   :  { %v4766_v25 = vpop.f32.mrb[22].mxu1 }
 0x4f9   :  { %v3854_v62 = vadd.f32 %v7591_v13, %v4766_v25  ;;  %v3848_v28 = vpop.f32.mrb[23].mxu1 }
 0x4fa   :  { %v3849_v19 = vadd.f32 %v7591_v13, %v3848_v28 }
 0x4fb   :  { %v3952_v39 = vmax.f32 %v3854_v62, 0.0 }
 0x4fc   :  { %v3951_v24 = vmax.f32 %v3849_v19, 0.0 }
 0x4fd   :  { %4017 = vst [vmem:[#allocation3 + $0x1b8] sm:$0xff] %v3952_v39 }
 0x4fe   :  { %4016 = vst [vmem:[#allocation3 + $0x1b0] sm:$0xff] %v3951_v24 }
 0x510   :  { %v4769_v44 = vpop.f32.mrb[24].mxu1 }
 0x511   :  { %v3864_v26 = vadd.f32 %v7591_v13, %v4769_v44  ;;  %v3858_v2 = vpop.f32.mrb[25].mxu1 }
 0x512   :  { %v3859_v61 = vadd.f32 %v7591_v13, %v3858_v2 }
 0x513   :  { %v3954_v17 = vmax.f32 %v3864_v26, 0.0 }
 0x514   :  { %v3953_v54 = vmax.f32 %v3859_v61, 0.0 }
 0x515   :  { %4019 = vst [vmem:[#allocation3 + $0x1c8] sm:$0xff] %v3954_v17 }
 0x516   :  { %4018 = vst [vmem:[#allocation3 + $0x1c0] sm:$0xff] %v3953_v54 }
 0x528   :  { %v4772_v47 = vpop.f32.mrb[26].mxu1 }
 0x529   :  { %v3874_v63 = vadd.f32 %v7591_v13, %v4772_v47  ;;  %v3868_v14 = vpop.f32.mrb[27].mxu1 }
 0x52a   :  { %v3869_v5 = vadd.f32 %v7591_v13, %v3868_v14 }
 0x52b   :  { %v3956_v27 = vmax.f32 %v3874_v63, 0.0 }
 0x52c   :  { %v3955_v31 = vmax.f32 %v3869_v5, 0.0 }
 0x52d   :  { %4021 = vst [vmem:[#allocation3 + $0x1d8] sm:$0xff] %v3956_v27 }
 0x52e   :  { %4020 = vst [vmem:[#allocation3 + $0x1d0] sm:$0xff] %v3955_v31 }
 0x540   :  { %v4775_v35 = vpop.f32.mrb[28].mxu1 }
 0x541   :  { %v3884_v6 = vadd.f32 %v7591_v13, %v4775_v35  ;;  %v3878_v12 = vpop.f32.mrb[29].mxu1 }
 0x542   :  { %v3879_v33 = vadd.f32 %v7591_v13, %v3878_v12 }
 0x543   :  { %v3958_v20 = vmax.f32 %v3884_v6, 0.0 }
 0x544   :  { %v3957_v36 = vmax.f32 %v3879_v33, 0.0 }
 0x545   :  { %4023 = vst [vmem:[#allocation3 + $0x1e8] sm:$0xff] %v3958_v20 }
 0x546   :  { %4022 = vst [vmem:[#allocation3 + $0x1e0] sm:$0xff] %v3957_v36 }
 0x54d   :  { %v4778_v55 = vpop.f32.mrb[30].mxu1 }
 0x54e   :  { %v3894_v37 = vadd.f32 %v7591_v13, %v4778_v55  ;;  %v3888_v59 = vpop.f32.mrb[31].mxu1 }
 0x54f   :  { %v3889_v38 = vadd.f32 %v7591_v13, %v3888_v59 }
 0x550   :  { %v3960_v40 = vmax.f32 %v3894_v37, 0.0 }
 0x551   :  { %v3959_v48 = vmax.f32 %v3889_v38, 0.0 }
 0x552   :  { %4025 = vst [vmem:[#allocation3 + $0x1f8] sm:$0xff] %v3960_v40 }
 0x553   :  { %4024 = vst [vmem:[#allocation3 + $0x1f0] sm:$0xff] %v3959_v48 }
 0x554   :  { %4827 = shalt.err (!%p4824_p4)
}
 0x555   :  { %s4828_s20 = scalar_lea.hbm %s7703_s3, 8192 }
 0x556   :  { %p4829_p5 = scmp.ne.s32.totalorder %s7703_s3, %s4828_s20  ;;  %p4832_p6 = scmp.lt.u32.totalorder %s4828_s20, %s7703_s3 }
 0x558   :  { %p4834_p7 = pnand %p4832_p6, %p4829_p5 }
 0x55a   :  { %4837 = shalt.err (!%p4834_p7)
}
 0x55b   :  { %s4849_s28 = smov 128  }
 0x55c   :  { %4037 = dma.vmem_to_hbm [thread:$0]  %s4032_s22, 8192, %s7703_s3, [#allocation4], %s4849_s28, %s4849_s28, %s4840_s16  }
 0x55d   :  { %4838 = dma.done.wait [#allocation4], 8192  }
 0x55e   :  { %4839 = vsyncadd [#allocation4], 4294959104 }
 0x55f   :  { %4041 = vsyncpa [#allocation4], 1 }

</bundles_post_ra>
